<compile_context>
chip_gen: v5e
topology: v5e:2x2
jax: 0.10.0
libtpu: 0.0.40
codegen_flags: <defaults>
</compile_context>

<pallas_src>
import functools

import jax
import jax.numpy as jnp
import numpy as np
from jax import lax
from jax.experimental import pallas as pl
from jax.experimental.pallas import tpu as pltpu

# ----------------------------- model config --------------------------------
# Concrete small ModelConfig consistent with the PyTorch module's __init__.
ENCODER_LAYERS = [
    dict(in_channels=4, out_channels=8, kernel_size=3, stride=2, padding=1,
         activation="relu"),
    dict(in_channels=8, out_channels=16, kernel_size=3, stride=2, padding=1,
         activation="relu"),
]
DECODER_LAYERS = [
    dict(in_channels=16, out_channels=8, kernel_size=3, stride=2, padding=1,
         output_padding=1, activation="relu"),
    dict(in_channels=8, out_channels=4, kernel_size=3, stride=2, padding=1,
         output_padding=1, activation="sigmoid"),
]
ACTIVATIONS = tuple(c["activation"] for c in ENCODER_LAYERS) + \
              tuple(c["activation"] for c in DECODER_LAYERS)

M_TILE = 256    # MXU-filling M tile (v6e/v7x MXU is 2 x 256x256)
M_ALIGN = 16    # bf16 packs 2 rows per sublane -> 16-row alignment is free


# ----------------------------- Pallas kernel --------------------------------
def _fused_autoencoder_kernel(*refs, acts, approx_recip):
    """refs = (x_tile, W_1..W_L, b_1..b_L, out_tile).

    One MXU matmul + f32 bias/activation epilogue per layer; intermediates never
    leave the core.  Weights/biases are full-array VMEM-resident (no pipelining);
    only the M tile of x / out is pipelined by the grid.
    """
    n = len(acts)
    x_ref = refs[0]
    w_refs = refs[1:1 + n]
    b_refs = refs[1 + n:1 + 2 * n]
    o_ref = refs[1 + 2 * n]

    h = x_ref[...]
    for w_ref, b_ref, act in zip(w_refs, b_refs, acts):
        # Cast the LHS to THIS layer's weight dtype (robust under mixed precision);
        # accumulate in f32 on the MXU.
        acc = jnp.dot(h.astype(w_ref.dtype), w_ref[...],
                      preferred_element_type=jnp.float32)
        acc = acc + b_ref[...]                       # (TM, n_out) + (1, n_out), f32
        if act == "relu":
            acc = jnp.maximum(acc, 0.0)
        elif act == "sigmoid":
            # exp on EUP; (approximate) reciprocal also rides the EUP slot.
            acc = pl.reciprocal(1.0 + jnp.exp(-acc), approx=approx_recip)
        else:
            raise ValueError(f"Unknown activation key {act}")
        h = acc                                      # kept f32 between layers
    # NOTE: padded rows (zero inputs) also flow through bias/sigmoid and produce
    # nonzero garbage here — harmless, they are sliced off by the wrapper.
    o_ref[...] = h.astype(o_ref.dtype)


@functools.partial(jax.jit, static_argnames=("approx_sigmoid",))
def fused_autoencoder_forward(mats, biases, x, *, approx_sigmoid=True):
    """x: (N, C, H, W) float32, NCHW (PyTorch layout). Returns the same shape."""
    N = x.shape[0]
    cdtype = mats[0].dtype
    n_in = mats[0].shape[0]
    n_out = mats[-1].shape[1]

    # Pad rows: 16-alignment for bf16 row packing; 256-row tiles once batched so
    # each MXU pass is filled and both v7x TensorCores get work.
    m_pad = max(M_ALIGN, -(-N // M_ALIGN) * M_ALIGN)
    if m_pad > M_TILE:
        tm = M_TILE
        m_pad = -(-m_pad // M_TILE) * M_TILE
    else:
        tm = m_pad
    grid = (m_pad // tm,)

    # Flatten NCHW -> (N, C*H*W); padding rows are discarded after the kernel.
    x_flat = x.reshape(N, n_in).astype(cdtype)
    x_flat = jnp.pad(x_flat, ((0, m_pad - N), (0, 0)))

    # Weights/biases: whole-array VMEM residents (single copy, no double buffer).
    vmem_full = pl.BlockSpec(memory_space=pltpu.MemorySpace.VMEM)
    in_specs = ([pl.BlockSpec((tm, n_in), lambda i: (i, 0))]
                + [vmem_full] * (2 * len(mats)))

    kernel = functools.partial(
        _fused_autoencoder_kernel,
        acts=ACTIVATIONS,
        approx_recip=approx_sigmoid,
    )
    out_flat = pl.pallas_call(
        kernel,
        out_shape=jax.ShapeDtypeStruct((m_pad, n_out), jnp.float32),
        grid=grid,
        in_specs=in_specs,
        out_specs=pl.BlockSpec((tm, n_out), lambda i: (i, 0)),
        compiler_params=pltpu.CompilerParams(
            dimension_semantics=("parallel",),
            vmem_limit_bytes=32 * 1024 * 1024,
        ),
    )(x_flat, *mats, *biases)
    return out_flat[:N].reshape(x.shape)


# --------------------- one-time parameter repacking -------------------------
def _conv_layer_fn(w, stride, padding):
    def f(v):  # v: (B, C, H, W)
        return lax.conv_general_dilated(
            v, w, (stride, stride), [(padding, padding)] * 2,
            dimension_numbers=("NCHW", "OIHW", "NCHW"))
    return f


def _deconv_layer_fn(w, stride, padding, output_padding):
    k = w.shape[-1]
    w_conv = jnp.transpose(w, (1, 0, 2, 3))[:, :, ::-1, ::-1]
    lo = k - 1 - padding
    hi = k - 1 - padding + output_padding
    def f(v):  # exact PyTorch ConvTranspose2d semantics (incl. output_padding)
        return lax.conv_general_dilated(
            v, w_conv, (1, 1), [(lo, hi)] * 2, lhs_dilation=(stride, stride),
            dimension_numbers=("NCHW", "OIHW", "NCHW"))
    return f


def _linearize(layer_fn, in_chw):
    """Dense flat operator T with  flat_out = flat_in @ T  (bias excluded)."""
    C, H, W = in_chw
    n_in = C * H * W
    basis = jnp.eye(n_in, dtype=jnp.float32).reshape(n_in, C, H, W)
    out = layer_fn(basis)                      # (n_in, Co, Ho, Wo)
    out_chw = tuple(int(d) for d in out.shape[1:])
    return out.reshape(n_in, -1), out_chw


def _flat_bias(b, out_chw):
    return jnp.broadcast_to(b[:, None, None], out_chw).reshape(1, -1).astype(jnp.float32)


def prepare_operators(params, input_chw, compute_dtype=jnp.bfloat16):
    """One-time weight repacking (NOT part of the per-call forward).

    Turns each conv / conv-transpose layer into a dense flat-feature operator by
    applying the reference lowering to an identity basis, so operators reproduce
    PyTorch semantics by construction.  bf16 is the production dtype on ALL
    generations (v5e/v6e/v7x MXUs take bf16 with f32 accumulation); f32 is kept
    only as a strict-verification mode.  Biases stay f32.
    """
    mats, biases = [], []
    shape = tuple(input_chw)
    for cfg, (w, b) in zip(ENCODER_LAYERS, params["encoder"]):
        T, shape = _linearize(_conv_layer_fn(w, cfg["stride"], cfg["padding"]), shape)
        mats.append(T.astype(compute_dtype))
        biases.append(_flat_bias(b, shape))
    for cfg, (w, b) in zip(DECODER_LAYERS, params["decoder"]):
        fn = _deconv_layer_fn(w, cfg["stride"], cfg["padding"], cfg["output_padding"])
        T, shape = _linearize(fn, shape)
        mats.append(T.astype(compute_dtype))
        biases.append(_flat_bias(b, shape))
    return tuple(mats), tuple(biases)


# --------------------------- params & reference ------------------------------
def init_params(key):
    params = {"encoder": [], "decoder": []}
    for cfg in ENCODER_LAYERS:
        key, wk, bk = jax.random.split(key, 3)
        k = cfg["kernel_size"]
        bound = 1.0 / np.sqrt(cfg["in_channels"] * k * k)
        w = jax.random.uniform(wk, (cfg["out_channels"], cfg["in_channels"], k, k),
                               minval=-bound, maxval=bound, dtype=jnp.float32)
        b = jax.random.uniform(bk, (cfg["out_channels"],),
                               minval=-bound, maxval=bound, dtype=jnp.float32)
        params["encoder"].append((w, b))
    for cfg in DECODER_LAYERS:
        key, wk, bk = jax.random.split(key, 3)
        k = cfg["kernel_size"]
        bound = 1.0 / np.sqrt(cfg["in_channels"] * k * k)
        w = jax.random.uniform(wk, (cfg["in_channels"], cfg["out_channels"], k, k),
                               minval=-bound, maxval=bound, dtype=jnp.float32)
        b = jax.random.uniform(bk, (cfg["out_channels"],),
                               minval=-bound, maxval=bound, dtype=jnp.float32)
        params["decoder"].append((w, b))
    return params


def reference_forward(params, x):
    """Pure-JAX reference (lax convolutions, PyTorch-equivalent semantics)."""
    def act(y, a):
        return jnp.maximum(y, 0.0) if a == "relu" else jax.nn.sigmoid(y)

    for cfg, (w, b) in zip(ENCODER_LAYERS, params["encoder"]):
        y = lax.conv_general_dilated(
            x, w, (cfg["stride"],) * 2, [(cfg["padding"],) * 2] * 2,
            dimension_numbers=("NCHW", "OIHW", "NCHW"))
        x = act(y + b.reshape(1, -1, 1, 1), cfg["activation"])
    for cfg, (w, b) in zip(DECODER_LAYERS, params["decoder"]):
        k, s, p, op = (cfg["kernel_size"], cfg["stride"], cfg["padding"],
                       cfg["output_padding"])
        w_conv = jnp.transpose(w, (1, 0, 2, 3))[:, :, ::-1, ::-1]
        y = lax.conv_general_dilated(
            x, w_conv, (1, 1), [(k - 1 - p, k - 1 - p + op)] * 2,
            lhs_dilation=(s, s), dimension_numbers=("NCHW", "OIHW", "NCHW"))
        x = act(y + b.reshape(1, -1, 1, 1), cfg["activation"])
    return x


if __name__ == "__main__":
    key = jax.random.PRNGKey(0)
    pkey, xkey, bkey = jax.random.split(key, 3)
    params = init_params(pkey)

    # Small shapes consistent with the module (NCHW).
    x = jax.random.normal(xkey, (2, 4, 16, 16), dtype=jnp.float32)
    ref = reference_forward(params, x)

    # Production path: bf16 weight operators on all generations, EUP approx sigmoid.
    mats16, biases16 = prepare_operators(params, x.shape[1:], compute_dtype=jnp.bfloat16)
    out16 = jax.block_until_ready(fused_autoencoder_forward(mats16, biases16, x))
    assert out16.shape == (2, 4, 16, 16), out16.shape
    np.testing.assert_allclose(np.asarray(out16), np.asarray(ref),
                               atol=2e-2, rtol=2e-2)

    # Strict verification path: f32 operators + exact reciprocal.
    mats32, biases32 = prepare_operators(params, x.shape[1:], compute_dtype=jnp.float32)
    out32 = jax.block_until_ready(
        fused_autoencoder_forward(mats32, biases32, x, approx_sigmoid=False))
    assert out32.shape == (2, 4, 16, 16), out32.shape
    np.testing.assert_allclose(np.asarray(out32), np.asarray(ref),
                               atol=1e-4, rtol=1e-4)

    # Amortized / batched path: larger M exercises the 256-row MXU tiles, the
    # ("parallel",) grid (both v7x TensorCores) and M padding (384 -> 512, 2 tiles).
    xb = jax.random.normal(bkey, (384, 4, 16, 16), dtype=jnp.float32)
    refb = reference_forward(params, xb)
    outb = jax.block_until_ready(fused_autoencoder_forward(mats16, biases16, xb))
    assert outb.shape == (384, 4, 16, 16), outb.shape
    np.testing.assert_allclose(np.asarray(outb), np.asarray(refb),
                               atol=3e-2, rtol=3e-2)

    print("KERNEL_OK")
</pallas_src>

<mosaic_0001>
module attributes {stable_mosaic.version = 11 : i64} {
  func.func @_fused_autoencoder_kernel(%arg0: i32, %arg1: memref<16x1024xbf16, #tpu.memory_space<vmem>>, %arg2: memref<1024x512xbf16, #tpu.memory_space<vmem>>, %arg3: memref<512x256xbf16, #tpu.memory_space<vmem>>, %arg4: memref<256x512xbf16, #tpu.memory_space<vmem>>, %arg5: memref<512x1024xbf16, #tpu.memory_space<vmem>>, %arg6: memref<1x512xf32, #tpu.memory_space<vmem>>, %arg7: memref<1x256xf32, #tpu.memory_space<vmem>>, %arg8: memref<1x512xf32, #tpu.memory_space<vmem>>, %arg9: memref<1x1024xf32, #tpu.memory_space<vmem>>, %arg10: memref<16x1024xf32, #tpu.memory_space<vmem>>) attributes {dimension_semantics = [#tpu.dimension_semantics<parallel>], iteration_bounds = array<i64: 1>, scalar_prefetch = 0 : i64, scratch_operands = 0 : i64, tpu.core_type = #tpu.core_type<tc>, window_params = [{transform_indices = @transform_0, window_bounds = array<i64: 16, 1024>}, {pipeline_mode = #tpu.pipeline_mode<synchronous>, transform_indices = @transform_1, window_bounds = array<i64: 1024, 512>}, {pipeline_mode = #tpu.pipeline_mode<synchronous>, transform_indices = @transform_2, window_bounds = array<i64: 512, 256>}, {pipeline_mode = #tpu.pipeline_mode<synchronous>, transform_indices = @transform_3, window_bounds = array<i64: 256, 512>}, {pipeline_mode = #tpu.pipeline_mode<synchronous>, transform_indices = @transform_4, window_bounds = array<i64: 512, 1024>}, {pipeline_mode = #tpu.pipeline_mode<synchronous>, transform_indices = @transform_5, window_bounds = array<i64: 1, 512>}, {pipeline_mode = #tpu.pipeline_mode<synchronous>, transform_indices = @transform_6, window_bounds = array<i64: 1, 256>}, {pipeline_mode = #tpu.pipeline_mode<synchronous>, transform_indices = @transform_7, window_bounds = array<i64: 1, 512>}, {pipeline_mode = #tpu.pipeline_mode<synchronous>, transform_indices = @transform_8, window_bounds = array<i64: 1, 1024>}, {transform_indices = @transform_9, window_bounds = array<i64: 16, 1024>}]} {
    %c0 = arith.constant 0 : index
    %c0_0 = arith.constant 0 : index
    %0 = vector.load %arg1[%c0, %c0_0] : memref<16x1024xbf16, #tpu.memory_space<vmem>>, vector<16x1024xbf16>
    %c0_1 = arith.constant 0 : index
    %c0_2 = arith.constant 0 : index
    %1 = vector.load %arg2[%c0_1, %c0_2] : memref<1024x512xbf16, #tpu.memory_space<vmem>>, vector<1024x512xbf16>
    %cst = arith.constant dense<0.000000e+00> : vector<16x512xf32>
    %2 = tpu.matmul %0, %1, %cst {dimension_numbers = #tpu.dot_dimension_numbers<[1], [0], [0], [1], [0, 0, 1, 1], [], []>} : vector<16x1024xbf16>, vector<1024x512xbf16>, vector<16x512xf32> -> vector<16x512xf32>
    %c0_3 = arith.constant 0 : index
    %c0_4 = arith.constant 0 : index
    %3 = vector.load %arg6[%c0_3, %c0_4] : memref<1x512xf32, #tpu.memory_space<vmem>>, vector<1x512xf32>
    %4 = vector.broadcast %3 : vector<1x512xf32> to vector<16x512xf32>
    %5 = arith.addf %2, %4 : vector<16x512xf32>
    %cst_5 = arith.constant 0.000000e+00 : f32
    %6 = vector.broadcast %cst_5 : f32 to vector<16x512xf32>
    %7 = arith.maximumf %5, %6 : vector<16x512xf32>
    %8 = arith.truncf %7 : vector<16x512xf32> to vector<16x512xbf16>
    %c0_6 = arith.constant 0 : index
    %c0_7 = arith.constant 0 : index
    %9 = vector.load %arg3[%c0_6, %c0_7] : memref<512x256xbf16, #tpu.memory_space<vmem>>, vector<512x256xbf16>
    %cst_8 = arith.constant dense<0.000000e+00> : vector<16x256xf32>
    %10 = tpu.matmul %8, %9, %cst_8 {dimension_numbers = #tpu.dot_dimension_numbers<[1], [0], [0], [1], [0, 0, 1, 1], [], []>} : vector<16x512xbf16>, vector<512x256xbf16>, vector<16x256xf32> -> vector<16x256xf32>
    %c0_9 = arith.constant 0 : index
    %c0_10 = arith.constant 0 : index
    %11 = vector.load %arg7[%c0_9, %c0_10] : memref<1x256xf32, #tpu.memory_space<vmem>>, vector<1x256xf32>
    %12 = vector.broadcast %11 : vector<1x256xf32> to vector<16x256xf32>
    %13 = arith.addf %10, %12 : vector<16x256xf32>
    %cst_11 = arith.constant 0.000000e+00 : f32
    %14 = vector.broadcast %cst_11 : f32 to vector<16x256xf32>
    %15 = arith.maximumf %13, %14 : vector<16x256xf32>
    %16 = arith.truncf %15 : vector<16x256xf32> to vector<16x256xbf16>
    %c0_12 = arith.constant 0 : index
    %c0_13 = arith.constant 0 : index
    %17 = vector.load %arg4[%c0_12, %c0_13] : memref<256x512xbf16, #tpu.memory_space<vmem>>, vector<256x512xbf16>
    %cst_14 = arith.constant dense<0.000000e+00> : vector<16x512xf32>
    %18 = tpu.matmul %16, %17, %cst_14 {dimension_numbers = #tpu.dot_dimension_numbers<[1], [0], [0], [1], [0, 0, 1, 1], [], []>} : vector<16x256xbf16>, vector<256x512xbf16>, vector<16x512xf32> -> vector<16x512xf32>
    %c0_15 = arith.constant 0 : index
    %c0_16 = arith.constant 0 : index
    %19 = vector.load %arg8[%c0_15, %c0_16] : memref<1x512xf32, #tpu.memory_space<vmem>>, vector<1x512xf32>
    %20 = vector.broadcast %19 : vector<1x512xf32> to vector<16x512xf32>
    %21 = arith.addf %18, %20 : vector<16x512xf32>
    %cst_17 = arith.constant 0.000000e+00 : f32
    %22 = vector.broadcast %cst_17 : f32 to vector<16x512xf32>
    %23 = arith.maximumf %21, %22 : vector<16x512xf32>
    %24 = arith.truncf %23 : vector<16x512xf32> to vector<16x512xbf16>
    %c0_18 = arith.constant 0 : index
    %c0_19 = arith.constant 0 : index
    %25 = vector.load %arg5[%c0_18, %c0_19] : memref<512x1024xbf16, #tpu.memory_space<vmem>>, vector<512x1024xbf16>
    %cst_20 = arith.constant dense<0.000000e+00> : vector<16x1024xf32>
    %26 = tpu.matmul %24, %25, %cst_20 {dimension_numbers = #tpu.dot_dimension_numbers<[1], [0], [0], [1], [0, 0, 1, 1], [], []>} : vector<16x512xbf16>, vector<512x1024xbf16>, vector<16x1024xf32> -> vector<16x1024xf32>
    %c0_21 = arith.constant 0 : index
    %c0_22 = arith.constant 0 : index
    %27 = vector.load %arg9[%c0_21, %c0_22] : memref<1x1024xf32, #tpu.memory_space<vmem>>, vector<1x1024xf32>
    %28 = vector.broadcast %27 : vector<1x1024xf32> to vector<16x1024xf32>
    %29 = arith.addf %26, %28 : vector<16x1024xf32>
    %cst_23 = arith.constant 0.000000e+00 : f32
    %30 = vector.broadcast %cst_23 : f32 to vector<16x1024xf32>
    %31 = arith.subf %30, %29 : vector<16x1024xf32>
    %32 = math.exp %31 : vector<16x1024xf32>
    %cst_24 = arith.constant 1.000000e+00 : f32
    %33 = vector.broadcast %cst_24 : f32 to vector<16x1024xf32>
    %34 = arith.addf %33, %32 : vector<16x1024xf32>
    %35 = tpu.reciprocal %34 {approx = true} : vector<16x1024xf32> -> vector<16x1024xf32>
    %c0_25 = arith.constant 0 : index
    %c0_26 = arith.constant 0 : index
    %36 = vector.load %arg10[%c0_25, %c0_26] : memref<16x1024xf32, #tpu.memory_space<vmem>>, vector<16x1024xf32>
    tpu.vector_store %arg10[%c0_25, %c0_26], %35 {strides = array<i32>} : memref<16x1024xf32, #tpu.memory_space<vmem>>, vector<16x1024xf32>,
    return
  }
  func.func @transform_0(%arg0: i32) -> (i32, i32) {
    %c0_i32 = arith.constant 0 : i32
    %c0_i32_0 = arith.constant 0 : i32
    return %arg0, %c0_i32 : i32, i32
  }
  func.func @transform_1(%arg0: i32) -> (i32, i32) {
    %c0_i32 = arith.constant 0 : i32
    %c0_i32_0 = arith.constant 0 : i32
    %c0_i32_1 = arith.constant 0 : i32
    return %c0_i32, %c0_i32_0 : i32, i32
  }
  func.func @transform_2(%arg0: i32) -> (i32, i32) {
    %c0_i32 = arith.constant 0 : i32
    %c0_i32_0 = arith.constant 0 : i32
    %c0_i32_1 = arith.constant 0 : i32
    return %c0_i32, %c0_i32_0 : i32, i32
  }
  func.func @transform_3(%arg0: i32) -> (i32, i32) {
    %c0_i32 = arith.constant 0 : i32
    %c0_i32_0 = arith.constant 0 : i32
    %c0_i32_1 = arith.constant 0 : i32
    return %c0_i32, %c0_i32_0 : i32, i32
  }
  func.func @transform_4(%arg0: i32) -> (i32, i32) {
    %c0_i32 = arith.constant 0 : i32
    %c0_i32_0 = arith.constant 0 : i32
    %c0_i32_1 = arith.constant 0 : i32
    return %c0_i32, %c0_i32_0 : i32, i32
  }
  func.func @transform_5(%arg0: i32) -> (i32, i32) {
    %c0_i32 = arith.constant 0 : i32
    %c0_i32_0 = arith.constant 0 : i32
    %c0_i32_1 = arith.constant 0 : i32
    return %c0_i32, %c0_i32_0 : i32, i32
  }
  func.func @transform_6(%arg0: i32) -> (i32, i32) {
    %c0_i32 = arith.constant 0 : i32
    %c0_i32_0 = arith.constant 0 : i32
    %c0_i32_1 = arith.constant 0 : i32
    return %c0_i32, %c0_i32_0 : i32, i32
  }
  func.func @transform_7(%arg0: i32) -> (i32, i32) {
    %c0_i32 = arith.constant 0 : i32
    %c0_i32_0 = arith.constant 0 : i32
    %c0_i32_1 = arith.constant 0 : i32
    return %c0_i32, %c0_i32_0 : i32, i32
  }
  func.func @transform_8(%arg0: i32) -> (i32, i32) {
    %c0_i32 = arith.constant 0 : i32
    %c0_i32_0 = arith.constant 0 : i32
    %c0_i32_1 = arith.constant 0 : i32
    return %c0_i32, %c0_i32_0 : i32, i32
  }
  func.func @transform_9(%arg0: i32) -> (i32, i32) {
    %c0_i32 = arith.constant 0 : i32
    %c0_i32_0 = arith.constant 0 : i32
    return %arg0, %c0_i32 : i32, i32
  }
}

</mosaic_0001>

<bundles_post_ra>
// kernel: fused_autoencoder_forward.1
= control target key start
LH: loop header
LB: loop body
LE: loop exit
PB: predicated region body
PF: predicated region fallthrough
CT: control target
= control target key end

     0   :  { %14 = vsyncpa [#allocation3], 0  ;;  %s9063_s0 = inlined_call_operand.vmem [shape: bf16[16,1024], index: 0, kind: input, shape index: {}]   ;;  %s9064_s1 = inlined_call_operand.hbm [shape: bf16[1024,512], index: 1, kind: input, shape index: {}]   ;;  %s9065_s2 = inlined_call_operand.hbm [shape: bf16[512,256], index: 2, kind: input, shape index: {}]   ;;  %s9066_s3 = inlined_call_operand.hbm [shape: bf16[256,512], index: 3, kind: input, shape index: {}]   ;;  %s9067_s4 = inlined_call_operand.hbm [shape: bf16[512,1024], index: 4, kind: input, shape index: {}]   ;;  %s9068_s5 = inlined_call_operand.vmem [shape: f32[1,512], index: 5, kind: input, shape index: {}]   ;;  %s9069_s6 = inlined_call_operand.vmem [shape: f32[1,256], index: 6, kind: input, shape index: {}]   ;;  %s9070_s7 = inlined_call_operand.vmem [shape: f32[1,512], index: 7, kind: input, shape index: {}]   ;;  %s9071_s8 = inlined_call_operand.vmem [shape: f32[1,1024], index: 8, kind: input, shape index: {}]   ;;  %s9072_s9 = inlined_call_operand.vmem [shape: f32[16,1024], index: 9, kind: output, shape index: {}]  }
   0x1   :  { %15 = vsyncpa [#allocation5], 0  ;;  %s36_s11 = sshll.u32 %s9065_s2, 4  ;;  %s37_s11 = int_to_ptr.hbm [resolvable:$true] %s36_s11 }
   0x2   :  { %16 = vsyncpa [#allocation8], 0  ;;  %s8696_s12 = smov [#allocation4]   ;;  %s23_s16 = sshll.u32 %s9064_s1, 4  ;;  %s24_s16 = int_to_ptr.hbm [resolvable:$true] %s23_s16 }
   0x3   :  { %s38_s13 = sshll.u32 %s8696_s12, 4  ;;  %s8697_s17 = smov 128   ;;  %s39_s13 = int_to_ptr.vmem [resolvable:$true] %s38_s13 }
   0x4   :  { %s8698_s18 = smov 8   ;;  %s8699_s19 = smov [#allocation2]  }
   0x5   :  { %44 = dma.hbm_to_vmem [thread:$0]  %s37_s11, 8192, %s39_s13, [#allocation5], %s8697_s17, %s8697_s17, %s8698_s18  }
   0x6   :  { %s25_s20 = sshll.u32 %s8699_s19, 4  ;;  %s8700_s21 = smov 256   ;;  %s26_s20 = int_to_ptr.vmem [resolvable:$true] %s25_s20 }
   0x7   :  { %s8701_s22 = smov 16   ;;  %s49_s24 = sshll.u32 %s9066_s3, 4  ;;  %s50_s24 = int_to_ptr.hbm [resolvable:$true] %s49_s24 }
   0x8   :  { %31 = dma.hbm_to_vmem [thread:$0]  %s24_s16, 32768, %s26_s20, [#allocation3], %s8700_s21, %s8700_s21, %s8701_s22  }
   0x9   :  { %s8702_s25 = smov [#allocation6]   ;;  %s62_s28 = sshll.u32 %s9067_s4, 4  ;;  %s63_s28 = int_to_ptr.hbm [resolvable:$true] %s62_s28 }
   0xa   :  { %s51_s26 = sshll.u32 %s8702_s25, 4  ;;  %s8703_s29 = smov [#allocation7]   ;;  %s52_s26 = int_to_ptr.vmem [resolvable:$true] %s51_s26 }
   0xb   :  { %57 = dma.hbm_to_vmem [thread:$0]  %s50_s24, 8192, %s52_s26, [#allocation5], %s8700_s21, %s8700_s21, %s8701_s22  }
   0xc   :  { %s64_s30 = sshll.u32 %s8703_s29, 4  ;;  %s8704_s10 = smov 512   ;;  %s65_s30 = int_to_ptr.vmem [resolvable:$true] %s64_s30 }
   0xd   :  { %s8705_s11 = smov 32  }
   0xe   :  { %70 = dma.hbm_to_vmem [thread:$0]  %s63_s28, 32768, %s65_s30, [#allocation8], %s8704_s10, %s8704_s10, %s8705_s11  }
   0xf   :  { %8690 = dma.done.wait [#allocation3], 32768  }
  0x10   :  { %8691 = vsyncadd [#allocation3], 4294934528 }
  0x11   :  { %8692 = dma.done.wait [#allocation5], 16384  }
  0x12   :  { %8693 = vsyncadd [#allocation5], 4294950912 }
  0x13   :  { %8694 = dma.done.wait [#allocation8], 32768  }
  0x14   :  { %8695 = vsyncadd [#allocation8], 4294934528  ;;  %v5426_v0 = vld [vmem:[#allocation2 + $0xe0] sm:$0xf]  ;;  %v7910_v1 = vld [vmem:[#allocation2 + $0xec] sm:$0xf0] }
  0x15   :  { %v5554_v2 = vld [vmem:[#allocation2 + $0x1e0] sm:$0xf]  ;;  %v5427_v3 = vor.u32 %v7910_v1, %v5426_v0  ;;  %v7942_v4 = vld [vmem:[#allocation2 + $0x1ec] sm:$0xf0] }
  0x16   :  { %v5682_v5 = vld [vmem:[#allocation2 + $0x2e0] sm:$0xf]  ;;  %v7974_v6 = vld [vmem:[#allocation2 + $0x2ec] sm:$0xf0]  ;;  %v5555_v7 = vor.u32 %v7942_v4, %v5554_v2 }
  0x17   :  { %v5683_v8 = vor.u32 %v7974_v6, %v5682_v5  ;;  %v5810_v9 = vld [vmem:[#allocation2 + $0x3e0] sm:$0xf]  ;;  %v8006_v10 = vld [vmem:[#allocation2 + $0x3ec] sm:$0xf0]  ;;  %1689 = vmatpush.bf16.msra.mxu0 %v5427_v3 }
  0x18   :  { %v5410_v11 = vld [vmem:[#allocation2 + $0xc0] sm:$0xf]  ;;  %v5811_v12 = vor.u32 %v8006_v10, %v5810_v9  ;;  %v7906_v13 = vld [vmem:[#allocation2 + $0xcc] sm:$0xf0]  ;;  %1703 = vmatpush.bf16.msra.mxu1 %v5555_v7 }
  0x19   :  { %v5538_v14 = vld [vmem:[#allocation2 + $0x1c0] sm:$0xf]  ;;  %v7938_v15 = vld [vmem:[#allocation2 + $0x1cc] sm:$0xf0]  ;;  %1717 = vmatpush.bf16.msra.mxu2 %v5683_v8  ;;  %v5411_v16 = vor.u32 %v7906_v13, %v5410_v11 }
  0x1a   :  { %v5539_v17 = vor.u32 %v7938_v15, %v5538_v14  ;;  %v5666_v18 = vld [vmem:[#allocation2 + $0x2c0] sm:$0xf]  ;;  %v7970_v19 = vld [vmem:[#allocation2 + $0x2cc] sm:$0xf0]  ;;  %1731 = vmatpush.bf16.msra.mxu3 %v5811_v12 }
  0x1b   :  { %v5794_v20 = vld [vmem:[#allocation2 + $0x3c0] sm:$0xf]  ;;  %v5667_v21 = vor.u32 %v7970_v19, %v5666_v18  ;;  %v8002_v22 = vld [vmem:[#allocation2 + $0x3cc] sm:$0xf0]  ;;  %1690 = vmatpush.bf16.msra.mxu0 %v5411_v16 }
  0x1c   :  { %v5394_v23 = vld [vmem:[#allocation2 + $0xa0] sm:$0xf]  ;;  %v7902_v24 = vld [vmem:[#allocation2 + $0xac] sm:$0xf0]  ;;  %v5795_v25 = vor.u32 %v8002_v22, %v5794_v20  ;;  %1704 = vmatpush.bf16.msra.mxu1 %v5539_v17 }
  0x1d   :  { %v5522_v26 = vld [vmem:[#allocation2 + $0x1a0] sm:$0xf]  ;;  %v7934_v27 = vld [vmem:[#allocation2 + $0x1ac] sm:$0xf0]  ;;  %v5395_v29 = vor.u32 %v7902_v24, %v5394_v23  ;;  %1718 = vmatpush.bf16.msra.mxu2 %v5667_v21 }
  0x1e   :  { %v5650_v28 = vld [vmem:[#allocation2 + $0x2a0] sm:$0xf]  ;;  %v7966_v30 = vld [vmem:[#allocation2 + $0x2ac] sm:$0xf0]  ;;  %v5523_v33 = vor.u32 %v7934_v27, %v5522_v26  ;;  %1732 = vmatpush.bf16.msra.mxu3 %v5795_v25 }
  0x1f   :  { %v5778_v31 = vld [vmem:[#allocation2 + $0x3a0] sm:$0xf]  ;;  %v7998_v32 = vld [vmem:[#allocation2 + $0x3ac] sm:$0xf0]  ;;  %v5651_v34 = vor.u32 %v7966_v30, %v5650_v28  ;;  %1691 = vmatpush.bf16.msra.mxu0 %v5395_v29 }
  0x20   :  { %v5378_v35 = vld [vmem:[#allocation2 + $0x80] sm:$0xf]  ;;  %v7898_v36 = vld [vmem:[#allocation2 + $0x8c] sm:$0xf0]  ;;  %v5779_v38 = vor.u32 %v7998_v32, %v5778_v31  ;;  %1705 = vmatpush.bf16.msra.mxu1 %v5523_v33 }
  0x21   :  { %v5506_v37 = vld [vmem:[#allocation2 + $0x180] sm:$0xf]  ;;  %v7930_v39 = vld [vmem:[#allocation2 + $0x18c] sm:$0xf0]  ;;  %v5379_v44 = vor.u32 %v7898_v36, %v5378_v35  ;;  %1719 = vmatpush.bf16.msra.mxu2 %v5651_v34 }
  0x22   :  { %v5634_v40 = vld [vmem:[#allocation2 + $0x280] sm:$0xf]  ;;  %v7962_v41 = vld [vmem:[#allocation2 + $0x28c] sm:$0xf0]  ;;  %v5507_v45 = vor.u32 %v7930_v39, %v5506_v37  ;;  %1733 = vmatpush.bf16.msra.mxu3 %v5779_v38 }
  0x23   :  { %v5762_v42 = vld [vmem:[#allocation2 + $0x380] sm:$0xf]  ;;  %v7994_v43 = vld [vmem:[#allocation2 + $0x38c] sm:$0xf0]  ;;  %v5635_v46 = vor.u32 %v7962_v41, %v5634_v40  ;;  %1692 = vmatpush.bf16.msra.mxu0 %v5379_v44 }
  0x24   :  { %v5362_v47 = vld [vmem:[#allocation2 + $0x60] sm:$0xf]  ;;  %v7894_v48 = vld [vmem:[#allocation2 + $0x6c] sm:$0xf0]  ;;  %v5763_v50 = vor.u32 %v7994_v43, %v5762_v42  ;;  %1706 = vmatpush.bf16.msra.mxu1 %v5507_v45 }
  0x25   :  { %v5490_v49 = vld [vmem:[#allocation2 + $0x160] sm:$0xf]  ;;  %v7926_v51 = vld [vmem:[#allocation2 + $0x16c] sm:$0xf0]  ;;  %v5363_v56 = vor.u32 %v7894_v48, %v5362_v47  ;;  %1720 = vmatpush.bf16.msra.mxu2 %v5635_v46 }
  0x26   :  { %v5618_v52 = vld [vmem:[#allocation2 + $0x260] sm:$0xf]  ;;  %v7958_v53 = vld [vmem:[#allocation2 + $0x26c] sm:$0xf0]  ;;  %v5491_v57 = vor.u32 %v7926_v51, %v5490_v49  ;;  %1734 = vmatpush.bf16.msra.mxu3 %v5763_v50 }
  0x27   :  { %v5746_v54 = vld [vmem:[#allocation2 + $0x360] sm:$0xf]  ;;  %v7990_v55 = vld [vmem:[#allocation2 + $0x36c] sm:$0xf0]  ;;  %v5619_v58 = vor.u32 %v7958_v53, %v5618_v52  ;;  %1693 = vmatpush.bf16.msra.mxu0 %v5363_v56 }
  0x28   :  { %v5346_v59 = vld [vmem:[#allocation2 + $0x40] sm:$0xf]  ;;  %v7890_v60 = vld [vmem:[#allocation2 + $0x4c] sm:$0xf0]  ;;  %v5747_v62 = vor.u32 %v7990_v55, %v5746_v54  ;;  %1707 = vmatpush.bf16.msra.mxu1 %v5491_v57  ;;  %v5290_v54 = vld [vmem:[%s9063_s0 + $0x8] sm:$0xf] }
  0x29   :  { %v5474_v61 = vld [vmem:[#allocation2 + $0x140] sm:$0xf]  ;;  %v7922_v63 = vld [vmem:[#allocation2 + $0x14c] sm:$0xf0]  ;;  %v5347_v4 = vor.u32 %v7890_v60, %v5346_v59  ;;  %1721 = vmatpush.bf16.msra.mxu2 %v5619_v58  ;;  %v7877_v59 = vld [vmem:[%s9063_s0 + $0x24] sm:$0xf0] }
  0x2a   :  { %v5602_v0 = vld [vmem:[#allocation2 + $0x240] sm:$0xf]  ;;  %v7954_v1 = vld [vmem:[#allocation2 + $0x24c] sm:$0xf0]  ;;  %v5475_v5 = vor.u32 %v7922_v63, %v5474_v61  ;;  %1735 = vmatpush.bf16.msra.mxu3 %v5747_v62 }
  0x2b   :  { %v5730_v2 = vld [vmem:[#allocation2 + $0x340] sm:$0xf]  ;;  %v7986_v3 = vld [vmem:[#allocation2 + $0x34c] sm:$0xf0]  ;;  %v5603_v6 = vor.u32 %v7954_v1, %v5602_v0  ;;  %1694 = vmatpush.bf16.msra.mxu0 %v5347_v4  ;;  %v8782_v1 = vor.u32 %v7877_v59, %v5290_v54 }
  0x2c   :  { %v5330_v7 = vld [vmem:[#allocation2 + $0x20] sm:$0xf]  ;;  %v7886_v8 = vld [vmem:[#allocation2 + $0x2c] sm:$0xf0]  ;;  %v5731_v10 = vor.u32 %v7986_v3, %v5730_v2  ;;  %1708 = vmatpush.bf16.msra.mxu1 %v5475_v5 }
  0x2d   :  { %v5458_v9 = vld [vmem:[#allocation2 + $0x120] sm:$0xf]  ;;  %v7918_v11 = vld [vmem:[#allocation2 + $0x12c] sm:$0xf0]  ;;  %v5331_v16 = vor.u32 %v7886_v8, %v5330_v7  ;;  %1722 = vmatpush.bf16.msra.mxu2 %v5603_v6  ;;  %v7872_v6 = vld [vmem:[%s9063_s0 + $0x4] sm:$0xf] }
  0x2e   :  { %v5586_v12 = vld [vmem:[#allocation2 + $0x220] sm:$0xf]  ;;  %v7950_v13 = vld [vmem:[#allocation2 + $0x22c] sm:$0xf0]  ;;  %v5459_v19 = vor.u32 %v7918_v11, %v5458_v9  ;;  %1736 = vmatpush.bf16.msra.mxu3 %v5731_v10  ;;  %v5284_v7 = vld [vmem:[%s9063_s0 + $0x20] sm:$0xf0] }
  0x2f   :  { %v5714_v14 = vld [vmem:[#allocation2 + $0x320] sm:$0xf]  ;;  %v7982_v15 = vld [vmem:[#allocation2 + $0x32c] sm:$0xf0]  ;;  %v5587_v20 = vor.u32 %v7950_v13, %v5586_v12  ;;  %1695 = vmatpush.bf16.msra.mxu0 %v5331_v16  ;;  %v7873_v8 = vld [vmem:[%s9063_s0 + $0xc] sm:$0xf]  ;;  %v8795_v10 = vor.u32 %v7872_v6, %v5284_v7 }
  0x30   :  { %v5314_v17 = vld [vmem:[#allocation2] sm:$0xf]  ;;  %v7882_v18 = vld [vmem:[#allocation2 + $0xc] sm:$0xf0]  ;;  %v5715_v24 = vor.u32 %v7982_v15, %v5714_v14  ;;  %1709 = vmatpush.bf16.msra.mxu1 %v5459_v19  ;;  %v5292_v11 = vld [vmem:[%s9063_s0 + $0x28] sm:$0xf0] }
  0x31   :  { %v5442_v21 = vld [vmem:[#allocation2 + $0x100] sm:$0xf]  ;;  %v7914_v22 = vld [vmem:[#allocation2 + $0x10c] sm:$0xf0]  ;;  %v5315_v31 = vor.u32 %v7882_v18, %v5314_v17  ;;  %1723 = vmatpush.bf16.msra.mxu2 %v5587_v20  ;;  %v8800_v17 = vor.u32 %v7873_v8, %v5292_v11 }
  0x32   :  { %v5570_v23 = vld [vmem:[#allocation2 + $0x200] sm:$0xf]  ;;  %v7946_v25 = vld [vmem:[#allocation2 + $0x20c] sm:$0xf0]  ;;  %v5443_v35 = vor.u32 %v7914_v22, %v5442_v21  ;;  %1737 = vmatpush.bf16.msra.mxu3 %v5715_v24 }
  0x33   :  { %v5698_v26 = vld [vmem:[#allocation2 + $0x300] sm:$0xf]  ;;  %v7978_v27 = vld [vmem:[#allocation2 + $0x30c] sm:$0xf0]  ;;  %v5571_v36 = vor.u32 %v7946_v25, %v5570_v23  ;;  %1696 = vmatpush.bf16.msra.mxu0 %v5315_v31 }
  0x34   :  { %v5938_v28 = vld [vmem:[#allocation2 + $0x4e0] sm:$0xf]  ;;  %v8038_v29 = vld [vmem:[#allocation2 + $0x4ec] sm:$0xf0]  ;;  %v5699_v39 = vor.u32 %v7978_v27, %v5698_v26  ;;  %1710 = vmatpush.bf16.msra.mxu1 %v5443_v35 }
  0x35   :  { %v6066_v30 = vld [vmem:[#allocation2 + $0x5e0] sm:$0xf]  ;;  %v8070_v32 = vld [vmem:[#allocation2 + $0x5ec] sm:$0xf0]  ;;  %v5939_v40 = vor.u32 %v8038_v29, %v5938_v28  ;;  %1724 = vmatpush.bf16.msra.mxu2 %v5571_v36 }
  0x36   :  { %v6194_v33 = vld [vmem:[#allocation2 + $0x6e0] sm:$0xf]  ;;  %v8102_v34 = vld [vmem:[#allocation2 + $0x6ec] sm:$0xf0]  ;;  %v6067_v43 = vor.u32 %v8070_v32, %v6066_v30  ;;  %1738 = vmatpush.bf16.msra.mxu3 %v5699_v39 }
  0x37   :  { %v6322_v37 = vld [vmem:[#allocation2 + $0x7e0] sm:$0xf]  ;;  %v8134_v38 = vld [vmem:[#allocation2 + $0x7ec] sm:$0xf0]  ;;  %v6195_v44 = vor.u32 %v8102_v34, %v6194_v33  ;;  %1745 = vmatpush.bf16.msrb.mxu0 %v5939_v40  ;;  %1711 = vmatmul.bf16.vlgmr.msra.gmra.mxu1 %v8795_v10 }
  0x38   :  { %v5922_v41 = vld [vmem:[#allocation2 + $0x4c0] sm:$0xf]  ;;  %v8034_v42 = vld [vmem:[#allocation2 + $0x4cc] sm:$0xf0]  ;;  %v6323_v48 = vor.u32 %v8134_v38, %v6322_v37  ;;  %1759 = vmatpush.bf16.msrb.mxu1 %v6067_v43  ;;  %1725 = vmatmul.bf16.vlgmr.msra.gmra.mxu2 %v8782_v1 }
  0x39   :  { %v6050_v45 = vld [vmem:[#allocation2 + $0x5c0] sm:$0xf]  ;;  %v8066_v46 = vld [vmem:[#allocation2 + $0x5cc] sm:$0xf0]  ;;  %v5923_v55 = vor.u32 %v8034_v42, %v5922_v41  ;;  %1773 = vmatpush.bf16.msrb.mxu2 %v6195_v44  ;;  %1739 = vmatmul.bf16.vlgmr.msra.gmra.mxu3 %v8800_v17 }
  0x3a   :  { %v6178_v47 = vld [vmem:[#allocation2 + $0x6c0] sm:$0xf]  ;;  %v8098_v49 = vld [vmem:[#allocation2 + $0x6cc] sm:$0xf0]  ;;  %v6051_v60 = vor.u32 %v8066_v46, %v6050_v45  ;;  %1787 = vmatpush.bf16.msrb.mxu3 %v6323_v48 }
  0x3b   :  { %v6306_v50 = vld [vmem:[#allocation2 + $0x7c0] sm:$0xf]  ;;  %v8130_v51 = vld [vmem:[#allocation2 + $0x7cc] sm:$0xf0]  ;;  %v6179_v61 = vor.u32 %v8098_v49, %v6178_v47  ;;  %1746 = vmatpush.bf16.msrb.mxu0 %v5923_v55 }
  0x3c   :  { %v5282_v52 = vld [vmem:[%s9063_s0] sm:$0xf]  ;;  %v8030_v57 = vld [vmem:[#allocation2 + $0x4ac] sm:$0xf0]  ;;  %v6307_v2 = vor.u32 %v8130_v51, %v6306_v50  ;;  %1760 = vmatpush.bf16.msrb.mxu1 %v6051_v60 }
  0x3d   :  { %v7876_v53 = vld [vmem:[%s9063_s0 + $0x1c] sm:$0xf0]  ;;  %v8062_v63 = vld [vmem:[#allocation2 + $0x5ac] sm:$0xf0]  ;;  %1774 = vmatpush.bf16.msrb.mxu2 %v6179_v61 }
  0x3e   :  { %v5906_v56 = vld [vmem:[#allocation2 + $0x4a0] sm:$0xf]  ;;  %v8777_v58 = vor.u32 %v7876_v53, %v5282_v52  ;;  %v8094_v3 = vld [vmem:[#allocation2 + $0x6ac] sm:$0xf0]  ;;  %1788 = vmatpush.bf16.msrb.mxu3 %v6307_v2 }
  0x3f   :  { %v6034_v62 = vld [vmem:[#allocation2 + $0x5a0] sm:$0xf]  ;;  %v8126_v5 = vld [vmem:[#allocation2 + $0x7ac] sm:$0xf0]  ;;  %v5907_v9 = vor.u32 %v8030_v57, %v5906_v56 }
  0x40   :  { %v6162_v0 = vld [vmem:[#allocation2 + $0x6a0] sm:$0xf]  ;;  %1697 = vmatmul.bf16.vlgmr.msra.gmra.mxu0 %v8777_v58  ;;  %v6035_v12 = vor.u32 %v8062_v63, %v6034_v62  ;;  %v8026_v15 = vld [vmem:[#allocation2 + $0x48c] sm:$0xf0] }
  0x41   :  { %v6290_v4 = vld [vmem:[#allocation2 + $0x7a0] sm:$0xf]  ;;  %v6163_v13 = vor.u32 %v8094_v3, %v6162_v0  ;;  %v8058_v19 = vld [vmem:[#allocation2 + $0x58c] sm:$0xf0]  ;;  %1747 = vmatpush.bf16.msrb.mxu0 %v5907_v9  ;;  %v7908_v9 = vld [vmem:[#allocation2 + $0xe4] sm:$0xf] }
  0x42   :  { %v5890_v14 = vld [vmem:[#allocation2 + $0x480] sm:$0xf]  ;;  %v6291_v18 = vor.u32 %v8126_v5, %v6290_v4  ;;  %v8090_v21 = vld [vmem:[#allocation2 + $0x68c] sm:$0xf0]  ;;  %1761 = vmatpush.bf16.msrb.mxu1 %v6035_v12  ;;  %v5428_v12 = vld [vmem:[#allocation2 + $0xf0] sm:$0xf0] }
  0x43   :  { %v6018_v16 = vld [vmem:[#allocation2 + $0x580] sm:$0xf]  ;;  %v8122_v23 = vld [vmem:[#allocation2 + $0x78c] sm:$0xf0]  ;;  %v5891_v24 = vor.u32 %v8026_v15, %v5890_v14  ;;  %1775 = vmatpush.bf16.msrb.mxu2 %v6163_v13  ;;  %v7940_v13 = vld [vmem:[#allocation2 + $0x1e4] sm:$0xf] }
  0x44   :  { %v6146_v20 = vld [vmem:[#allocation2 + $0x680] sm:$0xf]  ;;  %v6019_v25 = vor.u32 %v8058_v19, %v6018_v16  ;;  %v8022_v28 = vld [vmem:[#allocation2 + $0x46c] sm:$0xf0]  ;;  %1789 = vmatpush.bf16.msrb.mxu3 %v6291_v18  ;;  %v5556_v14 = vld [vmem:[#allocation2 + $0x1f0] sm:$0xf0] }
  0x45   :  { %v6274_v22 = vld [vmem:[#allocation2 + $0x780] sm:$0xf]  ;;  %v6147_v26 = vor.u32 %v8090_v21, %v6146_v20  ;;  %v8054_v31 = vld [vmem:[#allocation2 + $0x56c] sm:$0xf0]  ;;  %1748 = vmatpush.bf16.msrb.mxu0 %v5891_v24  ;;  %v7972_v15 = vld [vmem:[#allocation2 + $0x2e4] sm:$0xf] }
  0x46   :  { %v5874_v27 = vld [vmem:[#allocation2 + $0x460] sm:$0xf]  ;;  %v6275_v30 = vor.u32 %v8122_v23, %v6274_v22  ;;  %v8086_v33 = vld [vmem:[#allocation2 + $0x66c] sm:$0xf0]  ;;  %1762 = vmatpush.bf16.msrb.mxu1 %v6019_v25  ;;  %v5684_v16 = vld [vmem:[#allocation2 + $0x2f0] sm:$0xf0] }
  0x47   :  { %v6002_v29 = vld [vmem:[#allocation2 + $0x560] sm:$0xf]  ;;  %v8118_v35 = vld [vmem:[#allocation2 + $0x76c] sm:$0xf0]  ;;  %v5875_v36 = vor.u32 %v8022_v28, %v5874_v27  ;;  %1776 = vmatpush.bf16.msrb.mxu2 %v6147_v26  ;;  %v8004_v18 = vld [vmem:[#allocation2 + $0x3e4] sm:$0xf] }
  0x48   :  { %v6130_v32 = vld [vmem:[#allocation2 + $0x660] sm:$0xf]  ;;  %v6003_v37 = vor.u32 %v8054_v31, %v6002_v29  ;;  %v8018_v40 = vld [vmem:[#allocation2 + $0x44c] sm:$0xf0]  ;;  %1790 = vmatpush.bf16.msrb.mxu3 %v6275_v30  ;;  %v5812_v20 = vld [vmem:[#allocation2 + $0x3f0] sm:$0xf0]  ;;  %v5431_v29 = vor.u32 %v7908_v9, %v5428_v12 }
  0x49   :  { %v6258_v34 = vld [vmem:[#allocation2 + $0x760] sm:$0xf]  ;;  %v6131_v38 = vor.u32 %v8086_v33, %v6130_v32  ;;  %v8050_v43 = vld [vmem:[#allocation2 + $0x54c] sm:$0xf0]  ;;  %1749 = vmatpush.bf16.msrb.mxu0 %v5875_v36  ;;  %v5306_v25 = vld [vmem:[%s9063_s0 + $0x18] sm:$0xf]  ;;  %v5559_v33 = vor.u32 %v7940_v13, %v5556_v14 }
  0x4a   :  { %v5858_v39 = vld [vmem:[#allocation2 + $0x440] sm:$0xf]  ;;  %v6259_v42 = vor.u32 %v8118_v35, %v6258_v34  ;;  %v8082_v45 = vld [vmem:[#allocation2 + $0x64c] sm:$0xf0]  ;;  %1763 = vmatpush.bf16.msrb.mxu1 %v6003_v37  ;;  %v7879_v26 = vld [vmem:[%s9063_s0 + $0x34] sm:$0xf0]  ;;  %v5687_v34 = vor.u32 %v7972_v15, %v5684_v16 }
  0x4b   :  { %v5986_v41 = vld [vmem:[#allocation2 + $0x540] sm:$0xf]  ;;  %v8114_v47 = vld [vmem:[#allocation2 + $0x74c] sm:$0xf0]  ;;  %v5859_v48 = vor.u32 %v8018_v40, %v5858_v39  ;;  %1777 = vmatpush.bf16.msrb.mxu2 %v6131_v38  ;;  %v7874_v27 = vld [vmem:[%s9063_s0 + $0x14] sm:$0xf]  ;;  %v5815_v38 = vor.u32 %v8004_v18, %v5812_v20 }
  0x4c   :  { %v6114_v44 = vld [vmem:[#allocation2 + $0x640] sm:$0xf]  ;;  %v5987_v50 = vor.u32 %v8050_v43, %v5986_v41  ;;  %v8014_v52 = vld [vmem:[#allocation2 + $0x42c] sm:$0xf0]  ;;  %1791 = vmatpush.bf16.msrb.mxu3 %v6259_v42  ;;  %v5300_v30 = vld [vmem:[%s9063_s0 + $0x30] sm:$0xf0]  ;;  %v8830_v43 = vor.u32 %v7879_v26, %v5306_v25 }
  0x4d   :  { %v6242_v46 = vld [vmem:[#allocation2 + $0x740] sm:$0xf]  ;;  %v6115_v51 = vor.u32 %v8082_v45, %v6114_v44  ;;  %v8046_v54 = vld [vmem:[#allocation2 + $0x52c] sm:$0xf0]  ;;  %1750 = vmatpush.bf16.msrb.mxu0 %v5859_v48  ;;  %v7875_v31 = vld [vmem:[%s9063_s0 + $0x1c] sm:$0xf]  ;;  %v8832_v44 = vor.u32 %v7874_v27, %v5300_v30 }
  0x4e   :  { %v5842_v49 = vld [vmem:[#allocation2 + $0x420] sm:$0xf]  ;;  %v6243_v55 = vor.u32 %v8114_v47, %v6242_v46  ;;  %v8078_v57 = vld [vmem:[#allocation2 + $0x62c] sm:$0xf0]  ;;  %1764 = vmatpush.bf16.msrb.mxu1 %v5987_v50  ;;  %v5308_v32 = vld [vmem:[%s9063_s0 + $0x38] sm:$0xf0] }
  0x4f   :  { %v5970_v53 = vld [vmem:[#allocation2 + $0x520] sm:$0xf]  ;;  %v8110_v60 = vld [vmem:[#allocation2 + $0x72c] sm:$0xf0]  ;;  %v5843_v63 = vor.u32 %v8014_v52, %v5842_v49  ;;  %1778 = vmatpush.bf16.msrb.mxu2 %v6115_v51  ;;  %v7904_v35 = vld [vmem:[#allocation2 + $0xc4] sm:$0xf]  ;;  %v8834_v47 = vor.u32 %v7875_v31, %v5308_v32 }
  0x50   :  { %v6098_v56 = vld [vmem:[#allocation2 + $0x620] sm:$0xf]  ;;  %v8010_v62 = vld [vmem:[#allocation2 + $0x40c] sm:$0xf0]  ;;  %v5971_v5 = vor.u32 %v8046_v54, %v5970_v53  ;;  %1792 = vmatpush.bf16.msrb.mxu3 %v6243_v55  ;;  %v5412_v36 = vld [vmem:[#allocation2 + $0xd0] sm:$0xf0] }
  0x51   :  { %v6226_v59 = vld [vmem:[#allocation2 + $0x720] sm:$0xf]  ;;  %v8042_v2 = vld [vmem:[#allocation2 + $0x50c] sm:$0xf0]  ;;  %v6099_v6 = vor.u32 %v8078_v57, %v6098_v56  ;;  %1751 = vmatpush.bf16.msrb.mxu0 %v5843_v63  ;;  %v7936_v37 = vld [vmem:[#allocation2 + $0x1c4] sm:$0xf]  ;;  %v5415_v48 = vor.u32 %v7904_v35, %v5412_v36 }
  0x52   :  { %v5826_v61 = vld [vmem:[#allocation2 + $0x400] sm:$0xf]  ;;  %v8074_v4 = vld [vmem:[#allocation2 + $0x60c] sm:$0xf0]  ;;  %v6227_v11 = vor.u32 %v8110_v60, %v6226_v59  ;;  %1765 = vmatpush.bf16.msrb.mxu1 %v5971_v5  ;;  %v5540_v40 = vld [vmem:[#allocation2 + $0x1d0] sm:$0xf0] }
  0x53   :  { %v5954_v0 = vld [vmem:[#allocation2 + $0x500] sm:$0xf]  ;;  %v8106_v8 = vld [vmem:[#allocation2 + $0x70c] sm:$0xf0]  ;;  %v5827_v19 = vor.u32 %v8010_v62, %v5826_v61  ;;  %1779 = vmatpush.bf16.msrb.mxu2 %v6099_v6  ;;  %v7968_v41 = vld [vmem:[#allocation2 + $0x2c4] sm:$0xf]  ;;  %v5543_v49 = vor.u32 %v7936_v37, %v5540_v40 }
  0x54   :  { %v6082_v3 = vld [vmem:[#allocation2 + $0x600] sm:$0xf]  ;;  %v5298_v21 = vld [vmem:[%s9063_s0 + $0x10] sm:$0xf]  ;;  %v5955_v23 = vor.u32 %v8042_v2, %v5954_v0  ;;  %1793 = vmatpush.bf16.msrb.mxu3 %v6227_v11  ;;  %v5668_v42 = vld [vmem:[#allocation2 + $0x2d0] sm:$0xf0] }
  0x55   :  { %v6210_v7 = vld [vmem:[#allocation2 + $0x700] sm:$0xf]  ;;  %v7878_v22 = vld [vmem:[%s9063_s0 + $0x2c] sm:$0xf0]  ;;  %v6083_v24 = vor.u32 %v8074_v4, %v6082_v3  ;;  %1752 = vmatpush.bf16.msrb.mxu0 %v5827_v19  ;;  %v8000_v45 = vld [vmem:[#allocation2 + $0x3c4] sm:$0xf]  ;;  %v5671_v50 = vor.u32 %v7968_v41, %v5668_v42 }
  0x56   :  { %v6211_v28 = vor.u32 %v8106_v8, %v6210_v7  ;;  %v8828_v39 = vor.u32 %v7878_v22, %v5298_v21  ;;  %1766 = vmatpush.bf16.msrb.mxu1 %v5955_v23  ;;  %v5796_v46 = vld [vmem:[#allocation2 + $0x3d0] sm:$0xf0]  ;;  %v7900_v51 = vld [vmem:[#allocation2 + $0xa4] sm:$0xf] }
  0x57   :  { %1780 = vmatpush.bf16.msrb.mxu2 %v6083_v24  ;;  %v5396_v52 = vld [vmem:[#allocation2 + $0xb0] sm:$0xf0]  ;;  %v7932_v53 = vld [vmem:[#allocation2 + $0x1a4] sm:$0xf]  ;;  %v5799_v54 = vor.u32 %v8000_v45, %v5796_v46 }
  0x58   :  { %1794 = vmatpush.bf16.msrb.mxu3 %v6211_v28  ;;  %1753 = vmatmul.bf16.vlgmr.msrb.gmra.mxu0 %v8828_v39  ;;  %v5524_v55 = vld [vmem:[#allocation2 + $0x1b0] sm:$0xf0]  ;;  %v7964_v56 = vld [vmem:[#allocation2 + $0x2a4] sm:$0xf]  ;;  %v5399_v61 = vor.u32 %v7900_v51, %v5396_v52 }
  0x59   :  { %1801 = vmatpush.bf16.msra.mxu0 %v5431_v29  ;;  %v5652_v57 = vld [vmem:[#allocation2 + $0x2b0] sm:$0xf0]  ;;  %1767 = vmatmul.bf16.vlgmr.msrb.gmra.mxu1 %v8832_v44  ;;  %v7996_v59 = vld [vmem:[#allocation2 + $0x3a4] sm:$0xf]  ;;  %v5527_v62 = vor.u32 %v7932_v53, %v5524_v55 }
  0x5a   :  { %1815 = vmatpush.bf16.msra.mxu1 %v5559_v33  ;;  %1781 = vmatmul.bf16.vlgmr.msrb.gmra.mxu2 %v8830_v43  ;;  %v5780_v60 = vld [vmem:[#allocation2 + $0x3b0] sm:$0xf0]  ;;  %v5655_v63 = vor.u32 %v7964_v56, %v5652_v57  ;;  %v7896_v0 = vld [vmem:[#allocation2 + $0x84] sm:$0xf] }
  0x5b   :  { %1829 = vmatpush.bf16.msra.mxu2 %v5687_v34  ;;  %1795 = vmatmul.bf16.vlgmr.msrb.gmra.mxu3 %v8834_v47  ;;  %v5380_v2 = vld [vmem:[#allocation2 + $0x90] sm:$0xf0]  ;;  %v7928_v3 = vld [vmem:[#allocation2 + $0x184] sm:$0xf]  ;;  %v5783_v4 = vor.u32 %v7996_v59, %v5780_v60 }
  0x5c   :  { %1843 = vmatpush.bf16.msra.mxu3 %v5815_v38  ;;  %v5508_v5 = vld [vmem:[#allocation2 + $0x190] sm:$0xf0]  ;;  %v7960_v6 = vld [vmem:[#allocation2 + $0x284] sm:$0xf]  ;;  %v5383_v11 = vor.u32 %v7896_v0, %v5380_v2 }
  0x5d   :  { %1802 = vmatpush.bf16.msra.mxu0 %v5415_v48  ;;  %v5636_v7 = vld [vmem:[#allocation2 + $0x290] sm:$0xf0]  ;;  %v7992_v8 = vld [vmem:[#allocation2 + $0x384] sm:$0xf]  ;;  %v5511_v12 = vor.u32 %v7928_v3, %v5508_v5 }
  0x5e   :  { %1816 = vmatpush.bf16.msra.mxu1 %v5543_v49  ;;  %v5764_v9 = vld [vmem:[#allocation2 + $0x390] sm:$0xf0]  ;;  %v5639_v13 = vor.u32 %v7960_v6, %v5636_v7  ;;  %v7892_v14 = vld [vmem:[#allocation2 + $0x64] sm:$0xf] }
  0x5f   :  { %1830 = vmatpush.bf16.msra.mxu2 %v5671_v50  ;;  %v5364_v15 = vld [vmem:[#allocation2 + $0x70] sm:$0xf0]  ;;  %v7924_v16 = vld [vmem:[#allocation2 + $0x164] sm:$0xf]  ;;  %v5767_v18 = vor.u32 %v7992_v8, %v5764_v9 }
  0x60   :  { %1844 = vmatpush.bf16.msra.mxu3 %v5799_v54  ;;  %v5492_v19 = vld [vmem:[#allocation2 + $0x170] sm:$0xf0]  ;;  %v7956_v20 = vld [vmem:[#allocation2 + $0x264] sm:$0xf]  ;;  %v5367_v24 = vor.u32 %v7892_v14, %v5364_v15 }
  0x61   :  { %1803 = vmatpush.bf16.msra.mxu0 %v5399_v61  ;;  %v5620_v21 = vld [vmem:[#allocation2 + $0x270] sm:$0xf0]  ;;  %v7988_v22 = vld [vmem:[#allocation2 + $0x364] sm:$0xf]  ;;  %v5495_v25 = vor.u32 %v7924_v16, %v5492_v19 }
  0x62   :  { %1817 = vmatpush.bf16.msra.mxu1 %v5527_v62  ;;  %v5748_v23 = vld [vmem:[#allocation2 + $0x370] sm:$0xf0]  ;;  %v5623_v26 = vor.u32 %v7956_v20, %v5620_v21  ;;  %v7888_v27 = vld [vmem:[#allocation2 + $0x44] sm:$0xf] }
  0x63   :  { %1831 = vmatpush.bf16.msra.mxu2 %v5655_v63  ;;  %v5348_v28 = vld [vmem:[#allocation2 + $0x50] sm:$0xf0]  ;;  %v7920_v29 = vld [vmem:[#allocation2 + $0x144] sm:$0xf]  ;;  %v5751_v30 = vor.u32 %v7988_v22, %v5748_v23 }
  0x64   :  { %1845 = vmatpush.bf16.msra.mxu3 %v5783_v4  ;;  %v5476_v31 = vld [vmem:[#allocation2 + $0x150] sm:$0xf0]  ;;  %v7952_v32 = vld [vmem:[#allocation2 + $0x244] sm:$0xf]  ;;  %v5351_v36 = vor.u32 %v7888_v27, %v5348_v28 }
  0x65   :  { %1804 = vmatpush.bf16.msra.mxu0 %v5383_v11  ;;  %v5604_v33 = vld [vmem:[#allocation2 + $0x250] sm:$0xf0]  ;;  %v7984_v34 = vld [vmem:[#allocation2 + $0x344] sm:$0xf]  ;;  %v5479_v37 = vor.u32 %v7920_v29, %v5476_v31 }
  0x66   :  { %1818 = vmatpush.bf16.msra.mxu1 %v5511_v12  ;;  %v5732_v35 = vld [vmem:[#allocation2 + $0x350] sm:$0xf0]  ;;  %v5607_v38 = vor.u32 %v7952_v32, %v5604_v33  ;;  %v7884_v40 = vld [vmem:[#allocation2 + $0x24] sm:$0xf] }
  0x67   :  { %1832 = vmatpush.bf16.msra.mxu2 %v5639_v13  ;;  %v5332_v41 = vld [vmem:[#allocation2 + $0x30] sm:$0xf0]  ;;  %v7916_v42 = vld [vmem:[#allocation2 + $0x124] sm:$0xf]  ;;  %v5735_v45 = vor.u32 %v7984_v34, %v5732_v35 }
  0x68   :  { %1846 = vmatpush.bf16.msra.mxu3 %v5767_v18  ;;  %v5460_v46 = vld [vmem:[#allocation2 + $0x130] sm:$0xf0]  ;;  %v7948_v48 = vld [vmem:[#allocation2 + $0x224] sm:$0xf]  ;;  %v5335_v52 = vor.u32 %v7884_v40, %v5332_v41 }
  0x69   :  { %1805 = vmatpush.bf16.msra.mxu0 %v5367_v24  ;;  %v5588_v49 = vld [vmem:[#allocation2 + $0x230] sm:$0xf0]  ;;  %v7980_v50 = vld [vmem:[#allocation2 + $0x324] sm:$0xf]  ;;  %v5463_v55 = vor.u32 %v7916_v42, %v5460_v46 }
  0x6a   :  { %1819 = vmatpush.bf16.msra.mxu1 %v5495_v25  ;;  %v5716_v51 = vld [vmem:[#allocation2 + $0x330] sm:$0xf0]  ;;  %v7880_v53 = vld [vmem:[#allocation2 + $0x4] sm:$0xf]  ;;  %v5591_v56 = vor.u32 %v7948_v48, %v5588_v49 }
  0x6b   :  { %1833 = vmatpush.bf16.msra.mxu2 %v5623_v26  ;;  %v5316_v54 = vld [vmem:[#allocation2 + $0x10] sm:$0xf0]  ;;  %v7912_v57 = vld [vmem:[#allocation2 + $0x104] sm:$0xf]  ;;  %v5719_v61 = vor.u32 %v7980_v50, %v5716_v51 }
  0x6c   :  { %1847 = vmatpush.bf16.msra.mxu3 %v5751_v30  ;;  %v5444_v59 = vld [vmem:[#allocation2 + $0x110] sm:$0xf0]  ;;  %v7944_v60 = vld [vmem:[#allocation2 + $0x204] sm:$0xf]  ;;  %v5319_v5 = vor.u32 %v7880_v53, %v5316_v54 }
  0x6d   :  { %1806 = vmatpush.bf16.msra.mxu0 %v5351_v36  ;;  %v5572_v62 = vld [vmem:[#allocation2 + $0x210] sm:$0xf0]  ;;  %v7976_v63 = vld [vmem:[#allocation2 + $0x304] sm:$0xf]  ;;  %v5447_v9 = vor.u32 %v7912_v57, %v5444_v59 }
  0x6e   :  { %1820 = vmatpush.bf16.msra.mxu1 %v5479_v37  ;;  %v5700_v0 = vld [vmem:[#allocation2 + $0x310] sm:$0xf0]  ;;  %v8036_v2 = vld [vmem:[#allocation2 + $0x4e4] sm:$0xf]  ;;  %v5575_v11 = vor.u32 %v7944_v60, %v5572_v62 }
  0x6f   :  { %1834 = vmatpush.bf16.msra.mxu2 %v5607_v38  ;;  %v5940_v3 = vld [vmem:[#allocation2 + $0x4f0] sm:$0xf0]  ;;  %v8068_v4 = vld [vmem:[#allocation2 + $0x5e4] sm:$0xf]  ;;  %v5703_v14 = vor.u32 %v7976_v63, %v5700_v0 }
  0x70   :  { %1848 = vmatpush.bf16.msra.mxu3 %v5735_v45  ;;  %v6068_v6 = vld [vmem:[#allocation2 + $0x5f0] sm:$0xf0]  ;;  %v8100_v7 = vld [vmem:[#allocation2 + $0x6e4] sm:$0xf]  ;;  %v5943_v15 = vor.u32 %v8036_v2, %v5940_v3 }
  0x71   :  { %1807 = vmatpush.bf16.msra.mxu0 %v5335_v52  ;;  %v6196_v8 = vld [vmem:[#allocation2 + $0x6f0] sm:$0xf0]  ;;  %v8132_v12 = vld [vmem:[#allocation2 + $0x7e4] sm:$0xf]  ;;  %v6071_v16 = vor.u32 %v8068_v4, %v6068_v6 }
  0x72   :  { %1821 = vmatpush.bf16.msra.mxu1 %v5463_v55  ;;  %v6324_v13 = vld [vmem:[#allocation2 + $0x7f0] sm:$0xf0]  ;;  %v6199_v18 = vor.u32 %v8100_v7, %v6196_v8  ;;  %v8032_v19 = vld [vmem:[#allocation2 + $0x4c4] sm:$0xf] }
  0x73   :  { %1835 = vmatpush.bf16.msra.mxu2 %v5591_v56  ;;  %v5924_v20 = vld [vmem:[#allocation2 + $0x4d0] sm:$0xf0]  ;;  %v8064_v21 = vld [vmem:[#allocation2 + $0x5c4] sm:$0xf]  ;;  %v6327_v22 = vor.u32 %v8132_v12, %v6324_v13 }
  0x74   :  { %1849 = vmatpush.bf16.msra.mxu3 %v5719_v61  ;;  %v6052_v23 = vld [vmem:[#allocation2 + $0x5d0] sm:$0xf0]  ;;  %v8096_v24 = vld [vmem:[#allocation2 + $0x6c4] sm:$0xf]  ;;  %v5927_v28 = vor.u32 %v8032_v19, %v5924_v20 }
  0x75   :  { %1808 = vmatpush.bf16.msra.mxu0 %v5319_v5  ;;  %v6180_v25 = vld [vmem:[#allocation2 + $0x6d0] sm:$0xf0]  ;;  %v8128_v26 = vld [vmem:[#allocation2 + $0x7c4] sm:$0xf]  ;;  %v6055_v29 = vor.u32 %v8064_v21, %v6052_v23 }
  0x76   :  { %1822 = vmatpush.bf16.msra.mxu1 %v5447_v9  ;;  %v6308_v27 = vld [vmem:[#allocation2 + $0x7d0] sm:$0xf0]  ;;  %v6183_v30 = vor.u32 %v8096_v24, %v6180_v25  ;;  %v8028_v31 = vld [vmem:[#allocation2 + $0x4a4] sm:$0xf] }
  0x77   :  { %1836 = vmatpush.bf16.msra.mxu2 %v5575_v11  ;;  %v5908_v32 = vld [vmem:[#allocation2 + $0x4b0] sm:$0xf0]  ;;  %v8060_v33 = vld [vmem:[#allocation2 + $0x5a4] sm:$0xf]  ;;  %v6311_v34 = vor.u32 %v8128_v26, %v6308_v27 }
  0x78   :  { %1850 = vmatpush.bf16.msra.mxu3 %v5703_v14  ;;  %v6036_v35 = vld [vmem:[#allocation2 + $0x5b0] sm:$0xf0]  ;;  %v8092_v36 = vld [vmem:[#allocation2 + $0x6a4] sm:$0xf]  ;;  %1809 = vmatmul.bf16.vlgmr.msra.gmra.mxu0 %v8777_v58  ;;  %v5911_v41 = vor.u32 %v8028_v31, %v5908_v32 }
  0x79   :  { %1857 = vmatpush.bf16.msrb.mxu0 %v5943_v15  ;;  %v6164_v37 = vld [vmem:[#allocation2 + $0x6b0] sm:$0xf0]  ;;  %v8124_v38 = vld [vmem:[#allocation2 + $0x7a4] sm:$0xf]  ;;  %1823 = vmatmul.bf16.vlgmr.msra.gmra.mxu1 %v8795_v10  ;;  %v6039_v42 = vor.u32 %v8060_v33, %v6036_v35 }
  0x7a   :  { %1871 = vmatpush.bf16.msrb.mxu1 %v6071_v16  ;;  %v6292_v40 = vld [vmem:[#allocation2 + $0x7b0] sm:$0xf0]  ;;  %1837 = vmatmul.bf16.vlgmr.msra.gmra.mxu2 %v8782_v1  ;;  %v6167_v45 = vor.u32 %v8092_v36, %v6164_v37  ;;  %v8024_v46 = vld [vmem:[#allocation2 + $0x484] sm:$0xf] }
  0x7b   :  { %1885 = vmatpush.bf16.msrb.mxu2 %v6199_v18  ;;  %1851 = vmatmul.bf16.vlgmr.msra.gmra.mxu3 %v8800_v17  ;;  %v5892_v48 = vld [vmem:[#allocation2 + $0x490] sm:$0xf0]  ;;  %v8056_v49 = vld [vmem:[#allocation2 + $0x584] sm:$0xf]  ;;  %v6295_v50 = vor.u32 %v8124_v38, %v6292_v40 }
  0x7c   :  { %1899 = vmatpush.bf16.msrb.mxu3 %v6327_v22  ;;  %v6020_v51 = vld [vmem:[#allocation2 + $0x590] sm:$0xf0]  ;;  %v8088_v52 = vld [vmem:[#allocation2 + $0x684] sm:$0xf]  ;;  %v5895_v56 = vor.u32 %v8024_v46, %v5892_v48  ;;  %v5434_v48 = vld [vmem:[#allocation2 + $0xe8] sm:$0xf] }
  0x7d   :  { %1858 = vmatpush.bf16.msrb.mxu0 %v5927_v28  ;;  %v6148_v53 = vld [vmem:[#allocation2 + $0x690] sm:$0xf0]  ;;  %v8120_v54 = vld [vmem:[#allocation2 + $0x784] sm:$0xf]  ;;  %v6023_v57 = vor.u32 %v8056_v49, %v6020_v51  ;;  %v7911_v49 = vld [vmem:[#allocation2 + $0xf4] sm:$0xf0] }
  0x7e   :  { %1872 = vmatpush.bf16.msrb.mxu1 %v6055_v29  ;;  %v6276_v55 = vld [vmem:[#allocation2 + $0x790] sm:$0xf0]  ;;  %v6151_v59 = vor.u32 %v8088_v52, %v6148_v53  ;;  %v8020_v60 = vld [vmem:[#allocation2 + $0x464] sm:$0xf]  ;;  %v7943_v52 = vld [vmem:[#allocation2 + $0x1f4] sm:$0xf0] }
  0x7f   :  { %1886 = vmatpush.bf16.msrb.mxu2 %v6183_v30  ;;  %v5876_v61 = vld [vmem:[#allocation2 + $0x470] sm:$0xf0]  ;;  %v8052_v62 = vld [vmem:[#allocation2 + $0x564] sm:$0xf]  ;;  %v6279_v63 = vor.u32 %v8120_v54, %v6276_v55  ;;  %v5690_v53 = vld [vmem:[#allocation2 + $0x2e8] sm:$0xf] }
  0x80   :  { %1900 = vmatpush.bf16.msrb.mxu3 %v6311_v34  ;;  %v6004_v0 = vld [vmem:[#allocation2 + $0x570] sm:$0xf0]  ;;  %v8084_v2 = vld [vmem:[#allocation2 + $0x664] sm:$0xf]  ;;  %v5879_v6 = vor.u32 %v8020_v60, %v5876_v61  ;;  %v7975_v54 = vld [vmem:[#allocation2 + $0x2f4] sm:$0xf0]  ;;  %v5435_v61 = vor.u32 %v7911_v49, %v5434_v48 }
  0x81   :  { %1859 = vmatpush.bf16.msrb.mxu0 %v5911_v41  ;;  %v6132_v3 = vld [vmem:[#allocation2 + $0x670] sm:$0xf0]  ;;  %v8116_v4 = vld [vmem:[#allocation2 + $0x764] sm:$0xf]  ;;  %v6007_v7 = vor.u32 %v8052_v62, %v6004_v0  ;;  %v5418_v0 = vld [vmem:[#allocation2 + $0xc8] sm:$0xf] }
  0x82   :  { %1873 = vmatpush.bf16.msrb.mxu1 %v6039_v42  ;;  %v6260_v5 = vld [vmem:[#allocation2 + $0x770] sm:$0xf0]  ;;  %v6135_v8 = vor.u32 %v8084_v2, %v6132_v3  ;;  %v8016_v9 = vld [vmem:[#allocation2 + $0x444] sm:$0xf]  ;;  %v7907_v2 = vld [vmem:[#allocation2 + $0xd4] sm:$0xf0] }
  0x83   :  { %1887 = vmatpush.bf16.msrb.mxu2 %v6167_v45  ;;  %v5860_v11 = vld [vmem:[#allocation2 + $0x450] sm:$0xf0]  ;;  %v8048_v12 = vld [vmem:[#allocation2 + $0x544] sm:$0xf]  ;;  %v6263_v13 = vor.u32 %v8116_v4, %v6260_v5  ;;  %v5546_v3 = vld [vmem:[#allocation2 + $0x1c8] sm:$0xf] }
  0x84   :  { %1901 = vmatpush.bf16.msrb.mxu3 %v6295_v50  ;;  %v5988_v14 = vld [vmem:[#allocation2 + $0x550] sm:$0xf0]  ;;  %v8080_v15 = vld [vmem:[#allocation2 + $0x644] sm:$0xf]  ;;  %v5863_v20 = vor.u32 %v8016_v9, %v5860_v11  ;;  %v5562_v50 = vld [vmem:[#allocation2 + $0x1e8] sm:$0xf]  ;;  %v5419_v11 = vor.u32 %v7907_v2, %v5418_v0 }
  0x85   :  { %1860 = vmatpush.bf16.msrb.mxu0 %v5895_v56  ;;  %v6116_v16 = vld [vmem:[#allocation2 + $0x650] sm:$0xf0]  ;;  %v8112_v18 = vld [vmem:[#allocation2 + $0x744] sm:$0xf]  ;;  %v5991_v21 = vor.u32 %v8048_v12, %v5988_v14  ;;  %v5563_v62 = vor.u32 %v7943_v52, %v5562_v50  ;;  %v7939_v5 = vld [vmem:[#allocation2 + $0x1d4] sm:$0xf0] }
  0x86   :  { %1874 = vmatpush.bf16.msrb.mxu1 %v6023_v57  ;;  %v6244_v19 = vld [vmem:[#allocation2 + $0x750] sm:$0xf0]  ;;  %v6119_v22 = vor.u32 %v8080_v15, %v6116_v16  ;;  %v8012_v23 = vld [vmem:[#allocation2 + $0x424] sm:$0xf]  ;;  %v5818_v57 = vld [vmem:[#allocation2 + $0x3e8] sm:$0xf]  ;;  %v5547_v12 = vor.u32 %v7939_v5, %v5546_v3 }
  0x87   :  { %1888 = vmatpush.bf16.msrb.mxu2 %v6151_v59  ;;  %v5844_v24 = vld [vmem:[#allocation2 + $0x430] sm:$0xf0]  ;;  %v8044_v25 = vld [vmem:[#allocation2 + $0x524] sm:$0xf]  ;;  %v6247_v26 = vor.u32 %v8112_v18, %v6244_v19  ;;  %v8007_v59 = vld [vmem:[#allocation2 + $0x3f4] sm:$0xf0] }
  0x88   :  { %1902 = vmatpush.bf16.msrb.mxu3 %v6279_v63  ;;  %v5972_v27 = vld [vmem:[#allocation2 + $0x530] sm:$0xf0]  ;;  %v8076_v28 = vld [vmem:[#allocation2 + $0x624] sm:$0xf]  ;;  %v5847_v32 = vor.u32 %v8012_v23, %v5844_v24  ;;  %v5691_v63 = vor.u32 %v7975_v54, %v5690_v53  ;;  %v5819_v4 = vor.u32 %v8007_v59, %v5818_v57  ;;  %v8003_v9 = vld [vmem:[#allocation2 + $0x3d4] sm:$0xf0] }
  0x89   :  { %1861 = vmatpush.bf16.msrb.mxu0 %v5879_v6  ;;  %v6100_v29 = vld [vmem:[#allocation2 + $0x630] sm:$0xf0]  ;;  %v8108_v30 = vld [vmem:[#allocation2 + $0x724] sm:$0xf]  ;;  %v5975_v35 = vor.u32 %v8044_v25, %v5972_v27  ;;  %v5674_v6 = vld [vmem:[#allocation2 + $0x2c8] sm:$0xf] }
  0x8a   :  { %1875 = vmatpush.bf16.msrb.mxu1 %v6007_v7  ;;  %v6228_v31 = vld [vmem:[#allocation2 + $0x730] sm:$0xf0]  ;;  %v8008_v33 = vld [vmem:[#allocation2 + $0x404] sm:$0xf]  ;;  %v6103_v36 = vor.u32 %v8076_v28, %v6100_v29  ;;  %v7971_v7 = vld [vmem:[#allocation2 + $0x2d4] sm:$0xf0] }
  0x8b   :  { %1889 = vmatpush.bf16.msrb.mxu2 %v6135_v8  ;;  %v5828_v34 = vld [vmem:[#allocation2 + $0x410] sm:$0xf0]  ;;  %v8040_v37 = vld [vmem:[#allocation2 + $0x504] sm:$0xf]  ;;  %v6231_v41 = vor.u32 %v8108_v30, %v6228_v31  ;;  %v5802_v8 = vld [vmem:[#allocation2 + $0x3c8] sm:$0xf] }
  0x8c   :  { %1903 = vmatpush.bf16.msrb.mxu3 %v6263_v13  ;;  %v5956_v38 = vld [vmem:[#allocation2 + $0x510] sm:$0xf0]  ;;  %v8072_v40 = vld [vmem:[#allocation2 + $0x604] sm:$0xf]  ;;  %v5831_v51 = vor.u32 %v8008_v33, %v5828_v34  ;;  %v5675_v13 = vor.u32 %v7971_v7, %v5674_v6  ;;  %v5402_v14 = vld [vmem:[#allocation2 + $0xa8] sm:$0xf]  ;;  %v5803_v18 = vor.u32 %v8003_v9, %v5802_v8 }
  0x8d   :  { %1862 = vmatpush.bf16.msrb.mxu0 %v5863_v20  ;;  %v6084_v42 = vld [vmem:[#allocation2 + $0x610] sm:$0xf0]  ;;  %v8104_v45 = vld [vmem:[#allocation2 + $0x704] sm:$0xf]  ;;  %v5959_v55 = vor.u32 %v8040_v37, %v5956_v38  ;;  %v7903_v15 = vld [vmem:[#allocation2 + $0xb4] sm:$0xf0] }
  0x8e   :  { %1876 = vmatpush.bf16.msrb.mxu1 %v5991_v21  ;;  %v6212_v46 = vld [vmem:[#allocation2 + $0x710] sm:$0xf0]  ;;  %v6087_v56 = vor.u32 %v8072_v40, %v6084_v42  ;;  %v5530_v16 = vld [vmem:[#allocation2 + $0x1a8] sm:$0xf]  ;;  %v7935_v19 = vld [vmem:[#allocation2 + $0x1b4] sm:$0xf0]  ;;  %v5403_v24 = vor.u32 %v7903_v15, %v5402_v14 }
  0x8f   :  { %1890 = vmatpush.bf16.msrb.mxu2 %v6119_v22  ;;  %v6215_v60 = vor.u32 %v8104_v45, %v6212_v46  ;;  %v5658_v20 = vld [vmem:[#allocation2 + $0x2a8] sm:$0xf]  ;;  %v7967_v21 = vld [vmem:[#allocation2 + $0x2b4] sm:$0xf0]  ;;  %v5531_v25 = vor.u32 %v7935_v19, %v5530_v16 }
  0x90   :  { %1904 = vmatpush.bf16.msrb.mxu3 %v6247_v26  ;;  %v5786_v22 = vld [vmem:[#allocation2 + $0x3a8] sm:$0xf]  ;;  %v7999_v23 = vld [vmem:[#allocation2 + $0x3b4] sm:$0xf0]  ;;  %v5659_v26 = vor.u32 %v7967_v21, %v5658_v20 }
  0x91   :  { %1863 = vmatpush.bf16.msrb.mxu0 %v5847_v32  ;;  %v5386_v27 = vld [vmem:[#allocation2 + $0x88] sm:$0xf]  ;;  %v7899_v28 = vld [vmem:[#allocation2 + $0x94] sm:$0xf0]  ;;  %v5787_v30 = vor.u32 %v7999_v23, %v5786_v22 }
  0x92   :  { %1877 = vmatpush.bf16.msrb.mxu1 %v5975_v35  ;;  %v5514_v29 = vld [vmem:[#allocation2 + $0x188] sm:$0xf]  ;;  %v7931_v31 = vld [vmem:[#allocation2 + $0x194] sm:$0xf0] }
  0x93   :  { %1891 = vmatpush.bf16.msrb.mxu2 %v6103_v36  ;;  %v5642_v32 = vld [vmem:[#allocation2 + $0x288] sm:$0xf]  ;;  %v7963_v33 = vld [vmem:[#allocation2 + $0x294] sm:$0xf0]  ;;  %v5387_v36 = vor.u32 %v7899_v28, %v5386_v27  ;;  %v5515_v37 = vor.u32 %v7931_v31, %v5514_v29 }
  0x94   :  { %1905 = vmatpush.bf16.msrb.mxu3 %v6231_v41  ;;  %v5770_v34 = vld [vmem:[#allocation2 + $0x388] sm:$0xf]  ;;  %v7995_v35 = vld [vmem:[#allocation2 + $0x394] sm:$0xf0]  ;;  %v5643_v38 = vor.u32 %v7963_v33, %v5642_v32 }
  0x95   :  { %1864 = vmatpush.bf16.msrb.mxu0 %v5831_v51  ;;  %v5370_v40 = vld [vmem:[#allocation2 + $0x68] sm:$0xf]  ;;  %v7895_v41 = vld [vmem:[#allocation2 + $0x74] sm:$0xf0]  ;;  %v5771_v45 = vor.u32 %v7995_v35, %v5770_v34 }
  0x96   :  { %1878 = vmatpush.bf16.msrb.mxu1 %v5959_v55  ;;  %v5498_v42 = vld [vmem:[#allocation2 + $0x168] sm:$0xf]  ;;  %v7927_v46 = vld [vmem:[#allocation2 + $0x174] sm:$0xf0]  ;;  %v5371_v52 = vor.u32 %v7895_v41, %v5370_v40 }
  0x97   :  { %1892 = vmatpush.bf16.msrb.mxu2 %v6087_v56  ;;  %v5626_v48 = vld [vmem:[#allocation2 + $0x268] sm:$0xf]  ;;  %v7959_v49 = vld [vmem:[#allocation2 + $0x274] sm:$0xf0]  ;;  %v5499_v53 = vor.u32 %v7927_v46, %v5498_v42 }
  0x98   :  { %1906 = vmatpush.bf16.msrb.mxu3 %v6215_v60  ;;  %1865 = vmatmul.bf16.vlgmr.msrb.gmra.mxu0 %v8828_v39  ;;  %v5754_v50 = vld [vmem:[#allocation2 + $0x368] sm:$0xf]  ;;  %v7991_v51 = vld [vmem:[#allocation2 + $0x374] sm:$0xf0]  ;;  %v5627_v54 = vor.u32 %v7959_v49, %v5626_v48 }
  0x99   :  { %1913 = vmatpush.bf16.msra.mxu0 %v5435_v61  ;;  %1879 = vmatmul.bf16.vlgmr.msrb.gmra.mxu1 %v8832_v44  ;;  %v5354_v55 = vld [vmem:[#allocation2 + $0x48] sm:$0xf]  ;;  %v7891_v56 = vld [vmem:[#allocation2 + $0x54] sm:$0xf0]  ;;  %v5755_v59 = vor.u32 %v7991_v51, %v5754_v50 }
  0x9a   :  { %1927 = vmatpush.bf16.msra.mxu1 %v5563_v62  ;;  %1893 = vmatmul.bf16.vlgmr.msrb.gmra.mxu2 %v8830_v43  ;;  %v5482_v57 = vld [vmem:[#allocation2 + $0x148] sm:$0xf]  ;;  %v7923_v60 = vld [vmem:[#allocation2 + $0x154] sm:$0xf0]  ;;  %v5355_v2 = vor.u32 %v7891_v56, %v5354_v55 }
  0x9b   :  { %1941 = vmatpush.bf16.msra.mxu2 %v5691_v63  ;;  %1907 = vmatmul.bf16.vlgmr.msrb.gmra.mxu3 %v8834_v47  ;;  %v5610_v61 = vld [vmem:[#allocation2 + $0x248] sm:$0xf]  ;;  %v7955_v62 = vld [vmem:[#allocation2 + $0x254] sm:$0xf0]  ;;  %v5483_v3 = vor.u32 %v7923_v60, %v5482_v57 }
  0x9c   :  { %1955 = vmatpush.bf16.msra.mxu3 %v5819_v4  ;;  %v5738_v63 = vld [vmem:[#allocation2 + $0x348] sm:$0xf]  ;;  %v7987_v0 = vld [vmem:[#allocation2 + $0x354] sm:$0xf0]  ;;  %v5611_v4 = vor.u32 %v7955_v62, %v5610_v61 }
  0x9d   :  { %1914 = vmatpush.bf16.msra.mxu0 %v5419_v11  ;;  %v5338_v5 = vld [vmem:[#allocation2 + $0x28] sm:$0xf]  ;;  %v7887_v6 = vld [vmem:[#allocation2 + $0x34] sm:$0xf0]  ;;  %v5739_v8 = vor.u32 %v7987_v0, %v5738_v63 }
  0x9e   :  { %1928 = vmatpush.bf16.msra.mxu1 %v5547_v12  ;;  %v5466_v7 = vld [vmem:[#allocation2 + $0x128] sm:$0xf]  ;;  %v7919_v9 = vld [vmem:[#allocation2 + $0x134] sm:$0xf0]  ;;  %v5339_v15 = vor.u32 %v7887_v6, %v5338_v5 }
  0x9f   :  { %1942 = vmatpush.bf16.msra.mxu2 %v5675_v13  ;;  %v5594_v11 = vld [vmem:[#allocation2 + $0x228] sm:$0xf]  ;;  %v7951_v12 = vld [vmem:[#allocation2 + $0x234] sm:$0xf0]  ;;  %v5467_v19 = vor.u32 %v7919_v9, %v5466_v7 }
  0xa0   :  { %1956 = vmatpush.bf16.msra.mxu3 %v5803_v18  ;;  %v5722_v13 = vld [vmem:[#allocation2 + $0x328] sm:$0xf]  ;;  %v7983_v14 = vld [vmem:[#allocation2 + $0x334] sm:$0xf0]  ;;  %v5595_v20 = vor.u32 %v7951_v12, %v5594_v11 }
  0xa1   :  { %1915 = vmatpush.bf16.msra.mxu0 %v5403_v24  ;;  %v5322_v16 = vld [vmem:[#allocation2 + $0x8] sm:$0xf]  ;;  %v7883_v18 = vld [vmem:[#allocation2 + $0x14] sm:$0xf0]  ;;  %v5723_v24 = vor.u32 %v7983_v14, %v5722_v13 }
  0xa2   :  { %1929 = vmatpush.bf16.msra.mxu1 %v5531_v25  ;;  %v5450_v21 = vld [vmem:[#allocation2 + $0x108] sm:$0xf]  ;;  %v7915_v22 = vld [vmem:[#allocation2 + $0x114] sm:$0xf0]  ;;  %v5323_v31 = vor.u32 %v7883_v18, %v5322_v16 }
  0xa3   :  { %1943 = vmatpush.bf16.msra.mxu2 %v5659_v26  ;;  %v5578_v23 = vld [vmem:[#allocation2 + $0x208] sm:$0xf]  ;;  %v7947_v25 = vld [vmem:[#allocation2 + $0x214] sm:$0xf0]  ;;  %v5451_v35 = vor.u32 %v7915_v22, %v5450_v21 }
  0xa4   :  { %1957 = vmatpush.bf16.msra.mxu3 %v5787_v30  ;;  %v5706_v26 = vld [vmem:[#allocation2 + $0x308] sm:$0xf]  ;;  %v7979_v27 = vld [vmem:[#allocation2 + $0x314] sm:$0xf0] }
  0xa5   :  { %1916 = vmatpush.bf16.msra.mxu0 %v5387_v36  ;;  %v5946_v28 = vld [vmem:[#allocation2 + $0x4e8] sm:$0xf]  ;;  %v8039_v29 = vld [vmem:[#allocation2 + $0x4f4] sm:$0xf0]  ;;  %v5579_v36 = vor.u32 %v7947_v25, %v5578_v23  ;;  %v5707_v40 = vor.u32 %v7979_v27, %v5706_v26 }
  0xa6   :  { %1930 = vmatpush.bf16.msra.mxu1 %v5515_v37  ;;  %v6074_v30 = vld [vmem:[#allocation2 + $0x5e8] sm:$0xf]  ;;  %v8071_v32 = vld [vmem:[#allocation2 + $0x5f4] sm:$0xf0]  ;;  %v5947_v41 = vor.u32 %v8039_v29, %v5946_v28 }
  0xa7   :  { %1944 = vmatpush.bf16.msra.mxu2 %v5643_v38  ;;  %v6202_v33 = vld [vmem:[#allocation2 + $0x6e8] sm:$0xf]  ;;  %v8103_v34 = vld [vmem:[#allocation2 + $0x6f4] sm:$0xf0]  ;;  %v6075_v42 = vor.u32 %v8071_v32, %v6074_v30 }
  0xa8   :  { %1958 = vmatpush.bf16.msra.mxu3 %v5771_v45  ;;  %v6330_v37 = vld [vmem:[#allocation2 + $0x7e8] sm:$0xf]  ;;  %v8135_v38 = vld [vmem:[#allocation2 + $0x7f4] sm:$0xf0]  ;;  %v6203_v45 = vor.u32 %v8103_v34, %v6202_v33 }
  0xa9   :  { %1917 = vmatpush.bf16.msra.mxu0 %v5371_v52  ;;  %v5930_v46 = vld [vmem:[#allocation2 + $0x4c8] sm:$0xf]  ;;  %v8035_v48 = vld [vmem:[#allocation2 + $0x4d4] sm:$0xf0]  ;;  %v6331_v50 = vor.u32 %v8135_v38, %v6330_v37 }
  0xaa   :  { %1931 = vmatpush.bf16.msra.mxu1 %v5499_v53  ;;  %v6058_v49 = vld [vmem:[#allocation2 + $0x5c8] sm:$0xf]  ;;  %v8067_v51 = vld [vmem:[#allocation2 + $0x5d4] sm:$0xf0]  ;;  %v5931_v56 = vor.u32 %v8035_v48, %v5930_v46 }
  0xab   :  { %1945 = vmatpush.bf16.msra.mxu2 %v5627_v54  ;;  %v6186_v52 = vld [vmem:[#allocation2 + $0x6c8] sm:$0xf]  ;;  %v8099_v53 = vld [vmem:[#allocation2 + $0x6d4] sm:$0xf0]  ;;  %v6059_v57 = vor.u32 %v8067_v51, %v6058_v49 }
  0xac   :  { %1959 = vmatpush.bf16.msra.mxu3 %v5755_v59  ;;  %v6314_v54 = vld [vmem:[#allocation2 + $0x7c8] sm:$0xf]  ;;  %v8131_v55 = vld [vmem:[#allocation2 + $0x7d4] sm:$0xf0]  ;;  %v6187_v59 = vor.u32 %v8099_v53, %v6186_v52 }
  0xad   :  { %1918 = vmatpush.bf16.msra.mxu0 %v5355_v2  ;;  %v5914_v60 = vld [vmem:[#allocation2 + $0x4a8] sm:$0xf]  ;;  %v8031_v61 = vld [vmem:[#allocation2 + $0x4b4] sm:$0xf0]  ;;  %v6315_v63 = vor.u32 %v8131_v55, %v6314_v54 }
  0xae   :  { %1932 = vmatpush.bf16.msra.mxu1 %v5483_v3  ;;  %v6042_v62 = vld [vmem:[#allocation2 + $0x5a8] sm:$0xf]  ;;  %v8063_v0 = vld [vmem:[#allocation2 + $0x5b4] sm:$0xf0]  ;;  %v5915_v6 = vor.u32 %v8031_v61, %v5914_v60 }
  0xaf   :  { %1946 = vmatpush.bf16.msra.mxu2 %v5611_v4  ;;  %v6170_v2 = vld [vmem:[#allocation2 + $0x6a8] sm:$0xf]  ;;  %v8095_v3 = vld [vmem:[#allocation2 + $0x6b4] sm:$0xf0]  ;;  %v6043_v7 = vor.u32 %v8063_v0, %v6042_v62 }
  0xb0   :  { %1960 = vmatpush.bf16.msra.mxu3 %v5739_v8  ;;  %v6298_v4 = vld [vmem:[#allocation2 + $0x7a8] sm:$0xf]  ;;  %v8127_v5 = vld [vmem:[#allocation2 + $0x7b4] sm:$0xf0]  ;;  %v6171_v8 = vor.u32 %v8095_v3, %v6170_v2 }
  0xb1   :  { %1919 = vmatpush.bf16.msra.mxu0 %v5339_v15  ;;  %v5898_v9 = vld [vmem:[#allocation2 + $0x488] sm:$0xf]  ;;  %v8027_v11 = vld [vmem:[#allocation2 + $0x494] sm:$0xf0]  ;;  %v6299_v13 = vor.u32 %v8127_v5, %v6298_v4 }
  0xb2   :  { %1933 = vmatpush.bf16.msra.mxu1 %v5467_v19  ;;  %v6026_v12 = vld [vmem:[#allocation2 + $0x588] sm:$0xf]  ;;  %v8059_v14 = vld [vmem:[#allocation2 + $0x594] sm:$0xf0] }
  0xb3   :  { %1947 = vmatpush.bf16.msra.mxu2 %v5595_v20  ;;  %v6154_v15 = vld [vmem:[#allocation2 + $0x688] sm:$0xf]  ;;  %v8091_v16 = vld [vmem:[#allocation2 + $0x694] sm:$0xf0]  ;;  %v5899_v20 = vor.u32 %v8027_v11, %v5898_v9  ;;  %v6027_v21 = vor.u32 %v8059_v14, %v6026_v12  ;;  %v7909_v11 = vld [vmem:[#allocation2 + $0xec] sm:$0xf] }
  0xb4   :  { %1961 = vmatpush.bf16.msra.mxu3 %v5723_v24  ;;  %v6282_v18 = vld [vmem:[#allocation2 + $0x788] sm:$0xf]  ;;  %v8123_v19 = vld [vmem:[#allocation2 + $0x794] sm:$0xf0]  ;;  %v6155_v22 = vor.u32 %v8091_v16, %v6154_v15  ;;  %v5436_v12 = vld [vmem:[#allocation2 + $0xf8] sm:$0xf0] }
  0xb5   :  { %1920 = vmatpush.bf16.msra.mxu0 %v5323_v31  ;;  %v5882_v23 = vld [vmem:[#allocation2 + $0x468] sm:$0xf]  ;;  %v8023_v24 = vld [vmem:[#allocation2 + $0x474] sm:$0xf0]  ;;  %v6283_v26 = vor.u32 %v8123_v19, %v6282_v18  ;;  %v5564_v15 = vld [vmem:[#allocation2 + $0x1f8] sm:$0xf0] }
  0xb6   :  { %1934 = vmatpush.bf16.msra.mxu1 %v5451_v35  ;;  %v6010_v25 = vld [vmem:[#allocation2 + $0x568] sm:$0xf]  ;;  %v8055_v27 = vld [vmem:[#allocation2 + $0x574] sm:$0xf0]  ;;  %v5883_v32 = vor.u32 %v8023_v24, %v5882_v23  ;;  %v7973_v16 = vld [vmem:[#allocation2 + $0x2ec] sm:$0xf]  ;;  %v5439_v24 = vor.u32 %v7909_v11, %v5436_v12 }
  0xb7   :  { %1948 = vmatpush.bf16.msra.mxu2 %v5579_v36  ;;  %v6138_v28 = vld [vmem:[#allocation2 + $0x668] sm:$0xf]  ;;  %v8087_v29 = vld [vmem:[#allocation2 + $0x674] sm:$0xf0]  ;;  %v6011_v33 = vor.u32 %v8055_v27, %v6010_v25  ;;  %v5692_v18 = vld [vmem:[#allocation2 + $0x2f8] sm:$0xf0] }
  0xb8   :  { %1962 = vmatpush.bf16.msra.mxu3 %v5707_v40  ;;  %1921 = vmatmul.bf16.vlgmr.msra.gmra.mxu0 %v8777_v58  ;;  %v6266_v30 = vld [vmem:[#allocation2 + $0x768] sm:$0xf]  ;;  %v8119_v31 = vld [vmem:[#allocation2 + $0x774] sm:$0xf0]  ;;  %v6139_v34 = vor.u32 %v8087_v29, %v6138_v28  ;;  %v7905_v27 = vld [vmem:[#allocation2 + $0xcc] sm:$0xf] }
  0xb9   :  { %1969 = vmatpush.bf16.msrb.mxu0 %v5947_v41  ;;  %1935 = vmatmul.bf16.vlgmr.msra.gmra.mxu1 %v8795_v10  ;;  %v5866_v35 = vld [vmem:[#allocation2 + $0x448] sm:$0xf]  ;;  %v8019_v36 = vld [vmem:[#allocation2 + $0x454] sm:$0xf0]  ;;  %v6267_v38 = vor.u32 %v8119_v31, %v6266_v30  ;;  %v5420_v28 = vld [vmem:[#allocation2 + $0xd8] sm:$0xf0] }
  0xba   :  { %1983 = vmatpush.bf16.msrb.mxu1 %v6075_v42  ;;  %1949 = vmatmul.bf16.vlgmr.msra.gmra.mxu2 %v8782_v1  ;;  %v5994_v37 = vld [vmem:[#allocation2 + $0x548] sm:$0xf]  ;;  %v8051_v40 = vld [vmem:[#allocation2 + $0x554] sm:$0xf0]  ;;  %v5867_v48 = vor.u32 %v8019_v36, %v5866_v35  ;;  %v7937_v29 = vld [vmem:[#allocation2 + $0x1cc] sm:$0xf]  ;;  %v5423_v36 = vor.u32 %v7905_v27, %v5420_v28 }
  0xbb   :  { %1997 = vmatpush.bf16.msrb.mxu2 %v6203_v45  ;;  %1963 = vmatmul.bf16.vlgmr.msra.gmra.mxu3 %v8800_v17  ;;  %v6122_v41 = vld [vmem:[#allocation2 + $0x648] sm:$0xf]  ;;  %v8083_v42 = vld [vmem:[#allocation2 + $0x654] sm:$0xf0]  ;;  %v5995_v49 = vor.u32 %v8051_v40, %v5994_v37  ;;  %v5548_v31 = vld [vmem:[#allocation2 + $0x1d8] sm:$0xf0] }
  0xbc   :  { %2011 = vmatpush.bf16.msrb.mxu3 %v6331_v50  ;;  %v6250_v45 = vld [vmem:[#allocation2 + $0x748] sm:$0xf]  ;;  %v8115_v46 = vld [vmem:[#allocation2 + $0x754] sm:$0xf0]  ;;  %v6123_v50 = vor.u32 %v8083_v42, %v6122_v41  ;;  %v5804_v35 = vld [vmem:[#allocation2 + $0x3d8] sm:$0xf0]  ;;  %v5551_v37 = vor.u32 %v7937_v29, %v5548_v31 }
  0xbd   :  { %1970 = vmatpush.bf16.msrb.mxu0 %v5931_v56  ;;  %v5850_v51 = vld [vmem:[#allocation2 + $0x428] sm:$0xf]  ;;  %v8015_v52 = vld [vmem:[#allocation2 + $0x434] sm:$0xf0]  ;;  %v6251_v54 = vor.u32 %v8115_v46, %v6250_v45  ;;  %v7901_v40 = vld [vmem:[#allocation2 + $0xac] sm:$0xf] }
  0xbe   :  { %1984 = vmatpush.bf16.msrb.mxu1 %v6059_v57  ;;  %v5978_v53 = vld [vmem:[#allocation2 + $0x528] sm:$0xf]  ;;  %v8047_v55 = vld [vmem:[#allocation2 + $0x534] sm:$0xf0]  ;;  %v5851_v61 = vor.u32 %v8015_v52, %v5850_v51  ;;  %v5404_v41 = vld [vmem:[#allocation2 + $0xb8] sm:$0xf0] }
  0xbf   :  { %1998 = vmatpush.bf16.msrb.mxu2 %v6187_v59  ;;  %v6106_v56 = vld [vmem:[#allocation2 + $0x628] sm:$0xf]  ;;  %v8079_v57 = vld [vmem:[#allocation2 + $0x634] sm:$0xf0]  ;;  %v5979_v0 = vor.u32 %v8047_v55, %v5978_v53  ;;  %v7933_v42 = vld [vmem:[#allocation2 + $0x1ac] sm:$0xf]  ;;  %v5407_v52 = vor.u32 %v7901_v40, %v5404_v41 }
  0xc0   :  { %2012 = vmatpush.bf16.msrb.mxu3 %v6315_v63  ;;  %v6234_v59 = vld [vmem:[#allocation2 + $0x728] sm:$0xf]  ;;  %v8111_v60 = vld [vmem:[#allocation2 + $0x734] sm:$0xf0]  ;;  %v6107_v2 = vor.u32 %v8079_v57, %v6106_v56  ;;  %v5532_v46 = vld [vmem:[#allocation2 + $0x1b8] sm:$0xf0] }
  0xc1   :  { %1971 = vmatpush.bf16.msrb.mxu0 %v5915_v6  ;;  %v5834_v62 = vld [vmem:[#allocation2 + $0x408] sm:$0xf]  ;;  %v8011_v63 = vld [vmem:[#allocation2 + $0x414] sm:$0xf0]  ;;  %v6235_v6 = vor.u32 %v8111_v60, %v6234_v59  ;;  %v5788_v51 = vld [vmem:[#allocation2 + $0x3b8] sm:$0xf0]  ;;  %v5535_v53 = vor.u32 %v7933_v42, %v5532_v46 }
  0xc2   :  { %1985 = vmatpush.bf16.msrb.mxu1 %v6043_v7  ;;  %v5962_v3 = vld [vmem:[#allocation2 + $0x508] sm:$0xf]  ;;  %v8043_v4 = vld [vmem:[#allocation2 + $0x514] sm:$0xf0]  ;;  %v5835_v14 = vor.u32 %v8011_v63, %v5834_v62  ;;  %v7897_v55 = vld [vmem:[#allocation2 + $0x8c] sm:$0xf] }
  0xc3   :  { %1999 = vmatpush.bf16.msrb.mxu2 %v6171_v8  ;;  %v6090_v5 = vld [vmem:[#allocation2 + $0x608] sm:$0xf]  ;;  %v8075_v7 = vld [vmem:[#allocation2 + $0x614] sm:$0xf0]  ;;  %v5963_v19 = vor.u32 %v8043_v4, %v5962_v3  ;;  %v5388_v56 = vld [vmem:[#allocation2 + $0x98] sm:$0xf0]  ;;  %v8856_v3 = vpop.f32.mrf.mxu0 }
  0xc4   :  { %2013 = vmatpush.bf16.msrb.mxu3 %v6299_v13  ;;  %v6218_v8 = vld [vmem:[#allocation2 + $0x708] sm:$0xf]  ;;  %v8107_v9 = vld [vmem:[#allocation2 + $0x714] sm:$0xf0]  ;;  %v7941_v13 = vld [vmem:[#allocation2 + $0x1ec] sm:$0xf] }
  0xc5   :  { %1972 = vmatpush.bf16.msrb.mxu0 %v5899_v20  ;;  %v6091_v20 = vor.u32 %v8075_v7, %v6090_v5  ;;  %v6219_v23 = vor.u32 %v8107_v9, %v6218_v8  ;;  %v5567_v25 = vor.u32 %v7941_v13, %v5564_v15  ;;  %v7929_v57 = vld [vmem:[#allocation2 + $0x18c] sm:$0xf]  ;;  %v5516_v60 = vld [vmem:[#allocation2 + $0x198] sm:$0xf0]  ;;  %v8858_v9 = vpop.f32.mrf.mxu1 }
  0xc6   :  { %1986 = vmatpush.bf16.msrb.mxu1 %v6027_v21  ;;  %v8005_v21 = vld [vmem:[#allocation2 + $0x3ec] sm:$0xf]  ;;  %v5644_v62 = vld [vmem:[#allocation2 + $0x298] sm:$0xf0]  ;;  %v5519_v4 = vor.u32 %v7929_v57, %v5516_v60 }
  0xc7   :  { %2000 = vmatpush.bf16.msrb.mxu2 %v6155_v22  ;;  %v5820_v22 = vld [vmem:[#allocation2 + $0x3f8] sm:$0xf0]  ;;  %v7993_v63 = vld [vmem:[#allocation2 + $0x38c] sm:$0xf] }
  0xc8   :  { %2014 = vmatpush.bf16.msrb.mxu3 %v6283_v26  ;;  %v5695_v26 = vor.u32 %v7973_v16, %v5692_v18  ;;  %v5823_v30 = vor.u32 %v8005_v21, %v5820_v22  ;;  %v5372_v7 = vld [vmem:[#allocation2 + $0x78] sm:$0xf0]  ;;  %v7925_v8 = vld [vmem:[#allocation2 + $0x16c] sm:$0xf] }
  0xc9   :  { %1973 = vmatpush.bf16.msrb.mxu0 %v5883_v32  ;;  %v7969_v32 = vld [vmem:[#allocation2 + $0x2cc] sm:$0xf]  ;;  %v5500_v12 = vld [vmem:[#allocation2 + $0x178] sm:$0xf0] }
  0xca   :  { %1987 = vmatpush.bf16.msrb.mxu1 %v6011_v33  ;;  %v5676_v33 = vld [vmem:[#allocation2 + $0x2d8] sm:$0xf0]  ;;  %v7957_v13 = vld [vmem:[#allocation2 + $0x26c] sm:$0xf] }
  0xcb   :  { %2001 = vmatpush.bf16.msrb.mxu2 %v6139_v34  ;;  %v8001_v34 = vld [vmem:[#allocation2 + $0x3cc] sm:$0xf]  ;;  %v5756_v16 = vld [vmem:[#allocation2 + $0x378] sm:$0xf0] }
  0xcc   :  { %2015 = vmatpush.bf16.msrb.mxu3 %v6267_v38  ;;  %v5679_v38 = vor.u32 %v7969_v32, %v5676_v33  ;;  %v5807_v45 = vor.u32 %v8001_v34, %v5804_v35  ;;  %v7989_v15 = vld [vmem:[#allocation2 + $0x36c] sm:$0xf]  ;;  %v5356_v22 = vld [vmem:[#allocation2 + $0x58] sm:$0xf0]  ;;  %v8862_v32 = vpop.f32.mrf.mxu3 }
  0xcd   :  { %1974 = vmatpush.bf16.msrb.mxu0 %v5867_v48  ;;  %v7965_v48 = vld [vmem:[#allocation2 + $0x2ac] sm:$0xf]  ;;  %v5612_v27 = vld [vmem:[#allocation2 + $0x258] sm:$0xf0] }
  0xce   :  { %1988 = vmatpush.bf16.msrb.mxu1 %v5995_v49  ;;  %v5660_v49 = vld [vmem:[#allocation2 + $0x2b8] sm:$0xf0]  ;;  %v7889_v21 = vld [vmem:[#allocation2 + $0x4c] sm:$0xf] }
  0xcf   :  { %2002 = vmatpush.bf16.msrb.mxu2 %v6123_v50  ;;  %v7997_v50 = vld [vmem:[#allocation2 + $0x3ac] sm:$0xf]  ;;  %v5740_v29 = vld [vmem:[#allocation2 + $0x358] sm:$0xf0]  ;;  %v5359_v31 = vor.u32 %v7889_v21, %v5356_v22 }
  0xd0   :  { %2016 = vmatpush.bf16.msrb.mxu3 %v6251_v54  ;;  %v5663_v54 = vor.u32 %v7965_v48, %v5660_v49  ;;  %v5791_v59 = vor.u32 %v7997_v50, %v5788_v51  ;;  %v7985_v28 = vld [vmem:[#allocation2 + $0x34c] sm:$0xf]  ;;  %v5468_v40 = vld [vmem:[#allocation2 + $0x138] sm:$0xf0]  ;;  %v8866_v49 = vpop.f32.mrf.mxu1 }
  0xd1   :  { %1975 = vmatpush.bf16.msrb.mxu0 %v5851_v61  ;;  %v7961_v61 = vld [vmem:[#allocation2 + $0x28c] sm:$0xf]  ;;  %v5596_v42 = vld [vmem:[#allocation2 + $0x238] sm:$0xf0] }
  0xd2   :  { %1989 = vmatpush.bf16.msrb.mxu1 %v5979_v0  ;;  %v5772_v0 = vld [vmem:[#allocation2 + $0x398] sm:$0xf0]  ;;  %v5647_v5 = vor.u32 %v7961_v61, %v5644_v62  ;;  %v7885_v35 = vld [vmem:[#allocation2 + $0x2c] sm:$0xf] }
  0xd3   :  { %2003 = vmatpush.bf16.msrb.mxu2 %v6107_v2  ;;  %v5391_v2 = vor.u32 %v7897_v55, %v5388_v56  ;;  %v5775_v11 = vor.u32 %v7993_v63, %v5772_v0  ;;  %v7949_v41 = vld [vmem:[#allocation2 + $0x22c] sm:$0xf]  ;;  %v5724_v48 = vld [vmem:[#allocation2 + $0x338] sm:$0xf0] }
  0xd4   :  { %2017 = vmatpush.bf16.msrb.mxu3 %v6235_v6  ;;  %v7893_v6 = vld [vmem:[#allocation2 + $0x6c] sm:$0xf]  ;;  %v5452_v56 = vld [vmem:[#allocation2 + $0x118] sm:$0xf0] }
  0xd5   :  { %1976 = vmatpush.bf16.msrb.mxu0 %v5835_v14  ;;  %v5628_v14 = vld [vmem:[#allocation2 + $0x278] sm:$0xf0]  ;;  %v5375_v18 = vor.u32 %v7893_v6, %v5372_v7  ;;  %v7981_v46 = vld [vmem:[#allocation2 + $0x32c] sm:$0xf] }
  0xd6   :  { %1990 = vmatpush.bf16.msrb.mxu1 %v5963_v19  ;;  %v5503_v19 = vor.u32 %v7925_v8, %v5500_v12  ;;  %v7881_v51 = vld [vmem:[#allocation2 + $0xc] sm:$0xf]  ;;  %v5580_v60 = vld [vmem:[#allocation2 + $0x218] sm:$0xf0] }
  0xd7   :  { %2004 = vmatpush.bf16.msrb.mxu2 %v6091_v20  ;;  %v5631_v20 = vor.u32 %v7957_v13, %v5628_v14  ;;  %v7913_v55 = vld [vmem:[#allocation2 + $0x10c] sm:$0xf]  ;;  %v5708_v62 = vld [vmem:[#allocation2 + $0x318] sm:$0xf0] }
  0xd8   :  { %2018 = vmatpush.bf16.msrb.mxu3 %v6219_v23  ;;  %1977 = vmatmul.bf16.vlgmr.msrb.gmra.mxu0 %v8828_v39  ;;  %v7921_v23 = vld [vmem:[#allocation2 + $0x14c] sm:$0xf]  ;;  %v5948_v0 = vld [vmem:[#allocation2 + $0x4f8] sm:$0xf0]  ;;  %v5455_v8 = vor.u32 %v7913_v55, %v5452_v56 }
  0xd9   :  { %2025 = vmatpush.bf16.msra.mxu0 %v5439_v24  ;;  %1991 = vmatmul.bf16.vlgmr.msrb.gmra.mxu1 %v8832_v44  ;;  %v5759_v24 = vor.u32 %v7989_v15, %v5756_v16  ;;  %v7945_v57 = vld [vmem:[#allocation2 + $0x20c] sm:$0xf]  ;;  %v6204_v7 = vld [vmem:[#allocation2 + $0x6f8] sm:$0xf0] }
  0xda   :  { %2039 = vmatpush.bf16.msra.mxu1 %v5567_v25  ;;  %2005 = vmatmul.bf16.vlgmr.msrb.gmra.mxu2 %v8830_v43  ;;  %v5484_v25 = vld [vmem:[#allocation2 + $0x158] sm:$0xf0]  ;;  %v7977_v61 = vld [vmem:[#allocation2 + $0x30c] sm:$0xf] }
  0xdb   :  { %2053 = vmatpush.bf16.msra.mxu2 %v5695_v26  ;;  %2019 = vmatmul.bf16.vlgmr.msrb.gmra.mxu3 %v8834_v47  ;;  %v7953_v26 = vld [vmem:[#allocation2 + $0x24c] sm:$0xf]  ;;  %v5487_v33 = vor.u32 %v7921_v23, %v5484_v25  ;;  %v6332_v13 = vld [vmem:[#allocation2 + $0x7f8] sm:$0xf0]  ;;  %v5711_v15 = vor.u32 %v7977_v61, %v5708_v62 }
  0xdc   :  { %2067 = vmatpush.bf16.msra.mxu3 %v5823_v30  ;;  %v8860_v30 = vpop.f32.mrf.mxu2  ;;  %v5615_v34 = vor.u32 %v7953_v26, %v5612_v27  ;;  %v8037_v63 = vld [vmem:[#allocation2 + $0x4ec] sm:$0xf]  ;;  %v5932_v22 = vld [vmem:[#allocation2 + $0x4d8] sm:$0xf0] }
  0xdd   :  { %2026 = vmatpush.bf16.msra.mxu0 %v5423_v36  ;;  %v5340_v36 = vld [vmem:[#allocation2 + $0x38] sm:$0xf0]  ;;  %v8101_v6 = vld [vmem:[#allocation2 + $0x6ec] sm:$0xf]  ;;  %v5951_v16 = vor.u32 %v8037_v63, %v5948_v0 }
  0xde   :  { %2040 = vmatpush.bf16.msra.mxu1 %v5551_v37  ;;  %v7917_v37 = vld [vmem:[#allocation2 + $0x12c] sm:$0xf]  ;;  %v5343_v50 = vor.u32 %v7885_v35, %v5340_v36  ;;  %v6060_v25 = vld [vmem:[#allocation2 + $0x5d8] sm:$0xf0] }
  0xdf   :  { %2054 = vmatpush.bf16.msra.mxu2 %v5679_v38  ;;  %v5743_v38 = vor.u32 %v7985_v28, %v5740_v29  ;;  %v8133_v12 = vld [vmem:[#allocation2 + $0x7ec] sm:$0xf]  ;;  %v6188_v27 = vld [vmem:[#allocation2 + $0x6d8] sm:$0xf0] }
  0xe0   :  { %2068 = vmatpush.bf16.msra.mxu3 %v5807_v45  ;;  %v8864_v45 = vpop.f32.mrf.mxu0  ;;  %v8033_v21 = vld [vmem:[#allocation2 + $0x4cc] sm:$0xf]  ;;  %v5900_v56 = vld [vmem:[#allocation2 + $0x498] sm:$0xf0] }
  0xe1   :  { %2027 = vmatpush.bf16.msra.mxu0 %v5407_v52  ;;  %v5324_v52 = vld [vmem:[#allocation2 + $0x18] sm:$0xf0]  ;;  %v8065_v23 = vld [vmem:[#allocation2 + $0x5cc] sm:$0xf] }
  0xe2   :  { %2041 = vmatpush.bf16.msra.mxu1 %v5535_v53  ;;  %v5471_v53 = vor.u32 %v7917_v37, %v5468_v40  ;;  %v8097_v26 = vld [vmem:[#allocation2 + $0x6cc] sm:$0xf]  ;;  %v6063_v35 = vor.u32 %v8065_v23, %v6060_v25  ;;  %v6284_v63 = vld [vmem:[#allocation2 + $0x798] sm:$0xf0] }
  0xe3   :  { %2055 = vmatpush.bf16.msra.mxu2 %v5663_v54  ;;  %v5599_v54 = vor.u32 %v7949_v41, %v5596_v42  ;;  %v8129_v29 = vld [vmem:[#allocation2 + $0x7cc] sm:$0xf]  ;;  %v6191_v36 = vor.u32 %v8097_v26, %v6188_v27  ;;  %v6044_v42 = vld [vmem:[#allocation2 + $0x5b8] sm:$0xf0] }
  0xe4   :  { %2069 = vmatpush.bf16.msra.mxu3 %v5791_v59  ;;  %v5727_v59 = vor.u32 %v7981_v46, %v5724_v48  ;;  %v8868_v14 = vpop.f32.mrf.mxu2  ;;  %v8029_v37 = vld [vmem:[#allocation2 + $0x4ac] sm:$0xf]  ;;  %v6172_v48 = vld [vmem:[#allocation2 + $0x6b8] sm:$0xf0] }
  0xe5   :  { %2028 = vmatpush.bf16.msra.mxu0 %v5391_v2  ;;  %v8069_v2 = vld [vmem:[#allocation2 + $0x5ec] sm:$0xf]  ;;  %v5868_v25 = vld [vmem:[#allocation2 + $0x458] sm:$0xf0] }
  0xe6   :  { %2042 = vmatpush.bf16.msra.mxu1 %v5519_v4  ;;  %v5327_v4 = vor.u32 %v7881_v51, %v5324_v52  ;;  %v8061_v40 = vld [vmem:[#allocation2 + $0x5ac] sm:$0xf]  ;;  %v6300_v51 = vld [vmem:[#allocation2 + $0x7b8] sm:$0xf0] }
  0xe7   :  { %2056 = vmatpush.bf16.msra.mxu2 %v5647_v5  ;;  %v6076_v5 = vld [vmem:[#allocation2 + $0x5f8] sm:$0xf0]  ;;  %v8093_v46 = vld [vmem:[#allocation2 + $0x6ac] sm:$0xf] }
  0xe8   :  { %2070 = vmatpush.bf16.msra.mxu3 %v5775_v11  ;;  %v5583_v11 = vor.u32 %v7945_v57, %v5580_v60  ;;  %v8872_v28 = vpop.f32.mrf.mxu0  ;;  %v8025_v55 = vld [vmem:[#allocation2 + $0x48c] sm:$0xf]  ;;  %v6028_v60 = vld [vmem:[#allocation2 + $0x598] sm:$0xf0] }
  0xe9   :  { %2029 = vmatpush.bf16.msra.mxu0 %v5375_v18  ;;  %v8870_v18 = vpop.f32.mrf.mxu3  ;;  %v8089_v61 = vld [vmem:[#allocation2 + $0x68c] sm:$0xf] }
  0xea   :  { %2043 = vmatpush.bf16.msra.mxu1 %v5503_v19  ;;  %v6079_v19 = vor.u32 %v8069_v2, %v6076_v5  ;;  %v8021_v5 = vld [vmem:[#allocation2 + $0x46c] sm:$0xf] }
  0xeb   :  { %2057 = vmatpush.bf16.msra.mxu2 %v5631_v20  ;;  %v6207_v20 = vor.u32 %v8101_v6, %v6204_v7  ;;  %v5884_v6 = vld [vmem:[#allocation2 + $0x478] sm:$0xf0]  ;;  %v8053_v7 = vld [vmem:[#allocation2 + $0x56c] sm:$0xf] }
  0xec   :  { %2071 = vmatpush.bf16.msra.mxu3 %v5759_v24  ;;  %v6335_v24 = vor.u32 %v8133_v12, %v6332_v13  ;;  %v8880_v57 = vpop.f32.mrf.mxu2  ;;  %v6012_v12 = vld [vmem:[#allocation2 + $0x578] sm:$0xf0]  ;;  %v8085_v13 = vld [vmem:[#allocation2 + $0x66c] sm:$0xf] }
  0xed   :  { %2030 = vmatpush.bf16.msra.mxu0 %v5359_v31  ;;  %v6316_v31 = vld [vmem:[#allocation2 + $0x7d8] sm:$0xf0]  ;;  %v8049_v26 = vld [vmem:[#allocation2 + $0x54c] sm:$0xf] }
  0xee   :  { %2044 = vmatpush.bf16.msra.mxu1 %v5487_v33  ;;  %v8874_v33 = vpop.f32.mrf.mxu1  ;;  %v6319_v41 = vor.u32 %v8129_v29, %v6316_v31  ;;  %v5996_v29 = vld [vmem:[#allocation2 + $0x558] sm:$0xf0]  ;;  %v8081_v31 = vld [vmem:[#allocation2 + $0x64c] sm:$0xf] }
  0xef   :  { %2058 = vmatpush.bf16.msra.mxu2 %v5615_v34  ;;  %v5935_v34 = vor.u32 %v8033_v21, %v5932_v22  ;;  %v5887_v21 = vor.u32 %v8021_v5, %v5884_v6  ;;  %v6015_v22 = vor.u32 %v8053_v7, %v6012_v12  ;;  %v5964_v5 = vld [vmem:[#allocation2 + $0x518] sm:$0xf0] }
  0xf0   :  { %2072 = vmatpush.bf16.msra.mxu3 %v5743_v38  ;;  %v5916_v38 = vld [vmem:[#allocation2 + $0x4b8] sm:$0xf0]  ;;  %v8884_v0 = vpop.f32.mrf.mxu0 }
  0xf1   :  { %2031 = vmatpush.bf16.msra.mxu0 %v5343_v50  ;;  %v8125_v50 = vld [vmem:[#allocation2 + $0x7ac] sm:$0xf]  ;;  %v5919_v52 = vor.u32 %v8029_v37, %v5916_v38  ;;  %v8882_v62 = vpop.f32.mrf.mxu3  ;;  %v6092_v12 = vld [vmem:[#allocation2 + $0x618] sm:$0xf0] }
  0xf2   :  { %2045 = vmatpush.bf16.msra.mxu1 %v5471_v53  ;;  %v6047_v53 = vor.u32 %v8061_v40, %v6044_v42  ;;  %v5999_v42 = vor.u32 %v8049_v26, %v5996_v29 }
  0xf3   :  { %2059 = vmatpush.bf16.msra.mxu2 %v5599_v54  ;;  %v6175_v54 = vor.u32 %v8093_v46, %v6172_v48 }
  0xf4   :  { %2073 = vmatpush.bf16.msra.mxu3 %v5727_v59  ;;  %v6303_v59 = vor.u32 %v8125_v50, %v6300_v51  ;;  %v8894_v38 = vpop.f32.mrf.mxu2  ;;  %v8013_v50 = vld [vmem:[#allocation2 + $0x42c] sm:$0xf]  ;;  %v5852_v51 = vld [vmem:[#allocation2 + $0x438] sm:$0xf0] }
  0xf5   :  { %2032 = vmatpush.bf16.msra.mxu0 %v5327_v4 }
  0xf6   :  { %2046 = vmatpush.bf16.msra.mxu1 %v5455_v8  ;;  %v8886_v8 = vpop.f32.mrf.mxu1 }
  0xf7   :  { %2060 = vmatpush.bf16.msra.mxu2 %v5583_v11 }
  0xf8   :  { %2074 = vmatpush.bf16.msra.mxu3 %v5711_v15  ;;  %2033 = vmatmul.bf16.vlgmr.msra.gmra.mxu0 %v8777_v58  ;;  %v6156_v58 = vld [vmem:[#allocation2 + $0x698] sm:$0xf0]  ;;  %v1810_v48 = vpop.f32.mrf.mxu0 }
  0xf9   :  { %2081 = vmatpush.bf16.msrb.mxu0 %v5951_v16  ;;  %2047 = vmatmul.bf16.vlgmr.msra.gmra.mxu1 %v8795_v10  ;;  %v5903_v10 = vor.u32 %v8025_v55, %v5900_v56  ;;  %v6159_v4 = vor.u32 %v8089_v61, %v6156_v58  ;;  %v6140_v15 = vld [vmem:[#allocation2 + $0x678] sm:$0xf0]  ;;  %v8117_v16 = vld [vmem:[#allocation2 + $0x76c] sm:$0xf]  ;;  %v5855_v58 = vor.u32 %v8013_v50, %v5852_v51 }
  0xfa   :  { %2095 = vmatpush.bf16.msrb.mxu1 %v6079_v19  ;;  %2061 = vmatmul.bf16.vlgmr.msra.gmra.mxu2 %v8782_v1  ;;  %v8057_v1 = vld [vmem:[#allocation2 + $0x58c] sm:$0xf]  ;;  %v6268_v19 = vld [vmem:[#allocation2 + $0x778] sm:$0xf0]  ;;  %v6143_v23 = vor.u32 %v8085_v13, %v6140_v15 }
  0xfb   :  { %2109 = vmatpush.bf16.msrb.mxu2 %v6207_v20  ;;  %2075 = vmatmul.bf16.vlgmr.msra.gmra.mxu3 %v8800_v17  ;;  %v8121_v17 = vld [vmem:[#allocation2 + $0x78c] sm:$0xf]  ;;  %v6031_v2 = vor.u32 %v8057_v1, %v6028_v60  ;;  %v8891_v20 = vld [vmem:[%s9068_s5] sm:$0xf]  ;;  %v6271_v27 = vor.u32 %v8117_v16, %v6268_v19  ;;  %v6108_v56 = vld [vmem:[#allocation2 + $0x638] sm:$0xf0] }
  0xfc   :  { %2123 = vmatpush.bf16.msrb.mxu3 %v6335_v24  ;;  %v6287_v11 = vor.u32 %v8121_v17, %v6284_v63  ;;  %v8017_v24 = vld [vmem:[#allocation2 + $0x44c] sm:$0xf]  ;;  %v361_v37 = vperm.slane %v8891_v20, 0  ;;  %v6236_v60 = vld [vmem:[#allocation2 + $0x738] sm:$0xf0]  ;;  %v362_v61 = vperm.slane %v8891_v20, 1 }
  0xfd   :  { %2082 = vmatpush.bf16.msrb.mxu0 %v5935_v34  ;;  %v6124_v34 = vld [vmem:[#allocation2 + $0x658] sm:$0xf0]  ;;  %v5871_v40 = vor.u32 %v8017_v24, %v5868_v25  ;;  %v8077_v55 = vld [vmem:[#allocation2 + $0x62c] sm:$0xf]  ;;  %v6394_v16 = vld [vmem:[#allocation4 + $0x70] sm:$0xf]  ;;  %v1838_v25 = vpop.f32.mrf.mxu2 }
  0xfe   :  { %2096 = vmatpush.bf16.msrb.mxu1 %v6063_v35  ;;  %v8113_v35 = vld [vmem:[#allocation2 + $0x74c] sm:$0xf]  ;;  %v6127_v46 = vor.u32 %v8081_v31, %v6124_v34  ;;  %v1824_v1 = vpop.f32.mrf.mxu1  ;;  %v1699_v6 = vadd.f32 %v8856_v3, %v361_v37  ;;  %v6220_v15 = vld [vmem:[#allocation2 + $0x718] sm:$0xf0]  ;;  %v8151_v19 = vld [vmem:[#allocation4 + $0x74] sm:$0xf0]  ;;  %v1811_v26 = vadd.f32 %v1810_v48, %v362_v61 }
  0xff   :  { %2110 = vmatpush.bf16.msrb.mxu2 %v6191_v36  ;;  %v6252_v36 = vld [vmem:[#allocation2 + $0x758] sm:$0xf0]  ;;  %v8009_v17 = vld [vmem:[#allocation2 + $0x40c] sm:$0xf]  ;;  %v8167_v24 = vld [vmem:[#allocation4 + $0xf4] sm:$0xf0] }
 0x100   :  { %2124 = vmatpush.bf16.msrb.mxu3 %v6319_v41  ;;  %v8896_v41 = vpop.f32.mrf.mxu3  ;;  %v8105_v13 = vld [vmem:[#allocation2 + $0x70c] sm:$0xf]  ;;  %v1713_v31 = vadd.f32 %v8858_v9, %v1699_v6  ;;  %v1825_v51 = vadd.f32 %v1824_v1, %v1811_v26  ;;  %v8163_v1 = vld [vmem:[#allocation4 + $0xd4] sm:$0xf0]  ;;  %v6418_v26 = vld [vmem:[#allocation4 + $0xa0] sm:$0xf] }
 0x101   :  { %2083 = vmatpush.bf16.msrb.mxu0 %v5919_v52  ;;  %v8045_v52 = vld [vmem:[#allocation2 + $0x52c] sm:$0xf]  ;;  %v6223_v34 = vor.u32 %v8105_v13, %v6220_v15  ;;  %v8143_v13 = vld [vmem:[#allocation4 + $0x34] sm:$0xf0]  ;;  %v6426_v15 = vld [vmem:[#allocation4 + $0xb0] sm:$0xf] }
 0x102   :  { %2097 = vmatpush.bf16.msrb.mxu1 %v6047_v53  ;;  %v6255_v53 = vor.u32 %v8113_v35, %v6252_v36  ;;  %v6395_v35 = vor.u32 %v8151_v19, %v6394_v16  ;;  %v8159_v16 = vld [vmem:[#allocation4 + $0xb4] sm:$0xf0] }
 0x103   :  { %2111 = vmatpush.bf16.msrb.mxu2 %v6175_v54  ;;  %v5980_v54 = vld [vmem:[#allocation2 + $0x538] sm:$0xf0] }
 0x104   :  { %2125 = vmatpush.bf16.msrb.mxu3 %v6303_v59  ;;  %v8109_v59 = vld [vmem:[#allocation2 + $0x72c] sm:$0xf]  ;;  %v5983_v63 = vor.u32 %v8045_v52, %v5980_v54  ;;  %v1727_v52 = vadd.f32 %v8860_v30, %v1713_v31  ;;  %v8183_v31 = vld [vmem:[#allocation4 + $0x174] sm:$0xf0] }
 0x105   :  { %2084 = vmatpush.bf16.msrb.mxu0 %v5903_v10  ;;  %v6111_v10 = vor.u32 %v8077_v55, %v6108_v56  ;;  %v6239_v7 = vor.u32 %v8109_v59, %v6236_v60  ;;  %v6378_v55 = vld [vmem:[#allocation4 + $0x50] sm:$0xf]  ;;  %v8147_v56 = vld [vmem:[#allocation4 + $0x54] sm:$0xf0]  ;;  %v1839_v60 = vadd.f32 %v1838_v25, %v1825_v51  ;;  %v8141_v25 = vld [vmem:[#allocation4 + $0x24] sm:$0xf0] }
 0x106   :  { %2098 = vmatpush.bf16.msrb.mxu1 %v6031_v2  ;;  %v5836_v2 = vld [vmem:[#allocation2 + $0x418] sm:$0xf0]  ;;  %v1826_v50 = vpop.f32.mrf.mxu1  ;;  %v1741_v30 = vadd.f32 %v8862_v32, %v1727_v52  ;;  %v6410_v51 = vld [vmem:[#allocation4 + $0x90] sm:$0xf] }
 0x107   :  { %2112 = vmatpush.bf16.msrb.mxu2 %v6159_v4  ;;  %v8041_v4 = vld [vmem:[#allocation2 + $0x50c] sm:$0xf] }
 0x108   :  { %2126 = vmatpush.bf16.msrb.mxu3 %v6287_v11  ;;  %v8073_v11 = vld [vmem:[#allocation2 + $0x60c] sm:$0xf]  ;;  %v1852_v29 = vpop.f32.mrf.mxu3  ;;  %v1755_v6 = vadd.f32 %v8872_v28, %v1741_v30  ;;  %v6427_v28 = vor.u32 %v8159_v16, %v6426_v15  ;;  %v6402_v30 = vld [vmem:[#allocation4 + $0x80] sm:$0xf]  ;;  %v8177_v16 = vld [vmem:[#allocation4 + $0x144] sm:$0xf0] }
 0x109   :  { %2085 = vmatpush.bf16.msrb.mxu0 %v5887_v21  ;;  %v1701_v21 = vadd.f32 %v8864_v45, %v361_v37  ;;  %v6095_v3 = vor.u32 %v8073_v11, %v6092_v12  ;;  %v8149_v45 = vld [vmem:[#allocation4 + $0x64] sm:$0xf0]  ;;  %v6450_v37 = vld [vmem:[#allocation4 + $0xe0] sm:$0xf]  ;;  %v6362_v12 = vld [vmem:[#allocation4 + $0x30] sm:$0xf] }
 0x10a   :  { %2099 = vmatpush.bf16.msrb.mxu1 %v6015_v22  ;;  %v5839_v22 = vor.u32 %v8009_v17, %v5836_v2  ;;  %v6434_v2 = vld [vmem:[#allocation4 + $0xc0] sm:$0xf] }
 0x10b   :  { %2113 = vmatpush.bf16.msrb.mxu2 %v6143_v23  ;;  %v6458_v23 = vld [vmem:[#allocation4 + $0xf0] sm:$0xf]  ;;  %v1715_v48 = vadd.f32 %v8866_v49, %v1701_v21  ;;  %v6498_v15 = vld [vmem:[#allocation4 + $0x140] sm:$0xf] }
 0x10c   :  { %2127 = vmatpush.bf16.msrb.mxu3 %v6271_v27  ;;  %v5967_v27 = vor.u32 %v8041_v4, %v5964_v5  ;;  %v6459_v36 = vor.u32 %v8167_v24, %v6458_v23  ;;  %v6442_v49 = vld [vmem:[#allocation4 + $0xd0] sm:$0xf]  ;;  %v1853_v5 = vadd.f32 %v1852_v29, %v1839_v60  ;;  %v6354_v24 = vld [vmem:[#allocation4 + $0x20] sm:$0xf] }
 0x10d   :  { %2086 = vmatpush.bf16.msrb.mxu0 %v5871_v40  ;;  %v1812_v40 = vpop.f32.mrf.mxu0  ;;  %v1729_v59 = vadd.f32 %v8868_v14, %v1715_v48  ;;  %v6443_v17 = vor.u32 %v8163_v1, %v6442_v49  ;;  %v6522_v29 = vld [vmem:[#allocation4 + $0x170] sm:$0xf]  ;;  %v8139_v48 = vld [vmem:[#allocation4 + $0x14] sm:$0xf0]  ;;  %v6338_v49 = vld [vmem:[#allocation4] sm:$0xf] }
 0x10e   :  { %2100 = vmatpush.bf16.msrb.mxu1 %v5999_v42  ;;  %v6386_v42 = vld [vmem:[#allocation4 + $0x60] sm:$0xf]  ;;  %v8137_v1 = vld [vmem:[#allocation4 + $0x4] sm:$0xf0] }
 0x10f   :  { %2114 = vmatpush.bf16.msrb.mxu2 %v6127_v46  ;;  %v8165_v46 = vld [vmem:[#allocation4 + $0xe4] sm:$0xf0]  ;;  %v6387_v9 = vor.u32 %v8149_v45, %v6386_v42  ;;  %v1743_v4 = vadd.f32 %v8870_v18, %v1729_v59  ;;  %v6363_v18 = vor.u32 %v8143_v13, %v6362_v12  ;;  %v6355_v42 = vor.u32 %v8141_v25, %v6354_v24  ;;  %v6388_v13 = vld [vmem:[#allocation4 + $0x68] sm:$0xf0] }
 0x110   :  { %2128 = vmatpush.bf16.msrb.mxu3 %v6255_v53  ;;  %v1813_v53 = vadd.f32 %v1812_v40, %v362_v61  ;;  %v6451_v54 = vor.u32 %v8165_v46, %v6450_v37  ;;  %v6523_v40 = vor.u32 %v8183_v31, %v6522_v29  ;;  %v8146_v29 = vld [vmem:[#allocation4 + $0x54] sm:$0xf]  ;;  %v6380_v31 = vld [vmem:[#allocation4 + $0x58] sm:$0xf0] }
 0x111   :  { %2087 = vmatpush.bf16.msrb.mxu0 %v5855_v58  ;;  %v6379_v58 = vor.u32 %v8147_v56, %v6378_v55  ;;  %v1757_v19 = vadd.f32 %v8884_v0, %v1743_v4  ;;  %v6460_v4 = vld [vmem:[#allocation4 + $0xf8] sm:$0xf0] }
 0x112   :  { %2101 = vmatpush.bf16.msrb.mxu1 %v5983_v63  ;;  %v1827_v61 = vadd.f32 %v1826_v50, %v1813_v53  ;;  %v1854_v63 = vpop.f32.mrf.mxu3  ;;  %v6346_v50 = vld [vmem:[#allocation4 + $0x10] sm:$0xf]  ;;  %v8181_v53 = vld [vmem:[#allocation4 + $0x164] sm:$0xf0] }
 0x113   :  { %2115 = vmatpush.bf16.msrb.mxu2 %v6111_v10  ;;  %v6370_v10 = vld [vmem:[#allocation4 + $0x40] sm:$0xf] }
 0x114   :  { %2129 = vmatpush.bf16.msrb.mxu3 %v6239_v7 }
 0x115   :  { %2088 = vmatpush.bf16.msrb.mxu0 %v5839_v22  ;;  %v1866_v14 = vpop.f32.mrf.mxu0  ;;  %v1769_v22 = vadd.f32 %v8874_v33, %v1755_v6 }
 0x116   :  { %2102 = vmatpush.bf16.msrb.mxu1 %v5967_v27  ;;  %v1880_v32 = vpop.f32.mrf.mxu1  ;;  %v1867_v21 = vadd.f32 %v1866_v14, %v1853_v5 }
 0x117   :  { %2116 = vmatpush.bf16.msrb.mxu2 %v6095_v3  ;;  %v8157_v3 = vld [vmem:[#allocation4 + $0xa4] sm:$0xf0]  ;;  %v1783_v33 = vadd.f32 %v8880_v57, %v1769_v22  ;;  %v6347_v57 = vor.u32 %v8139_v48, %v6346_v50  ;;  %v8164_v22 = vld [vmem:[#allocation4 + $0xe4] sm:$0xf]  ;;  %v6436_v48 = vld [vmem:[#allocation4 + $0xc8] sm:$0xf0] }
 0x118   :  { %2130 = vmatpush.bf16.msrb.mxu3 %v6223_v34  ;;  %2089 = vmatmul.bf16.vlgmr.msrb.gmra.mxu0 %v8828_v39  ;;  %v1840_v39 = vpop.f32.mrf.mxu2  ;;  %v1771_v34 = vadd.f32 %v8886_v8, %v1757_v19  ;;  %v6419_v46 = vor.u32 %v8157_v3, %v6418_v26  ;;  %v6514_v8 = vld [vmem:[#allocation4 + $0x160] sm:$0xf]  ;;  %v6490_v26 = vld [vmem:[#allocation4 + $0x130] sm:$0xf]  ;;  %v8160_v50 = vld [vmem:[#allocation4 + $0xc4] sm:$0xf] }
 0x119   :  { %2539 = vmatpush.bf16.msra.mxu0 %v6395_v35  ;;  %2103 = vmatmul.bf16.vlgmr.msrb.gmra.mxu1 %v8832_v44  ;;  %v8145_v44 = vld [vmem:[#allocation4 + $0x44] sm:$0xf0]  ;;  %v1841_v7 = vadd.f32 %v1840_v39, %v1827_v61  ;;  %v1881_v35 = vadd.f32 %v1880_v32, %v1867_v21  ;;  %v6515_v55 = vor.u32 %v8181_v53, %v6514_v8  ;;  %v8150_v39 = vld [vmem:[#allocation4 + $0x74] sm:$0xf]  ;;  %v6364_v8 = vld [vmem:[#allocation4 + $0x38] sm:$0xf0] }
 0x11a   :  { %2553 = vmatpush.bf16.msra.mxu1 %v6459_v36  ;;  %2117 = vmatmul.bf16.vlgmr.msrb.gmra.mxu2 %v8830_v43  ;;  %v8161_v43 = vld [vmem:[#allocation4 + $0xc4] sm:$0xf0]  ;;  %v1785_v45 = vadd.f32 %v8894_v38, %v1771_v34  ;;  %v1797_v56 = vadd.f32 %v8882_v62, %v1783_v33  ;;  %v8162_v34 = vld [vmem:[#allocation4 + $0xd4] sm:$0xf]  ;;  %v6383_v33 = vor.u32 %v8146_v29, %v6380_v31  ;;  %v6474_v53 = vld [vmem:[#allocation4 + $0x110] sm:$0xf] }
 0x11b   :  { %2131 = vmatmul.bf16.vlgmr.msrb.gmra.mxu3 %v8834_v47  ;;  %v6371_v47 = vor.u32 %v8145_v44, %v6370_v10  ;;  %v6435_v11 = vor.u32 %v8161_v43, %v6434_v2  ;;  %v1855_v23 = vadd.f32 %v1854_v63, %v1841_v7  ;;  %2567 = vmatpush.bf16.msra.mxu2 %v6523_v40  ;;  %v6506_v63 = vld [vmem:[#allocation4 + $0x150] sm:$0xf]  ;;  %v8179_v10 = vld [vmem:[#allocation4 + $0x154] sm:$0xf0]  ;;  %v8166_v43 = vld [vmem:[#allocation4 + $0xf4] sm:$0xf] }
 0x11c   :  { %v1799_v38 = vadd.f32 %v8896_v41, %v1785_v45  ;;  %v6507_v5 = vor.u32 %v8179_v10, %v6506_v63  ;;  %v2137_v14 = vmax.f32 %v1797_v56, 0.0  ;;  %v6339_v41 = vor.u32 %v8137_v1, %v6338_v49  ;;  %v8173_v40 = vld [vmem:[#allocation4 + $0x124] sm:$0xf0]  ;;  %v8144_v45 = vld [vmem:[#allocation4 + $0x44] sm:$0xf] }
 0x11d   :  { %2540 = vmatpush.bf16.msra.mxu0 %v6387_v9  ;;  %v1868_v36 = vpop.f32.mrf.mxu0  ;;  %v8155_v9 = vld [vmem:[#allocation4 + $0x94] sm:$0xf0]  ;;  %v6463_v12 = vor.u32 %v8166_v43, %v6460_v4  ;;  %v6428_v56 = vld [vmem:[#allocation4 + $0xb8] sm:$0xf0]  ;;  %v8140_v1 = vld [vmem:[#allocation4 + $0x24] sm:$0xf] }
 0x11e   :  { %2554 = vmatpush.bf16.msra.mxu1 %v6451_v54  ;;  %v1908_v0 = vpop.f32.mrf.mxu3  ;;  %v1869_v37 = vadd.f32 %v1868_v36, %v1855_v23  ;;  %v1882_v52 = vpop.f32.mrf.mxu1  ;;  %v6411_v60 = vor.u32 %v8155_v9, %v6410_v51  ;;  %v2141_v6 = vmax.f32 %v1799_v38, 0.0  ;;  %v6499_v23 = vor.u32 %v8177_v16, %v6498_v15  ;;  %v6444_v36 = vld [vmem:[#allocation4 + $0xd8] sm:$0xf0]  ;;  %v6356_v38 = vld [vmem:[#allocation4 + $0x28] sm:$0xf0] }
 0x11f   :  { %2568 = vmatpush.bf16.msra.mxu2 %v6515_v55  ;;  %v6439_v9 = vor.u32 %v8160_v50, %v6436_v48  ;;  %v8158_v55 = vld [vmem:[#allocation4 + $0xb4] sm:$0xf]  ;;  %v6524_v63 = vld [vmem:[#allocation4 + $0x178] sm:$0xf0]  ;;  %v6340_v15 = vld [vmem:[#allocation4 + $0x8] sm:$0xf0] }
 0x120   :  { %v1894_v27 = vpop.f32.mrf.mxu2  ;;  %v1883_v59 = vadd.f32 %v1882_v52, %v1869_v37  ;;  %v6372_v37 = vld [vmem:[#allocation4 + $0x48] sm:$0xf0]  ;;  %v8142_v52 = vld [vmem:[#allocation4 + $0x34] sm:$0xf]  ;;  %v6348_v43 = vld [vmem:[#allocation4 + $0x18] sm:$0xf0] }
 0x121   :  { %2541 = vmatpush.bf16.msra.mxu0 %v6379_v58  ;;  %v1895_v54 = vadd.f32 %v1894_v27, %v1881_v35  ;;  %v8153_v58 = vld [vmem:[#allocation4 + $0x84] sm:$0xf0]  ;;  %v8175_v27 = vld [vmem:[#allocation4 + $0x134] sm:$0xf0]  ;;  %v6375_v51 = vor.u32 %v8144_v45, %v6372_v37  ;;  %v6367_v49 = vor.u32 %v8142_v52, %v6364_v8  ;;  %v8154_v4 = vld [vmem:[#allocation4 + $0x94] sm:$0xf] }
 0x122   :  { %2555 = vmatpush.bf16.msra.mxu1 %v6443_v17  ;;  %v6396_v17 = vld [vmem:[#allocation4 + $0x78] sm:$0xf0]  ;;  %v6403_v32 = vor.u32 %v8153_v58, %v6402_v30  ;;  %v6491_v35 = vor.u32 %v8175_v27, %v6490_v26  ;;  %v6466_v30 = vld [vmem:[#allocation4 + $0x100] sm:$0xf]  ;;  %v8169_v58 = vld [vmem:[#allocation4 + $0x104] sm:$0xf0] }
 0x123   :  { %v1909_v44 = vadd.f32 %v1908_v0, %v1895_v54  ;;  %v6399_v7 = vor.u32 %v8150_v39, %v6396_v17  ;;  %2569 = vmatpush.bf16.msra.mxu2 %v6507_v5  ;;  %v6482_v0 = vld [vmem:[#allocation4 + $0x120] sm:$0xf]  ;;  %v8171_v54 = vld [vmem:[#allocation4 + $0x114] sm:$0xf0]  ;;  %v6420_v39 = vld [vmem:[#allocation4 + $0xa8] sm:$0xf0] }
 0x124   :  { %v8182_v17 = vld [vmem:[#allocation4 + $0x174] sm:$0xf]  ;;  %v8152_v16 = vld [vmem:[#allocation4 + $0x84] sm:$0xf]  ;;  %v6500_v31 = vld [vmem:[#allocation4 + $0x148] sm:$0xf0] }
 0x125   :  { %2542 = vmatpush.bf16.msra.mxu0 %v6371_v47  ;;  %v2138_v19 = vmax.f32 %v1909_v44, 0.0  ;;  %v6527_v10 = vor.u32 %v8182_v17, %v6524_v63  ;;  %v6359_v44 = vor.u32 %v8140_v1, %v6356_v38  ;;  %v8176_v29 = vld [vmem:[#allocation4 + $0x144] sm:$0xf]  ;;  %v6484_v37 = vld [vmem:[#allocation4 + $0x128] sm:$0xf0] }
 0x126   :  { %2556 = vmatpush.bf16.msra.mxu1 %v6435_v11  ;;  %v1910_v62 = vpop.f32.mrf.mxu3  ;;  %v8148_v11 = vld [vmem:[#allocation4 + $0x64] sm:$0xf]  ;;  %v8170_v52 = vld [vmem:[#allocation4 + $0x114] sm:$0xf]  ;;  %v6468_v1 = vld [vmem:[#allocation4 + $0x108] sm:$0xf0] }
 0x127   :  { %v6391_v25 = vor.u32 %v8148_v11, %v6388_v13  ;;  %2570 = vmatpush.bf16.msra.mxu2 %v6499_v23  ;;  %v8136_v13 = vld [vmem:[#allocation4 + $0x4] sm:$0xf]  ;;  %v8199_v38 = vld [vmem:[#allocation4 + $0x1f4] sm:$0xf0] }
 0x128   :  { %v1896_v61 = vpop.f32.mrf.mxu2  ;;  %v6343_v23 = vor.u32 %v8136_v13, %v6340_v15  ;;  %v8172_v45 = vld [vmem:[#allocation4 + $0x124] sm:$0xf] }
 0x129   :  { %2543 = vmatpush.bf16.msra.mxu0 %v6363_v18  ;;  %v1897_v2 = vadd.f32 %v1896_v61, %v1883_v59  ;;  %v6452_v18 = vld [vmem:[#allocation4 + $0xe8] sm:$0xf0]  ;;  %v6431_v59 = vor.u32 %v8158_v55, %v6428_v56  ;;  %v6467_v61 = vor.u32 %v8169_v58, %v6466_v30  ;;  %v6487_v48 = vor.u32 %v8172_v45, %v6484_v37  ;;  %v8196_v45 = vld [vmem:[#allocation4 + $0x1e4] sm:$0xf] }
 0x12a   :  { %2557 = vmatpush.bf16.msra.mxu1 %v6427_v28  ;;  %v8919_v28 = vpack.c.bf16 %v2141_v6, %v2137_v14  ;;  %v6455_v3 = vor.u32 %v8164_v22, %v6452_v18  ;;  %v6412_v14 = vld [vmem:[#allocation4 + $0x98] sm:$0xf0]  ;;  %v6516_v6 = vld [vmem:[#allocation4 + $0x168] sm:$0xf0] }
 0x12b   :  { %v1911_v47 = vadd.f32 %v1910_v62, %v1897_v2  ;;  %2571 = vmatpush.bf16.msra.mxu2 %v6491_v35  ;;  %v8138_v62 = vld [vmem:[#allocation4 + $0x14] sm:$0xf]  ;;  %v6508_v22 = vld [vmem:[#allocation4 + $0x158] sm:$0xf0]  ;;  %v6580_v37 = vld [vmem:[#allocation4 + $0x1e8] sm:$0xf0] }
 0x12c   :  { %v6351_v11 = vor.u32 %v8138_v62, %v6348_v43  ;;  %v8195_v43 = vld [vmem:[#allocation4 + $0x1d4] sm:$0xf0] }
 0x12d   :  { %2544 = vmatpush.bf16.msra.mxu0 %v6355_v42  ;;  %v2142_v21 = vmax.f32 %v1911_v47, 0.0  ;;  %v6447_v42 = vor.u32 %v8162_v34, %v6444_v36  ;;  %v6503_v34 = vor.u32 %v8176_v29, %v6500_v31  ;;  %v6538_v29 = vld [vmem:[#allocation4 + $0x190] sm:$0xf]  ;;  %v8187_v31 = vld [vmem:[#allocation4 + $0x194] sm:$0xf0] }
 0x12e   :  { %2558 = vmatpush.bf16.msra.mxu1 %v6419_v46  ;;  %v6483_v46 = vor.u32 %v8173_v40, %v6482_v0  ;;  %v8174_v40 = vld [vmem:[#allocation4 + $0x134] sm:$0xf] }
 0x12f   :  { %v8921_v24 = vpack.c.bf16 %v2142_v21, %v2138_v19  ;;  %v6404_v19 = vld [vmem:[#allocation4 + $0x88] sm:$0xf0]  ;;  %v8178_v21 = vld [vmem:[#allocation4 + $0x154] sm:$0xf] }
 0x130   :  { %2572 = vmatpush.bf16.msra.mxu2 %v6483_v46  ;;  %v6511_v18 = vor.u32 %v8178_v21, %v6508_v22 }
 0x131   :  { %2545 = vmatpush.bf16.msra.mxu0 %v6347_v57  ;;  %v6475_v57 = vor.u32 %v8171_v54, %v6474_v53 }
 0x132   :  { %2559 = vmatpush.bf16.msra.mxu1 %v6411_v60  ;;  %v8156_v60 = vld [vmem:[#allocation4 + $0xa4] sm:$0xf] }
 0x133   :  { %v6423_v2 = vor.u32 %v8156_v60, %v6420_v39 }
 0x134   :  { %2573 = vmatpush.bf16.msra.mxu2 %v6475_v57  ;;  %v6586_v57 = vld [vmem:[#allocation4 + $0x1f0] sm:$0xf] }
 0x135   :  { %2546 = vmatpush.bf16.msra.mxu0 %v6339_v41  ;;  %v1922_v5 = vpop.f32.mrf.mxu0  ;;  %v8180_v41 = vld [vmem:[#allocation4 + $0x164] sm:$0xf] }
 0x136   :  { %2560 = vmatpush.bf16.msra.mxu1 %v6403_v32  ;;  %v1936_v47 = vpop.f32.mrf.mxu1  ;;  %v6519_v32 = vor.u32 %v8180_v41, %v6516_v6  ;;  %v6562_v6 = vld [vmem:[#allocation4 + $0x1c0] sm:$0xf] }
 0x138   :  { %2547 = vmatmul.bf16.vlgmr.msra.gmra.mxu0 %v8919_v28  ;;  %2574 = vmatpush.bf16.msra.mxu2 %v6467_v61 }
 0x139   :  { %2595 = vmatpush.bf16.msrb.mxu0 %v6399_v7  ;;  %2561 = vmatmul.bf16.vlgmr.msra.gmra.mxu1 %v8921_v24  ;;  %v363_v7 = vperm.slane %v8891_v20, 2 }
 0x13a   :  { %2609 = vmatpush.bf16.msrb.mxu1 %v6463_v12  ;;  %v6415_v12 = vor.u32 %v8154_v4, %v6412_v14 }
 0x13b   :  { %v1923_v27 = vadd.f32 %v1922_v5, %v363_v7 }
 0x13c   :  { %2623 = vmatpush.bf16.msrb.mxu2 %v6527_v10  ;;  %v6578_v10 = vld [vmem:[#allocation4 + $0x1e0] sm:$0xf] }
 0x13d   :  { %2596 = vmatpush.bf16.msrb.mxu0 %v6391_v25  ;;  %v6407_v25 = vor.u32 %v8152_v16, %v6404_v19  ;;  %v1950_v26 = vpop.f32.mrf.mxu2  ;;  %v1924_v35 = vpop.f32.mrf.mxu0  ;;  %v1937_v0 = vadd.f32 %v1936_v47, %v1923_v27  ;;  %v8193_v47 = vld [vmem:[#allocation4 + $0x1c4] sm:$0xf0]  ;;  %v6554_v16 = vld [vmem:[#allocation4 + $0x1b0] sm:$0xf]  ;;  %v8191_v19 = vld [vmem:[#allocation4 + $0x1b4] sm:$0xf0] }
 0x13e   :  { %2610 = vmatpush.bf16.msrb.mxu1 %v6455_v3  ;;  %v1964_v3 = vpop.f32.mrf.mxu3  ;;  %v1938_v36 = vpop.f32.mrf.mxu1  ;;  %v1925_v46 = vadd.f32 %v1924_v35, %v363_v7  ;;  %v6555_v22 = vor.u32 %v8191_v19, %v6554_v16  ;;  %v6530_v35 = vld [vmem:[#allocation4 + $0x180] sm:$0xf] }
 0x13f   :  { %v1951_v50 = vadd.f32 %v1950_v26, %v1937_v0  ;;  %v8189_v26 = vld [vmem:[#allocation4 + $0x1a4] sm:$0xf0] }
 0x140   :  { %2624 = vmatpush.bf16.msrb.mxu2 %v6519_v32  ;;  %v1939_v8 = vadd.f32 %v1938_v36, %v1925_v46  ;;  %v8185_v36 = vld [vmem:[#allocation4 + $0x184] sm:$0xf0]  ;;  %v6583_v46 = vor.u32 %v8196_v45, %v6580_v37  ;;  %v8224_v37 = vld [vmem:[#allocation6 + $0xc4] sm:$0xf] }
 0x141   :  { %2597 = vmatpush.bf16.msrb.mxu0 %v6383_v33  ;;  %v6492_v33 = vld [vmem:[#allocation4 + $0x138] sm:$0xf0]  ;;  %v1965_v54 = vadd.f32 %v1964_v3, %v1951_v50  ;;  %v6531_v0 = vor.u32 %v8185_v36, %v6530_v35  ;;  %v8230_v35 = vld [vmem:[#allocation6 + $0xec] sm:$0xf0]  ;;  %v8228_v36 = vld [vmem:[#allocation6 + $0xe4] sm:$0xf] }
 0x142   :  { %2611 = vmatpush.bf16.msrb.mxu1 %v6447_v42  ;;  %v6495_v42 = vor.u32 %v8174_v40, %v6492_v33  ;;  %v8198_v40 = vld [vmem:[#allocation4 + $0x1f4] sm:$0xf]  ;;  %v6588_v33 = vld [vmem:[#allocation4 + $0x1f8] sm:$0xf0] }
 0x144   :  { %2625 = vmatpush.bf16.msrb.mxu2 %v6511_v18 }
 0x145   :  { %2598 = vmatpush.bf16.msrb.mxu0 %v6375_v51  ;;  %v1952_v51 = vpop.f32.mrf.mxu2 }
 0x146   :  { %2612 = vmatpush.bf16.msrb.mxu1 %v6439_v9  ;;  %v6476_v9 = vld [vmem:[#allocation4 + $0x118] sm:$0xf0]  ;;  %v1966_v53 = vpop.f32.mrf.mxu3 }
 0x147   :  { %v6479_v56 = vor.u32 %v8170_v52, %v6476_v9 }
 0x148   :  { %2626 = vmatpush.bf16.msrb.mxu2 %v6503_v34  ;;  %v6539_v34 = vor.u32 %v8187_v31, %v6538_v29 }
 0x149   :  { %2599 = vmatpush.bf16.msrb.mxu0 %v6367_v49  ;;  %v8168_v49 = vld [vmem:[#allocation4 + $0x104] sm:$0xf] }
 0x14a   :  { %2613 = vmatpush.bf16.msrb.mxu1 %v6431_v59  ;;  %v1953_v59 = vadd.f32 %v1952_v51, %v1939_v8  ;;  %v6471_v30 = vor.u32 %v8168_v49, %v6468_v1  ;;  %v6572_v51 = vld [vmem:[#allocation4 + $0x1d8] sm:$0xf0]  ;;  %v8192_v8 = vld [vmem:[#allocation4 + $0x1c4] sm:$0xf] }
 0x14b   :  { %v6556_v49 = vld [vmem:[#allocation4 + $0x1b8] sm:$0xf0] }
 0x14c   :  { %2627 = vmatpush.bf16.msrb.mxu2 %v6495_v42  ;;  %v1967_v58 = vadd.f32 %v1966_v53, %v1953_v59  ;;  %v6591_v42 = vor.u32 %v8198_v40, %v6588_v33  ;;  %v6564_v53 = vld [vmem:[#allocation4 + $0x1c8] sm:$0xf0]  ;;  %v6708_v40 = vld [vmem:[#allocation6 + $0xf0] sm:$0xf0]  ;;  %v6690_v33 = vld [vmem:[#allocation6 + $0xc0] sm:$0xf] }
 0x14d   :  { %2600 = vmatpush.bf16.msrb.mxu0 %v6359_v44  ;;  %v8197_v44 = vld [vmem:[#allocation4 + $0x1e4] sm:$0xf0]  ;;  %v6711_v45 = vor.u32 %v8228_v36, %v6708_v40  ;;  %v6594_v36 = vld [vmem:[#allocation6] sm:$0xf]  ;;  %v8200_v40 = vld [vmem:[#allocation6 + $0x4] sm:$0xf] }
 0x14e   :  { %2614 = vmatpush.bf16.msrb.mxu1 %v6423_v2  ;;  %v6570_v2 = vld [vmem:[#allocation4 + $0x1d0] sm:$0xf]  ;;  %v6579_v62 = vor.u32 %v8197_v44, %v6578_v10 }
 0x14f   :  { %v6571_v14 = vor.u32 %v8195_v43, %v6570_v2 }
 0x150   :  { %2628 = vmatpush.bf16.msrb.mxu2 %v6487_v48  ;;  %v8194_v48 = vld [vmem:[#allocation4 + $0x1d4] sm:$0xf] }
 0x151   :  { %2601 = vmatpush.bf16.msrb.mxu0 %v6351_v11  ;;  %v6563_v11 = vor.u32 %v8193_v47, %v6562_v6  ;;  %v6575_v52 = vor.u32 %v8194_v48, %v6572_v51  ;;  %v6674_v51 = vld [vmem:[#allocation6 + $0xa0] sm:$0xf] }
 0x152   :  { %2615 = vmatpush.bf16.msrb.mxu1 %v6415_v12 }
 0x154   :  { %2629 = vmatpush.bf16.msrb.mxu2 %v6479_v56 }
 0x155   :  { %2602 = vmatpush.bf16.msrb.mxu0 %v6343_v23  ;;  %v1978_v55 = vpop.f32.mrf.mxu0 }
 0x156   :  { %2616 = vmatpush.bf16.msrb.mxu1 %v6407_v25  ;;  %v1979_v60 = vadd.f32 %v1978_v55, %v1965_v54  ;;  %v6546_v25 = vld [vmem:[#allocation4 + $0x1a0] sm:$0xf]  ;;  %v364_v54 = vperm.slane %v8891_v20, 3  ;;  %v6567_v55 = vor.u32 %v8192_v8, %v6564_v53  ;;  %v6540_v20 = vld [vmem:[#allocation4 + $0x198] sm:$0xf0] }
 0x157   :  { %v6547_v3 = vor.u32 %v8189_v26, %v6546_v25  ;;  %v6676_v8 = vld [vmem:[#allocation6 + $0xb0] sm:$0xf0]  ;;  %v6834_v53 = vld [vmem:[#allocation6 + $0x1e0] sm:$0xf] }
 0x158   :  { %2603 = vmatmul.bf16.vlgmr.msrb.gmra.mxu0 %v8919_v28  ;;  %v1992_v28 = vpop.f32.mrf.mxu1  ;;  %2630 = vmatpush.bf16.msrb.mxu2 %v6471_v30 }
 0x159   :  { %2617 = vmatmul.bf16.vlgmr.msrb.gmra.mxu1 %v8921_v24  ;;  %v6587_v24 = vor.u32 %v8199_v38, %v6586_v57  ;;  %v1993_v61 = vadd.f32 %v1992_v28, %v1979_v60  ;;  %v8190_v28 = vld [vmem:[#allocation4 + $0x1b4] sm:$0xf]  ;;  %v6548_v60 = vld [vmem:[#allocation4 + $0x1a8] sm:$0xf0] }
 0x15a   :  { %v6559_v59 = vor.u32 %v8190_v28, %v6556_v49  ;;  %v6836_v28 = vld [vmem:[#allocation6 + $0x1f0] sm:$0xf0] }
 0x15b   :  { %2581 = vmatpush.bf16.msra.mxu3 %v6587_v24  ;;  %v8188_v24 = vld [vmem:[#allocation4 + $0x1a4] sm:$0xf] }
 0x15c   :  { %v6551_v30 = vor.u32 %v8188_v24, %v6548_v60  ;;  %v6818_v24 = vld [vmem:[#allocation6 + $0x1c0] sm:$0xf]  ;;  %v8216_v60 = vld [vmem:[#allocation6 + $0x84] sm:$0xf] }
 0x15d   :  { %v2006_v39 = vpop.f32.mrf.mxu2  ;;  %v1980_v17 = vpop.f32.mrf.mxu0 }
 0x15e   :  { %v2020_v63 = vpop.f32.mrf.mxu3  ;;  %v1981_v4 = vadd.f32 %v1980_v17, %v1967_v58  ;;  %v2007_v41 = vadd.f32 %v2006_v39, %v1993_v61 }
 0x15f   :  { %2582 = vmatpush.bf16.msra.mxu3 %v6579_v62 }
 0x160   :  { %v1994_v5 = vpop.f32.mrf.mxu1  ;;  %v2021_v12 = vadd.f32 %v2020_v63, %v2007_v41  ;;  %v8186_v63 = vld [vmem:[#allocation4 + $0x194] sm:$0xf] }
 0x161   :  { %v1995_v32 = vadd.f32 %v1994_v5, %v1981_v4  ;;  %v6543_v43 = vor.u32 %v8186_v63, %v6540_v20  ;;  %v8184_v4 = vld [vmem:[#allocation4 + $0x184] sm:$0xf]  ;;  %v6532_v5 = vld [vmem:[#allocation4 + $0x188] sm:$0xf0] }
 0x162   :  { %v2139_v18 = vmax.f32 %v2021_v12, 0.0 }
 0x163   :  { %2583 = vmatpush.bf16.msra.mxu3 %v6571_v14  ;;  %v6535_v14 = vor.u32 %v8184_v4, %v6532_v5  ;;  %v8252_v4 = vld [vmem:[#allocation6 + $0x1a4] sm:$0xf] }
 0x164   :  { %v8212_v5 = vld [vmem:[#allocation6 + $0x64] sm:$0xf] }
 0x165   :  { %v2008_v7 = vpop.f32.mrf.mxu2 }
 0x166   :  { %v2009_v13 = vadd.f32 %v2008_v7, %v1995_v32  ;;  %v2022_v15 = vpop.f32.mrf.mxu3 }
 0x167   :  { %2584 = vmatpush.bf16.msra.mxu3 %v6563_v11 }
 0x168   :  { %v2023_v21 = vadd.f32 %v2022_v15, %v2009_v13 }
 0x16a   :  { %v2143_v23 = vmax.f32 %v2023_v21, 0.0 }
 0x16b   :  { %2585 = vmatpush.bf16.msra.mxu3 %v6555_v22 }
 0x16c   :  { %v2147_v27 = vpack.c.bf16 %v2143_v23, %v2139_v18 }
 0x16e   :  { %2575 = vmatmul.bf16.vlgmr.msra.gmra.mxu2 %v2147_v27 }
 0x16f   :  { %2586 = vmatpush.bf16.msra.mxu3 %v6547_v3  ;;  %3079 = vmatpush.bf16.msra.mxu2 %v6711_v45 }
 0x173   :  { %2587 = vmatpush.bf16.msra.mxu3 %v6539_v34  ;;  %v6706_v34 = vld [vmem:[#allocation6 + $0xe0] sm:$0xf] }
 0x175   :  { %v2034_v50 = vpop.f32.mrf.mxu0 }
 0x176   :  { %v2048_v9 = vpop.f32.mrf.mxu1  ;;  %v2035_v1 = vadd.f32 %v2034_v50, %v364_v54 }
 0x177   :  { %2588 = vmatpush.bf16.msra.mxu3 %v6531_v0  ;;  %v6707_v0 = vor.u32 %v8230_v35, %v6706_v34 }
 0x178   :  { %v2049_v39 = vadd.f32 %v2048_v9, %v2035_v1  ;;  %v8220_v9 = vld [vmem:[#allocation6 + $0xa4] sm:$0xf]  ;;  %v6658_v1 = vld [vmem:[#allocation6 + $0x80] sm:$0xf] }
 0x179   :  { %3051 = vmatpush.bf16.msra.mxu0 %v6707_v0  ;;  %v6679_v49 = vor.u32 %v8220_v9, %v6676_v8  ;;  %v8202_v0 = vld [vmem:[#allocation6 + $0xc] sm:$0xf0]  ;;  %v6770_v9 = vld [vmem:[#allocation6 + $0x160] sm:$0xf] }
 0x17a   :  { %v8246_v8 = vld [vmem:[#allocation6 + $0x16c] sm:$0xf0] }
 0x17b   :  { %2637 = vmatpush.bf16.msrb.mxu3 %v6591_v42  ;;  %v8226_v42 = vld [vmem:[#allocation6 + $0xcc] sm:$0xf0] }
 0x17c   :  { %v6691_v50 = vor.u32 %v8226_v42, %v6690_v33  ;;  %v6596_v33 = vld [vmem:[#allocation6 + $0x10] sm:$0xf0]  ;;  %v6595_v42 = vor.u32 %v8202_v0, %v6594_v36 }
 0x17d   :  { %v2062_v56 = vpop.f32.mrf.mxu2  ;;  %v2036_v38 = vpop.f32.mrf.mxu0  ;;  %v6599_v45 = vor.u32 %v8200_v40, %v6596_v33  ;;  %v6634_v33 = vld [vmem:[#allocation6 + $0x48] sm:$0xf] }
 0x17e   :  { %2631 = vmatmul.bf16.vlgmr.msrb.gmra.mxu2 %v2147_v27  ;;  %v2076_v57 = vpop.f32.mrf.mxu3  ;;  %v2050_v58 = vpop.f32.mrf.mxu1  ;;  %v2037_v61 = vadd.f32 %v2036_v38, %v364_v54  ;;  %v2063_v10 = vadd.f32 %v2062_v56, %v2049_v39  ;;  %v8262_v54 = vld [vmem:[#allocation6 + $0x1ec] sm:$0xf0]  ;;  %3052 = vmatpush.bf16.msra.mxu0 %v6691_v50  ;;  %v8229_v50 = vld [vmem:[#allocation6 + $0xec] sm:$0xf] }
 0x17f   :  { %2638 = vmatpush.bf16.msrb.mxu3 %v6583_v46  ;;  %v6692_v46 = vld [vmem:[#allocation6 + $0xd0] sm:$0xf0]  ;;  %v6835_v56 = vor.u32 %v8262_v54, %v6834_v53  ;;  %v8218_v38 = vld [vmem:[#allocation6 + $0x8c] sm:$0xf0]  ;;  %v8244_v53 = vld [vmem:[#allocation6 + $0x164] sm:$0xf]  ;;  %v6771_v54 = vor.u32 %v8246_v8, %v6770_v9 }
 0x180   :  { %v2051_v44 = vadd.f32 %v2050_v58, %v2037_v61  ;;  %v2077_v6 = vadd.f32 %v2076_v57, %v2063_v10  ;;  %v6695_v48 = vor.u32 %v8224_v37, %v6692_v46  ;;  %v8260_v57 = vld [vmem:[#allocation6 + $0x1e4] sm:$0xf]  ;;  %v8258_v58 = vld [vmem:[#allocation6 + $0x1cc] sm:$0xf0]  ;;  %v6659_v63 = vor.u32 %v8218_v38, %v6658_v1  ;;  %v6802_v10 = vld [vmem:[#allocation6 + $0x1a0] sm:$0xf] }
 0x181   :  { %3065 = vmatpush.bf16.msra.mxu1 %v6835_v56  ;;  %v6819_v39 = vor.u32 %v8258_v58, %v6818_v24  ;;  %v8256_v61 = vld [vmem:[#allocation6 + $0x1c4] sm:$0xf]  ;;  %v6714_v37 = vld [vmem:[#allocation6 + $0xe8] sm:$0xf]  ;;  %v8231_v46 = vld [vmem:[#allocation6 + $0xf4] sm:$0xf0] }
 0x182   :  { %3080 = vmatpush.bf16.msra.mxu2 %v6695_v48  ;;  %v6715_v48 = vor.u32 %v8231_v46, %v6714_v37  ;;  %v6698_v56 = vld [vmem:[#allocation6 + $0xc8] sm:$0xf]  ;;  %v8225_v1 = vld [vmem:[#allocation6 + $0xcc] sm:$0xf]  ;;  %v6700_v38 = vld [vmem:[#allocation6 + $0xd8] sm:$0xf0] }
 0x183   :  { %2639 = vmatpush.bf16.msrb.mxu3 %v6575_v52  ;;  %v8222_v52 = vld [vmem:[#allocation6 + $0xac] sm:$0xf0]  ;;  %v6703_v24 = vor.u32 %v8225_v1, %v6700_v38  ;;  %v6756_v58 = vld [vmem:[#allocation6 + $0x150] sm:$0xf0]  ;;  %v8259_v46 = vld [vmem:[#allocation6 + $0x1d4] sm:$0xf0] }
 0x184   :  { %v8257_v9 = vld [vmem:[#allocation6 + $0x1cc] sm:$0xf]  ;;  %v6828_v8 = vld [vmem:[#allocation6 + $0x1d8] sm:$0xf0]  ;;  %v8255_v1 = vld [vmem:[#allocation6 + $0x1b4] sm:$0xf0] }
 0x185   :  { %v2064_v17 = vpop.f32.mrf.mxu2  ;;  %3066 = vmatpush.bf16.msra.mxu1 %v6819_v39  ;;  %v8205_v38 = vld [vmem:[#allocation6 + $0x2c] sm:$0xf] }
 0x186   :  { %v2078_v2 = vpop.f32.mrf.mxu3  ;;  %v2065_v47 = vadd.f32 %v2064_v17, %v2051_v44  ;;  %v6820_v17 = vld [vmem:[#allocation6 + $0x1d0] sm:$0xf0]  ;;  %v8254_v44 = vld [vmem:[#allocation6 + $0x1ac] sm:$0xf0]  ;;  %3081 = vmatpush.bf16.msra.mxu2 %v6679_v49 }
 0x187   :  { %2640 = vmatpush.bf16.msrb.mxu3 %v6567_v55  ;;  %v6675_v55 = vor.u32 %v8222_v52, %v6674_v51  ;;  %v6823_v20 = vor.u32 %v8256_v61, %v6820_v17  ;;  %v6716_v51 = vld [vmem:[#allocation6 + $0xf8] sm:$0xf0]  ;;  %v6682_v17 = vld [vmem:[#allocation6 + $0xa8] sm:$0xf] }
 0x188   :  { %v2079_v11 = vadd.f32 %v2078_v2, %v2065_v47  ;;  %v6719_v52 = vor.u32 %v8229_v50, %v6716_v51  ;;  %v8209_v50 = vld [vmem:[#allocation6 + $0x4c] sm:$0xf] }
 0x189   :  { %3053 = vmatpush.bf16.msra.mxu0 %v6675_v55  ;;  %v6772_v55 = vld [vmem:[#allocation6 + $0x170] sm:$0xf0] }
 0x18b   :  { %2641 = vmatpush.bf16.msrb.mxu3 %v6559_v59  ;;  %v6839_v59 = vor.u32 %v8260_v57, %v6836_v28  ;;  %v8227_v57 = vld [vmem:[#allocation6 + $0xd4] sm:$0xf0]  ;;  %v6775_v28 = vor.u32 %v8244_v53, %v6772_v55  ;;  %v8932_v53 = vld [vmem:[%s9069_s6] sm:$0x3] }
 0x18c   :  { %v6699_v49 = vor.u32 %v8227_v57, %v6698_v56  ;;  %v6618_v56 = vld [vmem:[#allocation6 + $0x28] sm:$0xf]  ;;  %v8207_v57 = vld [vmem:[#allocation6 + $0x34] sm:$0xf0] }
 0x18d   :  { %3054 = vmatpush.bf16.msra.mxu0 %v6659_v63  ;;  %v8223_v63 = vld [vmem:[#allocation6 + $0xb4] sm:$0xf0] }
 0x18f   :  { %2642 = vmatpush.bf16.msrb.mxu3 %v6551_v30  ;;  %v6660_v30 = vld [vmem:[#allocation6 + $0x90] sm:$0xf0] }
 0x190   :  { %v6663_v2 = vor.u32 %v8216_v60, %v6660_v30  ;;  %v8242_v60 = vld [vmem:[#allocation6 + $0x14c] sm:$0xf0]  ;;  %v8240_v30 = vld [vmem:[#allocation6 + $0x144] sm:$0xf] }
 0x191   :  { %v6759_v61 = vor.u32 %v8240_v30, %v6756_v58  ;;  %v8253_v58 = vld [vmem:[#allocation6 + $0x1ac] sm:$0xf] }
 0x192   :  { %3082 = vmatpush.bf16.msra.mxu2 %v6663_v2 }
 0x193   :  { %2643 = vmatpush.bf16.msrb.mxu3 %v6543_v43  ;;  %v8214_v43 = vld [vmem:[#allocation6 + $0x6c] sm:$0xf0] }
 0x195   :  { %v2090_v62 = vpop.f32.mrf.mxu0 }
 0x196   :  { %v2104_v41 = vpop.f32.mrf.mxu1  ;;  %v2091_v32 = vadd.f32 %v2090_v62, %v2077_v6  ;;  %v6642_v62 = vld [vmem:[#allocation6 + $0x60] sm:$0xf]  ;;  %v6804_v6 = vld [vmem:[#allocation6 + $0x1b0] sm:$0xf0] }
 0x197   :  { %2644 = vmatpush.bf16.msrb.mxu3 %v6535_v14  ;;  %v6644_v14 = vld [vmem:[#allocation6 + $0x70] sm:$0xf0]  ;;  %v6807_v47 = vor.u32 %v8252_v4, %v6804_v6  ;;  %v8236_v4 = vld [vmem:[#allocation6 + $0x124] sm:$0xf]  ;;  %v8219_v6 = vld [vmem:[#allocation6 + $0x94] sm:$0xf0] }
 0x198   :  { %v2105_v15 = vadd.f32 %v2104_v41, %v2091_v32  ;;  %v6803_v41 = vor.u32 %v8254_v44, %v6802_v10  ;;  %v6786_v32 = vld [vmem:[#allocation6 + $0x180] sm:$0xf]  ;;  %v6683_v10 = vor.u32 %v8223_v63, %v6682_v17  ;;  %v6684_v44 = vld [vmem:[#allocation6 + $0xb8] sm:$0xf0]  ;;  %v6602_v63 = vld [vmem:[#allocation6 + $0x8] sm:$0xf] }
 0x19a   :  { %3067 = vmatpush.bf16.msra.mxu1 %v6803_v41  ;;  %v6666_v41 = vld [vmem:[#allocation6 + $0x88] sm:$0xf] }
 0x19d   :  { %v2118_v7 = vpop.f32.mrf.mxu2  ;;  %v2092_v13 = vpop.f32.mrf.mxu0 }
 0x19e   :  { %v2132_v12 = vpop.f32.mrf.mxu3  ;;  %v2093_v16 = vadd.f32 %v2092_v13, %v2079_v11  ;;  %v2119_v19 = vadd.f32 %v2118_v7, %v2105_v15  ;;  %v2106_v21 = vpop.f32.mrf.mxu1  ;;  %v8250_v7 = vld [vmem:[#allocation6 + $0x18c] sm:$0xf0]  ;;  %v6643_v11 = vor.u32 %v8214_v43, %v6642_v62  ;;  %v6788_v13 = vld [vmem:[#allocation6 + $0x190] sm:$0xf0]  ;;  %v6647_v15 = vor.u32 %v8212_v5, %v6644_v14  ;;  %v6738_v62 = vld [vmem:[#allocation6 + $0x120] sm:$0xf] }
 0x19f   :  { %v8238_v43 = vld [vmem:[#allocation6 + $0x12c] sm:$0xf0]  ;;  %v6740_v14 = vld [vmem:[#allocation6 + $0x130] sm:$0xf0] }
 0x1a0   :  { %v2107_v22 = vadd.f32 %v2106_v21, %v2093_v16  ;;  %v2133_v23 = vadd.f32 %v2132_v12, %v2119_v19  ;;  %v8248_v12 = vld [vmem:[#allocation6 + $0x184] sm:$0xf]  ;;  %v6626_v16 = vld [vmem:[#allocation6 + $0x40] sm:$0xf]  ;;  %v8210_v19 = vld [vmem:[#allocation6 + $0x4c] sm:$0xf0]  ;;  %3055 = vmatpush.bf16.msra.mxu0 %v6643_v11  ;;  %3083 = vmatpush.bf16.msra.mxu2 %v6647_v15  ;;  %v6739_v5 = vor.u32 %v8238_v43, %v6738_v62 }
 0x1a1   :  { %v8208_v21 = vld [vmem:[#allocation6 + $0x44] sm:$0xf]  ;;  %v6668_v11 = vld [vmem:[#allocation6 + $0x98] sm:$0xf0]  ;;  %v8234_v15 = vld [vmem:[#allocation6 + $0x10c] sm:$0xf0] }
 0x1a2   :  { %v2140_v3 = vmax.f32 %v2133_v23, 0.0  ;;  %v6791_v23 = vor.u32 %v8248_v12, %v6788_v13  ;;  %v6722_v13 = vld [vmem:[#allocation6 + $0x100] sm:$0xf]  ;;  %v8201_v62 = vld [vmem:[#allocation6 + $0xc] sm:$0xf] }
 0x1a3   :  { %v6604_v43 = vld [vmem:[#allocation6 + $0x18] sm:$0xf0] }
 0x1a5   :  { %v2120_v18 = vpop.f32.mrf.mxu2 }
 0x1a6   :  { %v2121_v25 = vadd.f32 %v2120_v18, %v2107_v22  ;;  %v2134_v26 = vpop.f32.mrf.mxu3  ;;  %v6628_v22 = vld [vmem:[#allocation6 + $0x50] sm:$0xf0]  ;;  %v6787_v18 = vor.u32 %v8250_v7, %v6786_v32  ;;  %v6667_v32 = vor.u32 %v8219_v6, %v6666_v41  ;;  %v8217_v7 = vld [vmem:[#allocation6 + $0x8c] sm:$0xf]  ;;  %v6796_v6 = vld [vmem:[#allocation6 + $0x198] sm:$0xf0] }
 0x1a7   :  { %v6671_v12 = vor.u32 %v8217_v7, %v6668_v11  ;;  %v8249_v41 = vld [vmem:[#allocation6 + $0x18c] sm:$0xf]  ;;  %v8247_v7 = vld [vmem:[#allocation6 + $0x174] sm:$0xf0] }
 0x1a8   :  { %v2135_v27 = vadd.f32 %v2134_v26, %v2121_v25  ;;  %v6627_v25 = vor.u32 %v8210_v19, %v6626_v16  ;;  %v6631_v26 = vor.u32 %v8208_v21, %v6628_v22  ;;  %3068 = vmatpush.bf16.msra.mxu1 %v6787_v18  ;;  %v8232_v16 = vld [vmem:[#allocation6 + $0x104] sm:$0xf]  ;;  %v6723_v19 = vor.u32 %v8234_v15, %v6722_v13  ;;  %v6724_v21 = vld [vmem:[#allocation6 + $0x110] sm:$0xf0]  ;;  %v6650_v22 = vld [vmem:[#allocation6 + $0x68] sm:$0xf] }
 0x1a9   :  { %v8215_v18 = vld [vmem:[#allocation6 + $0x74] sm:$0xf0]  ;;  %v8245_v11 = vld [vmem:[#allocation6 + $0x16c] sm:$0xf]  ;;  %v6780_v15 = vld [vmem:[#allocation6 + $0x178] sm:$0xf0] }
 0x1aa   :  { %v2144_v29 = vmax.f32 %v2135_v27, 0.0  ;;  %v6610_v27 = vld [vmem:[#allocation6 + $0x20] sm:$0xf]  ;;  %3056 = vmatpush.bf16.msra.mxu0 %v6627_v25  ;;  %3084 = vmatpush.bf16.msra.mxu2 %v6631_v26  ;;  %v6651_v25 = vor.u32 %v8215_v18, %v6650_v22  ;;  %v6842_v26 = vld [vmem:[#allocation6 + $0x1e8] sm:$0xf] }
 0x1ab   :  { %v6762_v22 = vld [vmem:[#allocation6 + $0x148] sm:$0xf]  ;;  %v8243_v18 = vld [vmem:[#allocation6 + $0x154] sm:$0xf0] }
 0x1ac   :  { %v2148_v31 = vpack.c.bf16 %v2144_v29, %v2140_v3  ;;  %v8206_v3 = vld [vmem:[#allocation6 + $0x2c] sm:$0xf0]  ;;  %v8204_v29 = vld [vmem:[#allocation6 + $0x24] sm:$0xf]  ;;  %3069 = vmatpush.bf16.msra.mxu1 %v6771_v54  ;;  %v6831_v54 = vor.u32 %v8257_v9, %v6828_v8  ;;  %v8233_v8 = vld [vmem:[#allocation6 + $0x10c] sm:$0xf] }
 0x1ad   :  { %v6611_v34 = vor.u32 %v8206_v3, %v6610_v27  ;;  %v8263_v27 = vld [vmem:[#allocation6 + $0x1f4] sm:$0xf0]  ;;  %v8213_v3 = vld [vmem:[#allocation6 + $0x6c] sm:$0xf] }
 0x1ae   :  { %2589 = vmatmul.bf16.vlgmr.msra.gmra.mxu3 %v2148_v31 }
 0x1af   :  { %3093 = vmatpush.bf16.msra.mxu3 %v6839_v59  ;;  %3057 = vmatpush.bf16.msra.mxu0 %v6611_v34  ;;  %v6754_v59 = vld [vmem:[#allocation6 + $0x140] sm:$0xf]  ;;  %v8261_v34 = vld [vmem:[#allocation6 + $0x1ec] sm:$0xf] }
 0x1b0   :  { %v6755_v39 = vor.u32 %v8242_v60, %v6754_v59  ;;  %v6620_v59 = vld [vmem:[#allocation6 + $0x38] sm:$0xf0] }
 0x1b1   :  { %v6623_v30 = vor.u32 %v8205_v38, %v6620_v59 }
 0x1b2   :  { %3070 = vmatpush.bf16.msra.mxu1 %v6755_v39  ;;  %v6812_v39 = vld [vmem:[#allocation6 + $0x1b8] sm:$0xf0] }
 0x1b3   :  { %3094 = vmatpush.bf16.msra.mxu3 %v6823_v20  ;;  %3058 = vmatpush.bf16.msra.mxu0 %v6595_v42  ;;  %v8221_v20 = vld [vmem:[#allocation6 + $0xac] sm:$0xf]  ;;  %v8211_v42 = vld [vmem:[#allocation6 + $0x54] sm:$0xf0]  ;;  %v6815_v17 = vor.u32 %v8253_v58, %v6812_v39  ;;  %v8324_v58 = vld [vmem:[#allocation7 + $0x1dc] sm:$0xf0] }
 0x1b4   :  { %v6687_v2 = vor.u32 %v8221_v20, %v6684_v44  ;;  %v6635_v37 = vor.u32 %v8211_v42, %v6634_v33  ;;  %v8203_v20 = vld [vmem:[#allocation6 + $0x14] sm:$0xf0]  ;;  %v7042_v39 = vld [vmem:[#allocation7 + $0x180] sm:$0xf] }
 0x1b5   :  { %v2548_v40 = vpop.f32.mrf.mxu0  ;;  %v6603_v44 = vor.u32 %v8203_v20, %v6602_v63 }
 0x1b6   :  { %3071 = vmatpush.bf16.msra.mxu1 %v6739_v5 }
 0x1b7   :  { %3095 = vmatpush.bf16.msra.mxu3 %v6807_v47  ;;  %3107 = vmatpush.bf16.msrb.mxu0 %v6715_v48  ;;  %v6743_v47 = vor.u32 %v8236_v4, %v6740_v14  ;;  %v6636_v48 = vld [vmem:[#allocation6 + $0x58] sm:$0xf0]  ;;  %v6607_v14 = vor.u32 %v8201_v62, %v6604_v43 }
 0x1ba   :  { %3072 = vmatpush.bf16.msra.mxu1 %v6723_v19 }
 0x1bb   :  { %3096 = vmatpush.bf16.msra.mxu3 %v6791_v23  ;;  %3108 = vmatpush.bf16.msrb.mxu0 %v6699_v49  ;;  %v6727_v23 = vor.u32 %v8232_v16, %v6724_v21  ;;  %v6619_v49 = vor.u32 %v8207_v57, %v6618_v56  ;;  %v6783_v21 = vor.u32 %v8245_v11, %v6780_v15  ;;  %v8444_v15 = vld [vmem:[#allocation7 + $0x59c] sm:$0xf0] }
 0x1bd   :  { %v2550_v4 = vpop.f32.mrf.mxu0 }
 0x1be   :  { %2645 = vmatmul.bf16.vlgmr.msrb.gmra.mxu3 %v2148_v31  ;;  %v6612_v31 = vld [vmem:[#allocation6 + $0x30] sm:$0xf0] }
 0x1bf   :  { %v6615_v35 = vor.u32 %v8204_v29, %v6612_v31  ;;  %3097 = vmatpush.bf16.msra.mxu3 %v6775_v28  ;;  %3109 = vmatpush.bf16.msrb.mxu0 %v6683_v10  ;;  %v6843_v29 = vor.u32 %v8263_v27, %v6842_v26  ;;  %v6652_v31 = vld [vmem:[#allocation6 + $0x78] sm:$0xf0]  ;;  %v6810_v28 = vld [vmem:[#allocation6 + $0x1a8] sm:$0xf] }
 0x1c0   :  { %v6655_v36 = vor.u32 %v8213_v3, %v6652_v31  ;;  %v6811_v60 = vor.u32 %v8255_v1, %v6810_v28  ;;  %v6794_v10 = vld [vmem:[#allocation6 + $0x188] sm:$0xf]  ;;  %v6764_v26 = vld [vmem:[#allocation6 + $0x158] sm:$0xf0]  ;;  %v6763_v3 = vor.u32 %v8243_v18, %v6762_v22  ;;  %v7330_v22 = vld [vmem:[#allocation7 + $0x3c0] sm:$0xf] }
 0x1c1   :  { %3085 = vmatpush.bf16.msra.mxu2 %v6615_v35  ;;  %v6844_v35 = vld [vmem:[#allocation6 + $0x1f8] sm:$0xf0]  ;;  %3121 = vmatpush.bf16.msrb.mxu1 %v6843_v29  ;;  %v8388_v18 = vld [vmem:[#allocation7 + $0x3dc] sm:$0xf0] }
 0x1c2   :  { %v6847_v0 = vor.u32 %v8261_v34, %v6844_v35  ;;  %v6746_v34 = vld [vmem:[#allocation6 + $0x128] sm:$0xf]  ;;  %v8239_v35 = vld [vmem:[#allocation6 + $0x134] sm:$0xf0] }
 0x1c3   :  { %3098 = vmatpush.bf16.msra.mxu3 %v6759_v61  ;;  %3110 = vmatpush.bf16.msrb.mxu0 %v6667_v32  ;;  %v2215_v61 = vperm.slane %v8932_v53, 0  ;;  %v6778_v32 = vld [vmem:[#allocation6 + $0x168] sm:$0xf] }
 0x1c4   :  { %v6779_v13 = vor.u32 %v8247_v7, %v6778_v32  ;;  %v7554_v32 = vld [vmem:[#allocation7 + $0x580] sm:$0xf] }
 0x1c5   :  { %3086 = vmatpush.bf16.msra.mxu2 %v6599_v45  ;;  %v6826_v45 = vld [vmem:[#allocation6 + $0x1c8] sm:$0xf] }
 0x1c6   :  { %v6827_v51 = vor.u32 %v8259_v46, %v6826_v45  ;;  %v6747_v45 = vor.u32 %v8239_v35, %v6746_v34  ;;  %v7522_v34 = vld [vmem:[#allocation7 + $0x540] sm:$0xf] }
 0x1c7   :  { %3099 = vmatpush.bf16.msra.mxu3 %v6743_v47  ;;  %3111 = vmatpush.bf16.msrb.mxu0 %v6651_v25  ;;  %v6799_v47 = vor.u32 %v8249_v41, %v6796_v6  ;;  %v2551_v25 = vadd.f32 %v2550_v4, %v2215_v61  ;;  %v7586_v4 = vld [vmem:[#allocation7 + $0x5c0] sm:$0xf] }
 0x1c8   :  { %3122 = vmatpush.bf16.msrb.mxu1 %v6827_v51  ;;  %v8235_v51 = vld [vmem:[#allocation6 + $0x114] sm:$0xf0]  ;;  %v8452_v41 = vld [vmem:[#allocation7 + $0x5dc] sm:$0xf0] }
 0x1c9   :  { %3135 = vmatpush.bf16.msrb.mxu2 %v6719_v52  ;;  %v6639_v52 = vor.u32 %v8209_v50, %v6636_v48  ;;  %v6730_v48 = vld [vmem:[#allocation6 + $0x108] sm:$0xf]  ;;  %v8436_v35 = vld [vmem:[#allocation7 + $0x55c] sm:$0xf0] }
 0x1ca   :  { %v6731_v28 = vor.u32 %v8235_v51, %v6730_v48  ;;  %v6914_v48 = vld [vmem:[#allocation7 + $0x80] sm:$0xf] }
 0x1cb   :  { %3100 = vmatpush.bf16.msra.mxu3 %v6727_v23  ;;  %3112 = vmatpush.bf16.msrb.mxu0 %v6635_v37  ;;  %v8241_v23 = vld [vmem:[#allocation6 + $0x14c] sm:$0xf]  ;;  %v8284_v51 = vld [vmem:[#allocation7 + $0x9c] sm:$0xf0] }
 0x1cc   :  { %3123 = vmatpush.bf16.msrb.mxu1 %v6811_v60  ;;  %v6767_v31 = vor.u32 %v8241_v23, %v6764_v26  ;;  %v6946_v23 = vld [vmem:[#allocation7 + $0xc0] sm:$0xf] }
 0x1cd   :  { %3136 = vmatpush.bf16.msrb.mxu2 %v6703_v24  ;;  %v2562_v24 = vpop.f32.mrf.mxu1  ;;  %v8292_v26 = vld [vmem:[#allocation7 + $0xdc] sm:$0xf0] }
 0x1cf   :  { %3149 = vmatpush.bf16.msrb.mxu3 %v6847_v0  ;;  %3113 = vmatpush.bf16.msrb.mxu0 %v6619_v49  ;;  %v8237_v0 = vld [vmem:[#allocation6 + $0x12c] sm:$0xf]  ;;  %v2216_v49 = vperm.slane %v8932_v53, 1  ;;  %v8316_v53 = vld [vmem:[#allocation7 + $0x19c] sm:$0xf0] }
 0x1d0   :  { %v7043_v20 = vor.u32 %v8316_v53, %v7042_v39  ;;  %v8348_v39 = vld [vmem:[#allocation7 + $0x29c] sm:$0xf0] }
 0x1d1   :  { %3137 = vmatpush.bf16.msrb.mxu2 %v6687_v2  ;;  %v8251_v2 = vld [vmem:[#allocation6 + $0x194] sm:$0xf0]  ;;  %v8268_v53 = vld [vmem:[#allocation7 + $0x1c] sm:$0xf0] }
 0x1d2   :  { %v6795_v5 = vor.u32 %v8251_v2, %v6794_v10  ;;  %v8308_v2 = vld [vmem:[#allocation7 + $0x15c] sm:$0xf0] }
 0x1d3   :  { %3150 = vmatpush.bf16.msrb.mxu3 %v6831_v54  ;;  %3114 = vmatpush.bf16.msrb.mxu0 %v6603_v44  ;;  %v6732_v54 = vld [vmem:[#allocation6 + $0x118] sm:$0xf0]  ;;  %v7010_v44 = vld [vmem:[#allocation7 + $0x140] sm:$0xf] }
 0x1d4   :  { %3124 = vmatpush.bf16.msrb.mxu1 %v6795_v5  ;;  %v6735_v38 = vor.u32 %v8233_v8, %v6732_v54  ;;  %v7011_v6 = vor.u32 %v8308_v2, %v7010_v44  ;;  %v7266_v8 = vld [vmem:[#allocation7 + $0x340] sm:$0xf]  ;;  %v8320_v44 = vld [vmem:[#allocation7 + $0x1c4] sm:$0xf] }
 0x1d5   :  { %3138 = vmatpush.bf16.msrb.mxu2 %v6671_v12  ;;  %v2549_v12 = vadd.f32 %v2548_v40, %v2215_v61  ;;  %v2564_v27 = vpop.f32.mrf.mxu1  ;;  %v6748_v40 = vld [vmem:[#allocation6 + $0x138] sm:$0xf0]  ;;  %v8372_v54 = vld [vmem:[#allocation7 + $0x35c] sm:$0xf0]  ;;  %v7076_v2 = vld [vmem:[#allocation7 + $0x1e0] sm:$0xf0] }
 0x1d6   :  { %v2565_v33 = vadd.f32 %v2564_v27, %v2551_v25  ;;  %v6751_v50 = vor.u32 %v8237_v0, %v6748_v40  ;;  %v7842_v27 = vld [vmem:[#allocation7 + $0x7c0] sm:$0xf]  ;;  %v7331_v0 = vor.u32 %v8388_v18, %v7330_v22 }
 0x1d7   :  { %3151 = vmatpush.bf16.msrb.mxu3 %v6815_v17  ;;  %v2563_v29 = vadd.f32 %v2562_v24, %v2549_v12  ;;  %v6978_v12 = vld [vmem:[#allocation7 + $0x100] sm:$0xf] }
 0x1d8   :  { %3125 = vmatpush.bf16.msrb.mxu1 %v6779_v13  ;;  %v8300_v13 = vld [vmem:[#allocation7 + $0x11c] sm:$0xf0] }
 0x1d9   :  { %3139 = vmatpush.bf16.msrb.mxu2 %v6655_v36  ;;  %v2604_v36 = vpop.f32.mrf.mxu0  ;;  %v6979_v25 = vor.u32 %v8300_v13, %v6978_v12  ;;  %v7298_v40 = vld [vmem:[#allocation7 + $0x380] sm:$0xf]  ;;  %v8312_v12 = vld [vmem:[#allocation7 + $0x184] sm:$0xf] }
 0x1da   :  { %v2605_v60 = vadd.f32 %v2604_v36, %v2216_v49  ;;  %v7044_v13 = vld [vmem:[#allocation7 + $0x1a0] sm:$0xf0]  ;;  %v8492_v18 = vld [vmem:[#allocation7 + $0x71c] sm:$0xf0] }
 0x1db   :  { %3152 = vmatpush.bf16.msrb.mxu3 %v6799_v47  ;;  %v7587_v47 = vor.u32 %v8452_v41, %v7586_v4  ;;  %v7138_v4 = vld [vmem:[#allocation7 + $0x240] sm:$0xf] }
 0x1dc   :  { %3126 = vmatpush.bf16.msrb.mxu1 %v6763_v3  ;;  %v8516_v3 = vld [vmem:[#allocation7 + $0x7dc] sm:$0xf0] }
 0x1dd   :  { %3140 = vmatpush.bf16.msrb.mxu2 %v6639_v52  ;;  %v2618_v56 = vpop.f32.mrf.mxu1 }
 0x1de   :  { %v2619_v10 = vadd.f32 %v2618_v56, %v2605_v60  ;;  %v6915_v56 = vor.u32 %v8284_v51, %v6914_v48  ;;  %v8356_v60 = vld [vmem:[#allocation7 + $0x2dc] sm:$0xf0]  ;;  %v8296_v51 = vld [vmem:[#allocation7 + $0x104] sm:$0xf] }
 0x1df   :  { %3153 = vmatpush.bf16.msrb.mxu3 %v6783_v21 }
 0x1e0   :  { %3127 = vmatpush.bf16.msrb.mxu1 %v6747_v45  ;;  %v6947_v45 = vor.u32 %v8292_v26, %v6946_v23  ;;  %v8384_v23 = vld [vmem:[#allocation7 + $0x3c4] sm:$0xf] }
 0x1e1   :  { %3141 = vmatpush.bf16.msrb.mxu2 %v6623_v30  ;;  %v2606_v24 = vpop.f32.mrf.mxu0  ;;  %v7074_v30 = vld [vmem:[#allocation7 + $0x1c0] sm:$0xf] }
 0x1e2   :  { %v7075_v17 = vor.u32 %v8324_v58, %v7074_v30  ;;  %v2607_v63 = vadd.f32 %v2606_v24, %v2216_v49  ;;  %v7267_v49 = vor.u32 %v8372_v54, %v7266_v8  ;;  %v7202_v24 = vld [vmem:[#allocation7 + $0x2c0] sm:$0xf] }
 0x1e3   :  { %3154 = vmatpush.bf16.msrb.mxu3 %v6767_v31  ;;  %v7203_v30 = vor.u32 %v8356_v60, %v7202_v24  ;;  %v7170_v58 = vld [vmem:[#allocation7 + $0x280] sm:$0xf]  ;;  %v6948_v24 = vld [vmem:[#allocation7 + $0xe0] sm:$0xf0] }
 0x1e4   :  { %3128 = vmatpush.bf16.msrb.mxu1 %v6731_v28  ;;  %v8276_v28 = vld [vmem:[#allocation7 + $0x5c] sm:$0xf0] }
 0x1e5   :  { %3142 = vmatpush.bf16.msrb.mxu2 %v6607_v14  ;;  %v2620_v62 = vpop.f32.mrf.mxu1  ;;  %v7682_v8 = vld [vmem:[#allocation7 + $0x680] sm:$0xf] }
 0x1e6   :  { %v2621_v5 = vadd.f32 %v2620_v62, %v2607_v63  ;;  %v7490_v63 = vld [vmem:[#allocation7 + $0x500] sm:$0xf] }
 0x1e7   :  { %3155 = vmatpush.bf16.msrb.mxu3 %v6751_v50  ;;  %v8508_v50 = vld [vmem:[#allocation7 + $0x79c] sm:$0xf0] }
 0x1e8   :  { %v8476_v54 = vld [vmem:[#allocation7 + $0x69c] sm:$0xf0] }
 0x1eb   :  { %3156 = vmatpush.bf16.msrb.mxu3 %v6735_v38 }
 0x1f1   :  { %v8934_v55 = vpop.f32.mrf.mxu2 }
 0x1f2   :  { %v2577_v42 = vadd.f32 %v8934_v55, %v2563_v29 }
 0x1f9   :  { %v2578_v16 = vpop.f32.mrf.mxu2 }
 0x1fa   :  { %v2579_v37 = vadd.f32 %v2578_v16, %v2565_v33  ;;  %v7843_v33 = vor.u32 %v8516_v3, %v7842_v27  ;;  %v7426_v3 = vld [vmem:[#allocation7 + $0x480] sm:$0xf] }
 0x201   :  { %v2632_v57 = vpop.f32.mrf.mxu2 }
 0x202   :  { %v2633_v14 = vadd.f32 %v2632_v57, %v2619_v10  ;;  %v6882_v57 = vld [vmem:[#allocation7 + $0x40] sm:$0xf] }
 0x203   :  { %v6883_v38 = vor.u32 %v8276_v28, %v6882_v57  ;;  %v8428_v10 = vld [vmem:[#allocation7 + $0x51c] sm:$0xf0]  ;;  %v8368_v57 = vld [vmem:[#allocation7 + $0x344] sm:$0xf] }
 0x204   :  { %v7491_v62 = vor.u32 %v8428_v10, %v7490_v63  ;;  %v7268_v28 = vld [vmem:[#allocation7 + $0x360] sm:$0xf0] }
 0x205   :  { %v7236_v63 = vld [vmem:[#allocation7 + $0x320] sm:$0xf0] }
 0x209   :  { %v2634_v43 = vpop.f32.mrf.mxu2 }
 0x20a   :  { %v2635_v7 = vadd.f32 %v2634_v43, %v2621_v5  ;;  %v7079_v43 = vor.u32 %v8320_v44, %v7076_v2  ;;  %v8340_v5 = vld [vmem:[#allocation7 + $0x25c] sm:$0xf0]  ;;  %v8280_v44 = vld [vmem:[#allocation7 + $0x84] sm:$0xf] }
 0x20b   :  { %v7139_v41 = vor.u32 %v8340_v5, %v7138_v4  ;;  %v6916_v2 = vld [vmem:[#allocation7 + $0xa0] sm:$0xf0]  ;;  %v7618_v5 = vld [vmem:[#allocation7 + $0x600] sm:$0xf] }
 0x20c   :  { %v7556_v4 = vld [vmem:[#allocation7 + $0x5a0] sm:$0xf0] }
 0x231   :  { %v2590_v19 = vpop.f32.mrf.mxu3 }
 0x232   :  { %v2591_v46 = vadd.f32 %v2590_v19, %v2577_v42  ;;  %v7555_v19 = vor.u32 %v8444_v15, %v7554_v32  ;;  %v8380_v42 = vld [vmem:[#allocation7 + $0x39c] sm:$0xf0]  ;;  %v7047_v15 = vor.u32 %v8312_v12, %v7044_v13  ;;  %v7844_v12 = vld [vmem:[#allocation7 + $0x7e0] sm:$0xf0] }
 0x233   :  { %v8420_v32 = vld [vmem:[#allocation7 + $0x4dc] sm:$0xf0] }
 0x234   :  { %v2651_v1 = vmax.f32 %v2591_v46, 0.0  ;;  %v7810_v46 = vld [vmem:[#allocation7 + $0x780] sm:$0xf] }
 0x239   :  { %v2592_v52 = vpop.f32.mrf.mxu3 }
 0x23a   :  { %v2593_v9 = vadd.f32 %v2592_v52, %v2579_v37  ;;  %v7523_v37 = vor.u32 %v8436_v35, %v7522_v34  ;;  %v7299_v52 = vor.u32 %v8380_v42, %v7298_v40  ;;  %v8304_v34 = vld [vmem:[#allocation7 + $0x144] sm:$0xf]  ;;  %v8484_v40 = vld [vmem:[#allocation7 + $0x6dc] sm:$0xf0] }
 0x23b   :  { %v7012_v35 = vld [vmem:[#allocation7 + $0x160] sm:$0xf0] }
 0x23c   :  { %v2653_v55 = vmax.f32 %v2593_v9, 0.0  ;;  %v7811_v9 = vor.u32 %v8508_v50, %v7810_v46  ;;  %v8404_v46 = vld [vmem:[#allocation7 + $0x45c] sm:$0xf0] }
 0x23e   :  { %v8939_v59 = vpack.c.bf16 %v2653_v55, %v2651_v1  ;;  %v7234_v1 = vld [vmem:[#allocation7 + $0x300] sm:$0xf] }
 0x23f   :  { %v8364_v55 = vld [vmem:[#allocation7 + $0x31c] sm:$0xf0] }
 0x240   :  { %3059 = vmatmul.bf16.vlgmr.msra.gmra.mxu0 %v8939_v59  ;;  %3087 = vmatmul.bf16.vlgmr.msra.gmra.mxu2 %v8939_v59 }
 0x241   :  { %v2646_v61 = vpop.f32.mrf.mxu3  ;;  %4729 = vmatpush.bf16.msra.mxu0 %v7075_v17  ;;  %4757 = vmatpush.bf16.msra.mxu2 %v7587_v47  ;;  %v6850_v17 = vld [vmem:[#allocation7] sm:$0xf] }
 0x242   :  { %v2647_v11 = vadd.f32 %v2646_v61, %v2633_v14  ;;  %v7171_v61 = vor.u32 %v8348_v39, %v7170_v58  ;;  %v7778_v14 = vld [vmem:[#allocation7 + $0x740] sm:$0xf]  ;;  %v7588_v58 = vld [vmem:[#allocation7 + $0x5e0] sm:$0xf0] }
 0x243   :  { %v7458_v47 = vld [vmem:[#allocation7 + $0x4c0] sm:$0xf] }
 0x244   :  { %v2652_v29 = vmax.f32 %v2647_v11, 0.0  ;;  %v7459_v11 = vor.u32 %v8420_v32, %v7458_v47  ;;  %v7650_v39 = vld [vmem:[#allocation7 + $0x640] sm:$0xf]  ;;  %v8352_v47 = vld [vmem:[#allocation7 + $0x2c4] sm:$0xf] }
 0x245   :  { %4730 = vmatpush.bf16.msra.mxu0 %v7043_v20  ;;  %4758 = vmatpush.bf16.msra.mxu2 %v7555_v19  ;;  %v6851_v20 = vor.u32 %v8268_v53, %v6850_v17  ;;  %v8332_v19 = vld [vmem:[#allocation7 + $0x21c] sm:$0xf0]  ;;  %v8360_v53 = vld [vmem:[#allocation7 + $0x304] sm:$0xf] }
 0x246   :  { %v8468_v17 = vld [vmem:[#allocation7 + $0x65c] sm:$0xf0]  ;;  %v7239_v10 = vor.u32 %v8360_v53, %v7236_v63  ;;  %v7204_v32 = vld [vmem:[#allocation7 + $0x2e0] sm:$0xf0] }
 0x249   :  { %v2648_v16 = vpop.f32.mrf.mxu3  ;;  %4731 = vmatpush.bf16.msra.mxu0 %v7011_v6  ;;  %4759 = vmatpush.bf16.msra.mxu2 %v7523_v37  ;;  %v8500_v6 = vld [vmem:[#allocation7 + $0x75c] sm:$0xf0] }
 0x24a   :  { %v2649_v21 = vadd.f32 %v2648_v16, %v2635_v7  ;;  %v7779_v7 = vor.u32 %v8500_v6, %v7778_v14  ;;  %v7106_v16 = vld [vmem:[#allocation7 + $0x200] sm:$0xf] }
 0x24b   :  { %v7107_v22 = vor.u32 %v8332_v19, %v7106_v16  ;;  %v7394_v37 = vld [vmem:[#allocation7 + $0x440] sm:$0xf]  ;;  %v6884_v16 = vld [vmem:[#allocation7 + $0x60] sm:$0xf0] }
 0x24c   :  { %v2654_v31 = vmax.f32 %v2649_v21, 0.0  ;;  %v7746_v21 = vld [vmem:[#allocation7 + $0x700] sm:$0xf]  ;;  %v7395_v48 = vor.u32 %v8404_v46, %v7394_v37  ;;  %v8432_v19 = vld [vmem:[#allocation7 + $0x544] sm:$0xf] }
 0x24d   :  { %4732 = vmatpush.bf16.msra.mxu0 %v6979_v25  ;;  %4760 = vmatpush.bf16.msra.mxu2 %v7491_v62  ;;  %v7332_v25 = vld [vmem:[#allocation7 + $0x3e0] sm:$0xf0]  ;;  %v7747_v26 = vor.u32 %v8492_v18, %v7746_v21  ;;  %v8460_v14 = vld [vmem:[#allocation7 + $0x61c] sm:$0xf0] }
 0x24e   :  { %v2656_v36 = vpack.c.bf16 %v2654_v31, %v2652_v29  ;;  %v7335_v27 = vor.u32 %v8384_v23, %v7332_v25  ;;  %v8412_v29 = vld [vmem:[#allocation7 + $0x49c] sm:$0xf0]  ;;  %v8440_v62 = vld [vmem:[#allocation7 + $0x584] sm:$0xf]  ;;  %v7619_v6 = vor.u32 %v8460_v14, %v7618_v5 }
 0x24f   :  { %v7427_v31 = vor.u32 %v8412_v29, %v7426_v3  ;;  %v8344_v23 = vld [vmem:[#allocation7 + $0x284] sm:$0xf] }
 0x250   :  { %3073 = vmatmul.bf16.vlgmr.msra.gmra.mxu1 %v2656_v36  ;;  %3101 = vmatmul.bf16.vlgmr.msra.gmra.mxu3 %v2656_v36  ;;  %v7172_v25 = vld [vmem:[#allocation7 + $0x2a0] sm:$0xf0] }
 0x251   :  { %3115 = vmatmul.bf16.vlgmr.msrb.gmra.mxu0 %v8939_v59  ;;  %3143 = vmatmul.bf16.vlgmr.msrb.gmra.mxu2 %v8939_v59  ;;  %v7235_v59 = vor.u32 %v8364_v55, %v7234_v1  ;;  %v7362_v1 = vld [vmem:[#allocation7 + $0x400] sm:$0xf]  ;;  %v7812_v3 = vld [vmem:[#allocation7 + $0x7a0] sm:$0xf0] }
 0x252   :  { %4743 = vmatpush.bf16.msra.mxu1 %v7331_v0  ;;  %4771 = vmatpush.bf16.msra.mxu3 %v7843_v33  ;;  %v7714_v0 = vld [vmem:[#allocation7 + $0x6c0] sm:$0xf]  ;;  %v8376_v33 = vld [vmem:[#allocation7 + $0x384] sm:$0xf] }
 0x253   :  { %4733 = vmatpush.bf16.msra.mxu0 %v6947_v45  ;;  %4761 = vmatpush.bf16.msra.mxu2 %v7459_v11  ;;  %v7715_v42 = vor.u32 %v8484_v40, %v7714_v0  ;;  %v7300_v45 = vld [vmem:[#allocation7 + $0x3a0] sm:$0xf0]  ;;  %v8396_v55 = vld [vmem:[#allocation7 + $0x41c] sm:$0xf0] }
 0x254   :  { %v7303_v50 = vor.u32 %v8376_v33, %v7300_v45  ;;  %v8512_v11 = vld [vmem:[#allocation7 + $0x7c4] sm:$0xf] }
 0x255   :  { %v7847_v13 = vor.u32 %v8512_v11, %v7844_v12  ;;  %v7492_v0 = vld [vmem:[#allocation7 + $0x520] sm:$0xf0] }
 0x256   :  { %4744 = vmatpush.bf16.msra.mxu1 %v7299_v52  ;;  %4772 = vmatpush.bf16.msra.mxu3 %v7811_v9  ;;  %v6980_v52 = vld [vmem:[#allocation7 + $0x120] sm:$0xf0] }
 0x257   :  { %4734 = vmatpush.bf16.msra.mxu0 %v6915_v56  ;;  %4762 = vmatpush.bf16.msra.mxu2 %v7427_v31  ;;  %v6983_v9 = vor.u32 %v8296_v51, %v6980_v52  ;;  %v7683_v56 = vor.u32 %v8476_v54, %v7682_v8  ;;  %v8264_v31 = vld [vmem:[#allocation7 + $0x4] sm:$0xf] }
 0x258   :  { %v8336_v33 = vld [vmem:[#allocation7 + $0x244] sm:$0xf] }
 0x259   :  { %v8496_v45 = vld [vmem:[#allocation7 + $0x744] sm:$0xf] }
 0x25a   :  { %4745 = vmatpush.bf16.msra.mxu1 %v7267_v49  ;;  %4773 = vmatpush.bf16.msra.mxu3 %v7779_v7  ;;  %v7271_v49 = vor.u32 %v8368_v57, %v7268_v28  ;;  %v7207_v7 = vor.u32 %v8352_v47, %v7204_v32  ;;  %v7780_v46 = vld [vmem:[#allocation7 + $0x760] sm:$0xf0] }
 0x25b   :  { %4735 = vmatpush.bf16.msra.mxu0 %v6883_v38  ;;  %4763 = vmatpush.bf16.msra.mxu2 %v7395_v48  ;;  %v7363_v38 = vor.u32 %v8396_v55, %v7362_v1  ;;  %v8416_v48 = vld [vmem:[#allocation7 + $0x4c4] sm:$0xf] }
 0x25c   :  { %v7460_v51 = vld [vmem:[#allocation7 + $0x4e0] sm:$0xf0] }
 0x25d   :  { %v7463_v52 = vor.u32 %v8416_v48, %v7460_v51  ;;  %v7108_v8 = vld [vmem:[#allocation7 + $0x220] sm:$0xf0] }
 0x25e   :  { %4746 = vmatpush.bf16.msra.mxu1 %v7235_v59  ;;  %4774 = vmatpush.bf16.msra.mxu3 %v7747_v26  ;;  %v8288_v59 = vld [vmem:[#allocation7 + $0xc4] sm:$0xf] }
 0x25f   :  { %4736 = vmatpush.bf16.msra.mxu0 %v6851_v20  ;;  %v6951_v60 = vor.u32 %v8288_v59, %v6948_v24  ;;  %4764 = vmatpush.bf16.msra.mxu2 %v7363_v38  ;;  %v7651_v20 = vor.u32 %v8468_v17, %v7650_v39  ;;  %v8504_v26 = vld [vmem:[#allocation7 + $0x784] sm:$0xf] }
 0x260   :  { %3129 = vmatmul.bf16.vlgmr.msrb.gmra.mxu1 %v2656_v36  ;;  %3157 = vmatmul.bf16.vlgmr.msrb.gmra.mxu3 %v2656_v36  ;;  %v7015_v36 = vor.u32 %v8304_v34, %v7012_v35  ;;  %v7815_v29 = vor.u32 %v8504_v26, %v7812_v3  ;;  %v6852_v34 = vld [vmem:[#allocation7 + $0x20] sm:$0xf0] }
 0x261   :  { %v8424_v35 = vld [vmem:[#allocation7 + $0x504] sm:$0xf] }
 0x262   :  { %4747 = vmatpush.bf16.msra.mxu1 %v7203_v30  ;;  %4775 = vmatpush.bf16.msra.mxu3 %v7715_v42  ;;  %v8448_v30 = vld [vmem:[#allocation7 + $0x5c4] sm:$0xf]  ;;  %v7495_v40 = vor.u32 %v8424_v35, %v7492_v0  ;;  %v7050_v35 = vld [vmem:[#allocation7 + $0x188] sm:$0xf] }
 0x263   :  { %4785 = vmatpush.bf16.msrb.mxu0 %v7079_v43  ;;  %v6919_v43 = vor.u32 %v8280_v44, %v6916_v2  ;;  %v7140_v42 = vld [vmem:[#allocation7 + $0x260] sm:$0xf0]  ;;  %v8948_v2 = vld [vmem:[%s9070_s7] sm:$0xf] }
 0x264   :  { %v7143_v37 = vor.u32 %v8336_v33, %v7140_v42  ;;  %v8488_v54 = vld [vmem:[#allocation7 + $0x704] sm:$0xf]  ;;  %v7338_v33 = vld [vmem:[#allocation7 + $0x3c8] sm:$0xf] }
 0x265   :  { %v7748_v57 = vld [vmem:[#allocation7 + $0x720] sm:$0xf0]  ;;  %v8389_v42 = vld [vmem:[#allocation7 + $0x3e4] sm:$0xf0] }
 0x266   :  { %4748 = vmatpush.bf16.msra.mxu1 %v7171_v61  ;;  %4776 = vmatpush.bf16.msra.mxu3 %v7683_v56  ;;  %v7591_v61 = vor.u32 %v8448_v30, %v7588_v58  ;;  %v7751_v28 = vor.u32 %v8488_v54, %v7748_v57  ;;  %v7428_v1 = vld [vmem:[#allocation7 + $0x4a0] sm:$0xf0]  ;;  %v8381_v57 = vld [vmem:[#allocation7 + $0x3a4] sm:$0xf0] }
 0x267   :  { %4786 = vmatpush.bf16.msrb.mxu0 %v7047_v15  ;;  %v8272_v15 = vld [vmem:[#allocation7 + $0x44] sm:$0xf] }
 0x268   :  { %4813 = vmatpush.bf16.msrb.mxu2 %v7591_v61  ;;  %v6887_v21 = vor.u32 %v8272_v15, %v6884_v16  ;;  %v8480_v59 = vld [vmem:[#allocation7 + $0x6c4] sm:$0xf] }
 0x269   :  { %v7716_v24 = vld [vmem:[#allocation7 + $0x6e0] sm:$0xf0] }
 0x26a   :  { %4749 = vmatpush.bf16.msra.mxu1 %v7139_v41  ;;  %4777 = vmatpush.bf16.msra.mxu3 %v7651_v20  ;;  %v7559_v41 = vor.u32 %v8440_v62, %v7556_v4  ;;  %v8400_v30 = vld [vmem:[#allocation7 + $0x444] sm:$0xf] }
 0x26b   :  { %4787 = vmatpush.bf16.msrb.mxu0 %v7015_v36  ;;  %v6855_v36 = vor.u32 %v8264_v31, %v6852_v34  ;;  %v7396_v58 = vld [vmem:[#allocation7 + $0x460] sm:$0xf0] }
 0x26c   :  { %4814 = vmatpush.bf16.msrb.mxu2 %v7559_v41  ;;  %v7399_v39 = vor.u32 %v8400_v30, %v7396_v58  ;;  %v8472_v61 = vld [vmem:[#allocation7 + $0x684] sm:$0xf]  ;;  %v2723_v41 = vperm.slane %v8948_v2, 0 }
 0x26d   :  { %v7684_v17 = vld [vmem:[#allocation7 + $0x6a0] sm:$0xf0] }
 0x26e   :  { %4750 = vmatpush.bf16.msra.mxu1 %v7107_v22  ;;  %4778 = vmatpush.bf16.msra.mxu3 %v7619_v6  ;;  %v7524_v22 = vld [vmem:[#allocation7 + $0x560] sm:$0xf0]  ;;  %v7687_v53 = vor.u32 %v8472_v61, %v7684_v17  ;;  %v8373_v61 = vld [vmem:[#allocation7 + $0x364] sm:$0xf0] }
 0x26f   :  { %4788 = vmatpush.bf16.msrb.mxu0 %v6983_v9  ;;  %v7527_v18 = vor.u32 %v8432_v19, %v7524_v22  ;;  %v8328_v9 = vld [vmem:[#allocation7 + $0x204] sm:$0xf]  ;;  %v7082_v22 = vld [vmem:[#allocation7 + $0x1c8] sm:$0xf] }
 0x270   :  { %v7111_v56 = vor.u32 %v8328_v9, %v7108_v8  ;;  %v8392_v20 = vld [vmem:[#allocation7 + $0x404] sm:$0xf]  ;;  %v8309_v9 = vld [vmem:[#allocation7 + $0x164] sm:$0xf0]  ;;  %v7339_v8 = vor.u32 %v8389_v42, %v7338_v33 }
 0x271   :  { %4815 = vmatpush.bf16.msrb.mxu2 %v7527_v18  ;;  %v8464_v62 = vld [vmem:[#allocation7 + $0x644] sm:$0xf]  ;;  %v8325_v18 = vld [vmem:[#allocation7 + $0x1e4] sm:$0xf0] }
 0x272   :  { %4799 = vmatpush.bf16.msrb.mxu1 %v7335_v27  ;;  %4827 = vmatpush.bf16.msrb.mxu3 %v7847_v13  ;;  %v7175_v27 = vor.u32 %v8344_v23, %v7172_v25  ;;  %v8456_v6 = vld [vmem:[#allocation7 + $0x604] sm:$0xf]  ;;  %v2724_v13 = vperm.slane %v8948_v2, 1  ;;  %v7083_v3 = vor.u32 %v8325_v18, %v7082_v22  ;;  %v7210_v18 = vld [vmem:[#allocation7 + $0x2c8] sm:$0xf] }
 0x273   :  { %4789 = vmatpush.bf16.msrb.mxu0 %v6951_v60  ;;  %v7719_v60 = vor.u32 %v8480_v59, %v7716_v24  ;;  %v7620_v47 = vld [vmem:[#allocation7 + $0x620] sm:$0xf0]  ;;  %v8437_v33 = vld [vmem:[#allocation7 + $0x564] sm:$0xf0] }
 0x274   :  { %v7623_v32 = vor.u32 %v8456_v6, %v7620_v47  ;;  %v7242_v6 = vld [vmem:[#allocation7 + $0x308] sm:$0xf] }
 0x275   :  { %4816 = vmatpush.bf16.msrb.mxu2 %v7495_v40 }
 0x276   :  { %4800 = vmatpush.bf16.msrb.mxu1 %v7303_v50  ;;  %4828 = vmatpush.bf16.msrb.mxu3 %v7815_v29  ;;  %v7783_v50 = vor.u32 %v8496_v45, %v7780_v46  ;;  %v2725_v45 = vperm.slane %v8948_v2, 2 }
 0x277   :  { %4790 = vmatpush.bf16.msrb.mxu0 %v6919_v43  ;;  %v7652_v43 = vld [vmem:[#allocation7 + $0x660] sm:$0xf0] }
 0x278   :  { %v7655_v4 = vor.u32 %v8464_v62, %v7652_v43  ;;  %v8453_v62 = vld [vmem:[#allocation7 + $0x5e4] sm:$0xf0] }
 0x279   :  { %4817 = vmatpush.bf16.msrb.mxu2 %v7463_v52  ;;  %v7018_v52 = vld [vmem:[#allocation7 + $0x148] sm:$0xf] }
 0x27a   :  { %4801 = vmatpush.bf16.msrb.mxu1 %v7271_v49  ;;  %4829 = vmatpush.bf16.msrb.mxu3 %v7783_v50  ;;  %v8408_v49 = vld [vmem:[#allocation7 + $0x484] sm:$0xf] }
 0x27b   :  { %4791 = vmatpush.bf16.msrb.mxu0 %v6887_v21  ;;  %v7431_v55 = vor.u32 %v8408_v49, %v7428_v1  ;;  %v7019_v49 = vor.u32 %v8309_v9, %v7018_v52 }
 0x27d   :  { %4818 = vmatpush.bf16.msrb.mxu2 %v7431_v55  ;;  %v6986_v55 = vld [vmem:[#allocation7 + $0x108] sm:$0xf] }
 0x27e   :  { %4802 = vmatpush.bf16.msrb.mxu1 %v7239_v10  ;;  %4830 = vmatpush.bf16.msrb.mxu3 %v7751_v28  ;;  %v7364_v10 = vld [vmem:[#allocation7 + $0x420] sm:$0xf0] }
 0x27f   :  { %4792 = vmatpush.bf16.msrb.mxu0 %v6855_v36  ;;  %v7367_v44 = vor.u32 %v8392_v20, %v7364_v10  ;;  %v8317_v36 = vld [vmem:[#allocation7 + $0x1a4] sm:$0xf0] }
 0x280   :  { %v7051_v50 = vor.u32 %v8317_v36, %v7050_v35  ;;  %v8293_v10 = vld [vmem:[#allocation7 + $0xe4] sm:$0xf0] }
 0x281   :  { %4819 = vmatpush.bf16.msrb.mxu2 %v7399_v39  ;;  %v7274_v39 = vld [vmem:[#allocation7 + $0x348] sm:$0xf] }
 0x282   :  { %4803 = vmatpush.bf16.msrb.mxu1 %v7207_v7  ;;  %4831 = vmatpush.bf16.msrb.mxu3 %v7719_v60  ;;  %v2726_v60 = vperm.slane %v8948_v2, 3  ;;  %v8365_v2 = vld [vmem:[#allocation7 + $0x324] sm:$0xf0] }
 0x283   :  { %v7243_v22 = vor.u32 %v8365_v2, %v7242_v6  ;;  %v8277_v35 = vld [vmem:[#allocation7 + $0x64] sm:$0xf0]  ;;  %v7340_v6 = vld [vmem:[#allocation7 + $0x3e8] sm:$0xf0] }
 0x285   :  { %4820 = vmatpush.bf16.msrb.mxu2 %v7367_v44  ;;  %v7594_v44 = vld [vmem:[#allocation7 + $0x5c8] sm:$0xf] }
 0x286   :  { %4804 = vmatpush.bf16.msrb.mxu1 %v7175_v27  ;;  %4832 = vmatpush.bf16.msrb.mxu3 %v7687_v53 }
 0x28a   :  { %4805 = vmatpush.bf16.msrb.mxu1 %v7143_v37  ;;  %4833 = vmatpush.bf16.msrb.mxu3 %v7655_v4  ;;  %v7275_v4 = vor.u32 %v8373_v61, %v7274_v39 }
 0x28e   :  { %4806 = vmatpush.bf16.msrb.mxu1 %v7111_v56  ;;  %4834 = vmatpush.bf16.msrb.mxu3 %v7623_v32  ;;  %v7306_v56 = vld [vmem:[#allocation7 + $0x388] sm:$0xf]  ;;  %v7595_v32 = vor.u32 %v8453_v62, %v7594_v44  ;;  %v7052_v44 = vld [vmem:[#allocation7 + $0x1a8] sm:$0xf0] }
 0x28f   :  { %v7307_v24 = vor.u32 %v8381_v57, %v7306_v56  ;;  %v8269_v56 = vld [vmem:[#allocation7 + $0x24] sm:$0xf0] }
 0x290   :  { %v7498_v57 = vld [vmem:[#allocation7 + $0x508] sm:$0xf] }
 0x291   :  { %v7114_v62 = vld [vmem:[#allocation7 + $0x208] sm:$0xf] }
 0x2bd   :  { %v3060_v38 = vpop.f32.mrf.mxu0 }
 0x2be   :  { %v3061_v7 = vadd.f32 %v3060_v38, %v2723_v41  ;;  %v8301_v38 = vld [vmem:[#allocation7 + $0x124] sm:$0xf0] }
 0x2bf   :  { %v6987_v53 = vor.u32 %v8301_v38, %v6986_v55  ;;  %v8321_v55 = vld [vmem:[#allocation7 + $0x1cc] sm:$0xf] }
 0x2c0   :  { %v7084_v38 = vld [vmem:[#allocation7 + $0x1e8] sm:$0xf0] }
 0x2c1   :  { %v7087_v61 = vor.u32 %v8321_v55, %v7084_v38  ;;  %v7244_v55 = vld [vmem:[#allocation7 + $0x328] sm:$0xf0] }
 0x2c3   :  { %v3088_v63 = vpop.f32.mrf.mxu2 }
 0x2c4   :  { %v3089_v25 = vadd.f32 %v3088_v63, %v2724_v13  ;;  %v6954_v63 = vld [vmem:[#allocation7 + $0xc8] sm:$0xf] }
 0x2c5   :  { %v3062_v5 = vpop.f32.mrf.mxu0  ;;  %v6955_v47 = vor.u32 %v8293_v10, %v6954_v63  ;;  %v8313_v10 = vld [vmem:[#allocation7 + $0x18c] sm:$0xf] }
 0x2c6   :  { %v3063_v15 = vadd.f32 %v3062_v5, %v2723_v41  ;;  %v7055_v2 = vor.u32 %v8313_v10, %v7052_v44  ;;  %v8513_v10 = vld [vmem:[#allocation7 + $0x7cc] sm:$0xf] }
 0x2c7   :  { %v7852_v44 = vld [vmem:[#allocation7 + $0x7e8] sm:$0xf0] }
 0x2cb   :  { %v3090_v11 = vpop.f32.mrf.mxu2 }
 0x2cc   :  { %v3091_v29 = vadd.f32 %v3090_v11, %v2724_v13 }
 0x2cd   :  { %v3074_v14 = vpop.f32.mrf.mxu1 }
 0x2ce   :  { %v3075_v16 = vadd.f32 %v3074_v14, %v3061_v7  ;;  %v3116_v23 = vpop.f32.mrf.mxu0  ;;  %v6922_v7 = vld [vmem:[#allocation7 + $0x88] sm:$0xf] }
 0x2cf   :  { %v3117_v1 = vadd.f32 %v3116_v23, %v2725_v45 }
 0x2d0   :  { %v3163_v26 = vmax.f32 %v3075_v16, 0.0  ;;  %v7562_v16 = vld [vmem:[#allocation7 + $0x588] sm:$0xf] }
 0x2d3   :  { %v3102_v12 = vpop.f32.mrf.mxu3 }
 0x2d4   :  { %v3103_v31 = vadd.f32 %v3102_v12, %v3089_v25  ;;  %v3144_v37 = vpop.f32.mrf.mxu2  ;;  %v8357_v25 = vld [vmem:[#allocation7 + $0x2e4] sm:$0xf0] }
 0x2d5   :  { %v3076_v19 = vpop.f32.mrf.mxu1  ;;  %v3145_v5 = vadd.f32 %v3144_v37, %v2726_v60  ;;  %v7211_v42 = vor.u32 %v8357_v25, %v7210_v18  ;;  %v7178_v37 = vld [vmem:[#allocation7 + $0x288] sm:$0xf]  ;;  %v8377_v18 = vld [vmem:[#allocation7 + $0x38c] sm:$0xf] }
 0x2d6   :  { %v3077_v21 = vadd.f32 %v3076_v19, %v3063_v15  ;;  %v3164_v48 = vmax.f32 %v3103_v31, 0.0  ;;  %v3118_v28 = vpop.f32.mrf.mxu0  ;;  %v8285_v15 = vld [vmem:[#allocation7 + $0xa4] sm:$0xf0] }
 0x2d7   :  { %v3119_v30 = vadd.f32 %v3118_v28, %v2725_v45  ;;  %v8445_v19 = vld [vmem:[#allocation7 + $0x5a4] sm:$0xf0] }
 0x2d8   :  { %v3167_v27 = vmax.f32 %v3077_v21, 0.0  ;;  %v6890_v31 = vld [vmem:[#allocation7 + $0x48] sm:$0xf] }
 0x2d9   :  { %v6891_v52 = vor.u32 %v8277_v35, %v6890_v31  ;;  %v8429_v28 = vld [vmem:[#allocation7 + $0x524] sm:$0xf0]  ;;  %v6988_v31 = vld [vmem:[#allocation7 + $0x128] sm:$0xf0] }
 0x2da   :  { %v8952_v34 = vpack.c.bf16 %v3167_v27, %v3163_v26  ;;  %v7850_v26 = vld [vmem:[#allocation7 + $0x7c8] sm:$0xf]  ;;  %v7499_v39 = vor.u32 %v8429_v28, %v7498_v57 }
 0x2db   :  { %v3104_v0 = vpop.f32.mrf.mxu3  ;;  %v8517_v27 = vld [vmem:[#allocation7 + $0x7e4] sm:$0xf0] }
 0x2dc   :  { %v3105_v40 = vadd.f32 %v3104_v0, %v3091_v29  ;;  %4737 = vmatmul.bf16.vlgmr.msra.gmra.mxu0 %v8952_v34  ;;  %v3146_v43 = vpop.f32.mrf.mxu2  ;;  %v7563_v29 = vor.u32 %v8445_v19, %v7562_v16  ;;  %v7851_v45 = vor.u32 %v8517_v27, %v7850_v26  ;;  %v7722_v19 = vld [vmem:[#allocation7 + $0x6c8] sm:$0xf] }
 0x2dd   :  { %4841 = vmatpush.bf16.msra.mxu0 %v7083_v3  ;;  %v3130_v46 = vpop.f32.mrf.mxu1  ;;  %v3147_v11 = vadd.f32 %v3146_v43, %v2726_v60  ;;  %v6923_v3 = vor.u32 %v8285_v15, %v6922_v7  ;;  %v7786_v60 = vld [vmem:[#allocation7 + $0x748] sm:$0xf]  ;;  %v7020_v15 = vld [vmem:[#allocation7 + $0x168] sm:$0xf0] }
 0x2de   :  { %v3168_v51 = vmax.f32 %v3105_v40, 0.0  ;;  %v3131_v58 = vadd.f32 %v3130_v46, %v3117_v1  ;;  %v7530_v40 = vld [vmem:[#allocation7 + $0x548] sm:$0xf] }
 0x2df   :  { %v7531_v9 = vor.u32 %v8437_v33, %v7530_v40  ;;  %v8333_v43 = vld [vmem:[#allocation7 + $0x224] sm:$0xf0]  ;;  %v8369_v33 = vld [vmem:[#allocation7 + $0x34c] sm:$0xf] }
 0x2e0   :  { %v8956_v54 = vpack.c.bf16 %v3168_v51, %v3164_v48  ;;  %v3165_v14 = vmax.f32 %v3131_v58, 0.0  ;;  %v7818_v48 = vld [vmem:[#allocation7 + $0x788] sm:$0xf]  ;;  %v7115_v7 = vor.u32 %v8333_v43, %v7114_v62 }
 0x2e1   :  { %4842 = vmatpush.bf16.msra.mxu0 %v7051_v50  ;;  %v8349_v50 = vld [vmem:[#allocation7 + $0x2a4] sm:$0xf0] }
 0x2e2   :  { %4751 = vmatmul.bf16.vlgmr.msra.gmra.mxu1 %v8956_v54  ;;  %v8509_v51 = vld [vmem:[#allocation7 + $0x7a4] sm:$0xf0] }
 0x2e3   :  { %4855 = vmatpush.bf16.msra.mxu1 %v7339_v8  ;;  %v3158_v59 = vpop.f32.mrf.mxu3  ;;  %v6858_v8 = vld [vmem:[#allocation7 + $0x8] sm:$0xf]  ;;  %v7819_v1 = vor.u32 %v8509_v51, %v7818_v48  ;;  %v8289_v48 = vld [vmem:[#allocation7 + $0xcc] sm:$0xf] }
 0x2e4   :  { %v3159_v12 = vadd.f32 %v3158_v59, %v3145_v5  ;;  %v7146_v59 = vld [vmem:[#allocation7 + $0x248] sm:$0xf]  ;;  %v6859_v58 = vor.u32 %v8269_v56, %v6858_v8  ;;  %v7596_v8 = vld [vmem:[#allocation7 + $0x5e8] sm:$0xf0] }
 0x2e5   :  { %4843 = vmatpush.bf16.msra.mxu0 %v7019_v49  ;;  %v3132_v17 = vpop.f32.mrf.mxu1  ;;  %v7179_v49 = vor.u32 %v8349_v50, %v7178_v37  ;;  %v8493_v5 = vld [vmem:[#allocation7 + $0x724] sm:$0xf0] }
 0x2e6   :  { %v3133_v20 = vadd.f32 %v3132_v17, %v3119_v30  ;;  %v3166_v36 = vmax.f32 %v3159_v12, 0.0  ;;  %v8501_v30 = vld [vmem:[#allocation7 + $0x764] sm:$0xf0]  ;;  %v8305_v12 = vld [vmem:[#allocation7 + $0x14c] sm:$0xf] }
 0x2e7   :  { %4856 = vmatpush.bf16.msra.mxu1 %v7307_v24  ;;  %v8341_v24 = vld [vmem:[#allocation7 + $0x264] sm:$0xf0]  ;;  %v7023_v25 = vor.u32 %v8305_v12, %v7020_v15  ;;  %v7820_v12 = vld [vmem:[#allocation7 + $0x7a8] sm:$0xf0] }
 0x2e8   :  { %v3169_v41 = vmax.f32 %v3133_v20, 0.0  ;;  %v7466_v17 = vld [vmem:[#allocation7 + $0x4c8] sm:$0xf]  ;;  %v7147_v63 = vor.u32 %v8341_v24, %v7146_v59  ;;  %v7787_v20 = vor.u32 %v8501_v30, %v7786_v60  ;;  %v8281_v24 = vld [vmem:[#allocation7 + $0x8c] sm:$0xf] }
 0x2e9   :  { %4844 = vmatpush.bf16.msra.mxu0 %v6987_v53  ;;  %v8421_v53 = vld [vmem:[#allocation7 + $0x4e4] sm:$0xf0]  ;;  %v6924_v30 = vld [vmem:[#allocation7 + $0xa8] sm:$0xf0] }
 0x2ea   :  { %v8960_v13 = vpack.c.bf16 %v3169_v41, %v3165_v14  ;;  %v7467_v14 = vor.u32 %v8421_v53, %v7466_v17  ;;  %v8385_v41 = vld [vmem:[#allocation7 + $0x3cc] sm:$0xf]  ;;  %v7402_v26 = vld [vmem:[#allocation7 + $0x448] sm:$0xf]  ;;  %v6927_v62 = vor.u32 %v8281_v24, %v6924_v30  ;;  %v7026_v24 = vld [vmem:[#allocation7 + $0x150] sm:$0xf] }
 0x2eb   :  { %4857 = vmatpush.bf16.msra.mxu1 %v7275_v4  ;;  %v3160_v21 = vpop.f32.mrf.mxu3  ;;  %v7754_v4 = vld [vmem:[#allocation7 + $0x708] sm:$0xf]  ;;  %v7343_v16 = vor.u32 %v8385_v41, %v7340_v6  ;;  %v8433_v41 = vld [vmem:[#allocation7 + $0x54c] sm:$0xf] }
 0x2ec   :  { %v3161_v23 = vadd.f32 %v3160_v21, %v3147_v11  ;;  %4765 = vmatmul.bf16.vlgmr.msra.gmra.mxu2 %v8960_v13  ;;  %4793 = vmatmul.bf16.vlgmr.msrb.gmra.mxu0 %v8952_v34  ;;  %v7755_v11 = vor.u32 %v8493_v5, %v7754_v4  ;;  %v8485_v21 = vld [vmem:[#allocation7 + $0x6e4] sm:$0xf0]  ;;  %v8273_v4 = vld [vmem:[#allocation7 + $0x4c] sm:$0xf] }
 0x2ed   :  { %4845 = vmatpush.bf16.msra.mxu0 %v6955_v47  ;;  %4869 = vmatpush.bf16.msra.mxu2 %v7595_v32  ;;  %v7434_v47 = vld [vmem:[#allocation7 + $0x488] sm:$0xf]  ;;  %v7532_v6 = vld [vmem:[#allocation7 + $0x568] sm:$0xf0] }
 0x2ee   :  { %v3170_v0 = vmax.f32 %v3161_v23, 0.0  ;;  %v8413_v32 = vld [vmem:[#allocation7 + $0x4a4] sm:$0xf0]  ;;  %v7308_v23 = vld [vmem:[#allocation7 + $0x3a8] sm:$0xf0] }
 0x2ef   :  { %4858 = vmatpush.bf16.msra.mxu1 %v7243_v22  ;;  %v7435_v22 = vor.u32 %v8413_v32, %v7434_v47  ;;  %v8405_v27 = vld [vmem:[#allocation7 + $0x464] sm:$0xf0]  ;;  %v7311_v35 = vor.u32 %v8377_v18, %v7308_v23  ;;  %v7855_v47 = vor.u32 %v8513_v10, %v7852_v44  ;;  %v8345_v32 = vld [vmem:[#allocation7 + $0x28c] sm:$0xf] }
 0x2f0   :  { %v8964_v46 = vpack.c.bf16 %v3170_v0, %v3166_v36  ;;  %v7690_v36 = vld [vmem:[#allocation7 + $0x688] sm:$0xf]  ;;  %v7403_v40 = vor.u32 %v8405_v27, %v7402_v26  ;;  %v7500_v18 = vld [vmem:[#allocation7 + $0x528] sm:$0xf0]  ;;  %v7090_v26 = vld [vmem:[#allocation7 + $0x1d0] sm:$0xf] }
 0x2f1   :  { %4846 = vmatpush.bf16.msra.mxu0 %v6923_v3  ;;  %4870 = vmatpush.bf16.msra.mxu2 %v7563_v29  ;;  %v7723_v3 = vor.u32 %v8485_v21, %v7722_v19  ;;  %v8297_v29 = vld [vmem:[#allocation7 + $0x10c] sm:$0xf]  ;;  %v8477_v0 = vld [vmem:[#allocation7 + $0x6a4] sm:$0xf0]  ;;  %v8326_v27 = vld [vmem:[#allocation7 + $0x1ec] sm:$0xf0] }
 0x2f2   :  { %4779 = vmatmul.bf16.vlgmr.msra.gmra.mxu3 %v8964_v46  ;;  %4807 = vmatmul.bf16.vlgmr.msrb.gmra.mxu1 %v8956_v54  ;;  %v7370_v37 = vld [vmem:[#allocation7 + $0x408] sm:$0xf]  ;;  %v7691_v51 = vor.u32 %v8477_v0, %v7690_v36  ;;  %v8265_v19 = vld [vmem:[#allocation7 + $0xc] sm:$0xf] }
 0x2f3   :  { %4859 = vmatpush.bf16.msra.mxu1 %v7211_v42  ;;  %4883 = vmatpush.bf16.msra.mxu3 %v7851_v45  ;;  %v7276_v42 = vld [vmem:[#allocation7 + $0x368] sm:$0xf0]  ;;  %v6991_v45 = vor.u32 %v8297_v29, %v6988_v31  ;;  %v8397_v50 = vld [vmem:[#allocation7 + $0x424] sm:$0xf0] }
 0x2f4   :  { %v7279_v56 = vor.u32 %v8369_v33, %v7276_v42  ;;  %v7658_v57 = vld [vmem:[#allocation7 + $0x648] sm:$0xf]  ;;  %v6860_v21 = vld [vmem:[#allocation7 + $0x28] sm:$0xf0] }
 0x2f5   :  { %4847 = vmatpush.bf16.msra.mxu0 %v6891_v52  ;;  %4871 = vmatpush.bf16.msra.mxu2 %v7531_v9  ;;  %v6956_v52 = vld [vmem:[#allocation7 + $0xe8] sm:$0xf0]  ;;  %v8469_v28 = vld [vmem:[#allocation7 + $0x664] sm:$0xf0]  ;;  %v6863_v36 = vor.u32 %v8265_v19, %v6860_v21  ;;  %v8454_v19 = vld [vmem:[#allocation7 + $0x5ec] sm:$0xf0] }
 0x2f6   :  { %v8449_v9 = vld [vmem:[#allocation7 + $0x5cc] sm:$0xf]  ;;  %v6959_v38 = vor.u32 %v8289_v48, %v6956_v52  ;;  %v7659_v60 = vor.u32 %v8469_v28, %v7658_v57  ;;  %v7626_v17 = vld [vmem:[#allocation7 + $0x608] sm:$0xf]  ;;  %v8318_v48 = vld [vmem:[#allocation7 + $0x1ac] sm:$0xf0] }
 0x2f7   :  { %4860 = vmatpush.bf16.msra.mxu1 %v7179_v49  ;;  %4884 = vmatpush.bf16.msra.mxu3 %v7819_v1  ;;  %v7371_v49 = vor.u32 %v8397_v50, %v7370_v37  ;;  %v8361_v1 = vld [vmem:[#allocation7 + $0x30c] sm:$0xf]  ;;  %v7599_v59 = vor.u32 %v8449_v9, %v7596_v8  ;;  %v8461_v53 = vld [vmem:[#allocation7 + $0x624] sm:$0xf0]  ;;  %v7058_v50 = vld [vmem:[#allocation7 + $0x190] sm:$0xf] }
 0x2f8   :  { %v7627_v5 = vor.u32 %v8461_v53, %v7626_v17  ;;  %v7148_v29 = vld [vmem:[#allocation7 + $0x268] sm:$0xf0]  ;;  %v7346_v57 = vld [vmem:[#allocation7 + $0x3d0] sm:$0xf] }
 0x2f9   :  { %4848 = vmatpush.bf16.msra.mxu0 %v6859_v58  ;;  %4872 = vmatpush.bf16.msra.mxu2 %v7499_v39  ;;  %v8441_v58 = vld [vmem:[#allocation7 + $0x58c] sm:$0xf]  ;;  %v8390_v28 = vld [vmem:[#allocation7 + $0x3ec] sm:$0xf0] }
 0x2fa   :  { %v7564_v39 = vld [vmem:[#allocation7 + $0x5a8] sm:$0xf0]  ;;  %v7347_v30 = vor.u32 %v8390_v28, %v7346_v57  ;;  %v7314_v17 = vld [vmem:[#allocation7 + $0x390] sm:$0xf] }
 0x2fb   :  { %4861 = vmatpush.bf16.msra.mxu1 %v7147_v63  ;;  %4885 = vmatpush.bf16.msra.mxu3 %v7787_v20  ;;  %v8353_v63 = vld [vmem:[#allocation7 + $0x2cc] sm:$0xf]  ;;  %v7567_v43 = vor.u32 %v8441_v58, %v7564_v39  ;;  %v8382_v53 = vld [vmem:[#allocation7 + $0x3ac] sm:$0xf0] }
 0x2fc   :  { %4821 = vmatmul.bf16.vlgmr.msrb.gmra.mxu2 %v8960_v13  ;;  %4849 = vmatmul.bf16.vlgmr.msra.gmra.mxu0 %v8952_v34  ;;  %v7212_v20 = vld [vmem:[#allocation7 + $0x2e8] sm:$0xf0] }
 0x2fd   :  { %4897 = vmatpush.bf16.msrb.mxu0 %v7087_v61  ;;  %4873 = vmatpush.bf16.msra.mxu2 %v7467_v14  ;;  %v7247_v61 = vor.u32 %v8361_v1, %v7244_v55  ;;  %v6892_v14 = vld [vmem:[#allocation7 + $0x68] sm:$0xf0] }
 0x2fe   :  { %v6895_v15 = vor.u32 %v8273_v4, %v6892_v14  ;;  %v8497_v31 = vld [vmem:[#allocation7 + $0x74c] sm:$0xf]  ;;  %v7315_v4 = vor.u32 %v8382_v53, %v7314_v17  ;;  %v8430_v17 = vld [vmem:[#allocation7 + $0x52c] sm:$0xf0] }
 0x2ff   :  { %4862 = vmatpush.bf16.msra.mxu1 %v7115_v7  ;;  %4886 = vmatpush.bf16.msra.mxu3 %v7755_v11  ;;  %v7180_v7 = vld [vmem:[#allocation7 + $0x2a8] sm:$0xf0] }
 0x300   :  { %v8505_v11 = vld [vmem:[#allocation7 + $0x78c] sm:$0xf]  ;;  %v7183_v23 = vor.u32 %v8345_v32, %v7180_v7 }
 0x301   :  { %4898 = vmatpush.bf16.msrb.mxu0 %v7055_v2  ;;  %4874 = vmatpush.bf16.msra.mxu2 %v7435_v22  ;;  %v7215_v2 = vor.u32 %v8353_v63, %v7212_v20  ;;  %v8425_v22 = vld [vmem:[#allocation7 + $0x50c] sm:$0xf] }
 0x302   :  { %4835 = vmatmul.bf16.vlgmr.msrb.gmra.mxu3 %v8964_v46  ;;  %4863 = vmatmul.bf16.vlgmr.msra.gmra.mxu1 %v8956_v54  ;;  %v7503_v0 = vor.u32 %v8425_v22, %v7500_v18  ;;  %v8417_v33 = vld [vmem:[#allocation7 + $0x4cc] sm:$0xf] }
 0x303   :  { %4911 = vmatpush.bf16.msrb.mxu1 %v7343_v16  ;;  %4887 = vmatpush.bf16.msra.mxu3 %v7723_v3  ;;  %v7535_v16 = vor.u32 %v8433_v41, %v7532_v6  ;;  %v8337_v3 = vld [vmem:[#allocation7 + $0x24c] sm:$0xf]  ;;  %v7282_v6 = vld [vmem:[#allocation7 + $0x350] sm:$0xf] }
 0x304   :  { %v7468_v42 = vld [vmem:[#allocation7 + $0x4e8] sm:$0xf0] }
 0x305   :  { %4899 = vmatpush.bf16.msrb.mxu0 %v7023_v25  ;;  %4875 = vmatpush.bf16.msra.mxu2 %v7403_v40  ;;  %v7823_v25 = vor.u32 %v8505_v11, %v7820_v12  ;;  %v7091_v40 = vor.u32 %v8326_v27, %v7090_v26  ;;  %v7116_v52 = vld [vmem:[#allocation7 + $0x228] sm:$0xf0]  ;;  %v6962_v11 = vld [vmem:[#allocation7 + $0xd0] sm:$0xf] }
 0x306   :  { %v8489_v9 = vld [vmem:[#allocation7 + $0x70c] sm:$0xf]  ;;  %v8366_v26 = vld [vmem:[#allocation7 + $0x32c] sm:$0xf0] }
 0x307   :  { %4912 = vmatpush.bf16.msrb.mxu1 %v7311_v35  ;;  %4888 = vmatpush.bf16.msra.mxu3 %v7691_v51  ;;  %v7788_v35 = vld [vmem:[#allocation7 + $0x768] sm:$0xf0] }
 0x308   :  { %v7791_v37 = vor.u32 %v8497_v31, %v7788_v35  ;;  %v8329_v51 = vld [vmem:[#allocation7 + $0x20c] sm:$0xf]  ;;  %v8286_v35 = vld [vmem:[#allocation7 + $0xac] sm:$0xf0] }
 0x309   :  { %4900 = vmatpush.bf16.msrb.mxu0 %v6991_v45  ;;  %4876 = vmatpush.bf16.msra.mxu2 %v7371_v49  ;;  %v7151_v45 = vor.u32 %v8337_v3, %v7148_v29  ;;  %v7756_v8 = vld [vmem:[#allocation7 + $0x728] sm:$0xf0]  ;;  %v7059_v49 = vor.u32 %v8318_v48, %v7058_v50  ;;  %v6930_v29 = vld [vmem:[#allocation7 + $0x90] sm:$0xf] }
 0x30a   :  { %v8409_v1 = vld [vmem:[#allocation7 + $0x48c] sm:$0xf]  ;;  %v7858_v50 = vld [vmem:[#allocation7 + $0x7d0] sm:$0xf] }
 0x30b   :  { %4913 = vmatpush.bf16.msrb.mxu1 %v7279_v56  ;;  %4889 = vmatpush.bf16.msra.mxu3 %v7659_v60  ;;  %v7471_v56 = vor.u32 %v8417_v33, %v7468_v42  ;;  %v7436_v55 = vld [vmem:[#allocation7 + $0x4a8] sm:$0xf0]  ;;  %v8310_v60 = vld [vmem:[#allocation7 + $0x16c] sm:$0xf0] }
 0x30c   :  { %4877 = vmatmul.bf16.vlgmr.msra.gmra.mxu2 %v8960_v13  ;;  %v8481_v58 = vld [vmem:[#allocation7 + $0x6cc] sm:$0xf]  ;;  %v7027_v63 = vor.u32 %v8310_v60, %v7026_v24  ;;  %v8518_v48 = vld [vmem:[#allocation7 + $0x7ec] sm:$0xf0] }
 0x30d   :  { %4901 = vmatpush.bf16.msrb.mxu0 %v6959_v38  ;;  %4925 = vmatpush.bf16.msrb.mxu2 %v7599_v59  ;;  %v7119_v38 = vor.u32 %v8329_v51, %v7116_v52  ;;  %v7759_v59 = vor.u32 %v8489_v9, %v7756_v8  ;;  %v7724_v39 = vld [vmem:[#allocation7 + $0x6e8] sm:$0xf0]  ;;  %v6931_v51 = vor.u32 %v8286_v35, %v6930_v29  ;;  %v6898_v8 = vld [vmem:[#allocation7 + $0x50] sm:$0xf]  ;;  %v8306_v29 = vld [vmem:[#allocation7 + $0x154] sm:$0xf] }
 0x30e   :  { %v8401_v20 = vld [vmem:[#allocation7 + $0x44c] sm:$0xf]  ;;  %v7727_v44 = vor.u32 %v8481_v58, %v7724_v39  ;;  %v7859_v28 = vor.u32 %v8518_v48, %v7858_v50  ;;  %v8510_v24 = vld [vmem:[#allocation7 + $0x7ac] sm:$0xf0]  ;;  %v7028_v35 = vld [vmem:[#allocation7 + $0x170] sm:$0xf0] }
 0x30f   :  { %4914 = vmatpush.bf16.msrb.mxu1 %v7247_v61  ;;  %4890 = vmatpush.bf16.msra.mxu3 %v7627_v5  ;;  %v7439_v61 = vor.u32 %v8409_v1, %v7436_v55  ;;  %v7404_v10 = vld [vmem:[#allocation7 + $0x468] sm:$0xf0]  ;;  %v8438_v1 = vld [vmem:[#allocation7 + $0x56c] sm:$0xf0] }
 0x310   :  { %v8473_v5 = vld [vmem:[#allocation7 + $0x68c] sm:$0xf]  ;;  %v7407_v41 = vor.u32 %v8401_v20, %v7404_v10  ;;  %v7186_v55 = vld [vmem:[#allocation7 + $0x290] sm:$0xf]  ;;  %v8322_v20 = vld [vmem:[#allocation7 + $0x1d4] sm:$0xf] }
 0x311   :  { %4902 = vmatpush.bf16.msrb.mxu0 %v6927_v62  ;;  %4926 = vmatpush.bf16.msrb.mxu2 %v7567_v43  ;;  %v6994_v62 = vld [vmem:[#allocation7 + $0x110] sm:$0xf]  ;;  %v7692_v14 = vld [vmem:[#allocation7 + $0x6a8] sm:$0xf0]  ;;  %v7092_v10 = vld [vmem:[#allocation7 + $0x1f0] sm:$0xf0] }
 0x312   :  { %4891 = vmatmul.bf16.vlgmr.msra.gmra.mxu3 %v8964_v46  ;;  %v8302_v43 = vld [vmem:[#allocation7 + $0x12c] sm:$0xf0]  ;;  %v8393_v32 = vld [vmem:[#allocation7 + $0x40c] sm:$0xf]  ;;  %v7695_v12 = vor.u32 %v8473_v5, %v7692_v14 }
 0x313   :  { %4915 = vmatpush.bf16.msrb.mxu1 %v7215_v2  ;;  %4939 = vmatpush.bf16.msrb.mxu3 %v7855_v47  ;;  %v8374_v2 = vld [vmem:[#allocation7 + $0x36c] sm:$0xf0]  ;;  %v6995_v47 = vor.u32 %v8302_v43, %v6994_v62  ;;  %v7372_v7 = vld [vmem:[#allocation7 + $0x428] sm:$0xf0] }
 0x314   :  { %v7283_v21 = vor.u32 %v8374_v2, %v7282_v6  ;;  %v8465_v22 = vld [vmem:[#allocation7 + $0x64c] sm:$0xf]  ;;  %v8270_v39 = vld [vmem:[#allocation7 + $0x2c] sm:$0xf0] }
 0x315   :  { %4903 = vmatpush.bf16.msrb.mxu0 %v6895_v15  ;;  %4927 = vmatpush.bf16.msrb.mxu2 %v7535_v16  ;;  %v8294_v15 = vld [vmem:[#allocation7 + $0xec] sm:$0xf0]  ;;  %v7660_v18 = vld [vmem:[#allocation7 + $0x668] sm:$0xf0] }
 0x316   :  { %v7602_v16 = vld [vmem:[#allocation7 + $0x5d0] sm:$0xf]  ;;  %v6963_v27 = vor.u32 %v8294_v15, %v6962_v11  ;;  %v7663_v31 = vor.u32 %v8465_v22, %v7660_v18  ;;  %v8457_v33 = vld [vmem:[#allocation7 + $0x60c] sm:$0xf]  ;;  %v7060_v11 = vld [vmem:[#allocation7 + $0x1b0] sm:$0xf0] }
 0x317   :  { %4916 = vmatpush.bf16.msrb.mxu1 %v7183_v23  ;;  %4940 = vmatpush.bf16.msrb.mxu3 %v7823_v25  ;;  %v7375_v23 = vor.u32 %v8393_v32, %v7372_v7  ;;  %v7250_v25 = vld [vmem:[#allocation7 + $0x310] sm:$0xf]  ;;  %v7603_v3 = vor.u32 %v8454_v19, %v7602_v16  ;;  %v7628_v42 = vld [vmem:[#allocation7 + $0x628] sm:$0xf0]  ;;  %v8314_v7 = vld [vmem:[#allocation7 + $0x194] sm:$0xf] }
 0x318   :  { %v7631_v9 = vor.u32 %v8457_v33, %v7628_v42  ;;  %v8342_v62 = vld [vmem:[#allocation7 + $0x26c] sm:$0xf0]  ;;  %v7348_v22 = vld [vmem:[#allocation7 + $0x3f0] sm:$0xf0] }
 0x319   :  { %4904 = vmatpush.bf16.msrb.mxu0 %v6863_v36  ;;  %4928 = vmatpush.bf16.msrb.mxu2 %v7503_v0  ;;  %v7570_v36 = vld [vmem:[#allocation7 + $0x590] sm:$0xf]  ;;  %v7316_v33 = vld [vmem:[#allocation7 + $0x3b0] sm:$0xf0] }
 0x31a   :  { %v8446_v0 = vld [vmem:[#allocation7 + $0x5ac] sm:$0xf0] }
 0x31b   :  { %4917 = vmatpush.bf16.msrb.mxu1 %v7151_v45  ;;  %4941 = vmatpush.bf16.msrb.mxu3 %v7791_v37  ;;  %v7218_v45 = vld [vmem:[#allocation7 + $0x2d0] sm:$0xf]  ;;  %v7571_v52 = vor.u32 %v8446_v0, %v7570_v36 }
 0x31c   :  { %4905 = vmatmul.bf16.vlgmr.msrb.gmra.mxu0 %v8952_v34  ;;  %v8358_v37 = vld [vmem:[#allocation7 + $0x2ec] sm:$0xf0] }
 0x31d   :  { %4953 = vmatpush.bf16.msra.mxu0 %v7091_v40  ;;  %4929 = vmatpush.bf16.msrb.mxu2 %v7471_v56  ;;  %v7251_v40 = vor.u32 %v8366_v26, %v7250_v25  ;;  %v8278_v56 = vld [vmem:[#allocation7 + $0x6c] sm:$0xf0]  ;;  %v7219_v57 = vor.u32 %v8358_v37, %v7218_v45  ;;  %v7031_v45 = vor.u32 %v8306_v29, %v7028_v35  ;;  %v7828_v29 = vld [vmem:[#allocation7 + $0x7b0] sm:$0xf0] }
 0x31e   :  { %v6899_v60 = vor.u32 %v8278_v56, %v6898_v8  ;;  %v7794_v43 = vld [vmem:[#allocation7 + $0x750] sm:$0xf]  ;;  %v8266_v35 = vld [vmem:[#allocation7 + $0x14] sm:$0xf] }
 0x31f   :  { %4918 = vmatpush.bf16.msrb.mxu1 %v7119_v38  ;;  %4942 = vmatpush.bf16.msrb.mxu3 %v7759_v59  ;;  %v8350_v38 = vld [vmem:[#allocation7 + $0x2ac] sm:$0xf0] }
 0x320   :  { %v7826_v59 = vld [vmem:[#allocation7 + $0x790] sm:$0xf]  ;;  %v7187_v53 = vor.u32 %v8350_v38, %v7186_v55 }
 0x321   :  { %4954 = vmatpush.bf16.msra.mxu0 %v7059_v49  ;;  %4930 = vmatpush.bf16.msrb.mxu2 %v7439_v61  ;;  %v7538_v49 = vld [vmem:[#allocation7 + $0x550] sm:$0xf] }
 0x322   :  { %4919 = vmatmul.bf16.vlgmr.msrb.gmra.mxu1 %v8956_v54  ;;  %v7539_v58 = vor.u32 %v8438_v1, %v7538_v49  ;;  %v7506_v61 = vld [vmem:[#allocation7 + $0x510] sm:$0xf] }
 0x323   :  { %4967 = vmatpush.bf16.msra.mxu1 %v7347_v30  ;;  %4943 = vmatpush.bf16.msrb.mxu3 %v7727_v44  ;;  %v6866_v30 = vld [vmem:[#allocation7 + $0x10] sm:$0xf]  ;;  %v7507_v14 = vor.u32 %v8430_v17, %v7506_v61 }
 0x324   :  { %v7154_v44 = vld [vmem:[#allocation7 + $0x250] sm:$0xf]  ;;  %v6867_v5 = vor.u32 %v8270_v39, %v6866_v30  ;;  %v7604_v39 = vld [vmem:[#allocation7 + $0x5f0] sm:$0xf0] }
 0x325   :  { %4955 = vmatpush.bf16.msra.mxu0 %v7027_v63  ;;  %4931 = vmatpush.bf16.msrb.mxu2 %v7407_v41  ;;  %v7827_v63 = vor.u32 %v8510_v24, %v7826_v59  ;;  %v7095_v41 = vor.u32 %v8322_v20, %v7092_v10  ;;  %v7474_v6 = vld [vmem:[#allocation7 + $0x4d0] sm:$0xf]  ;;  %v8290_v24 = vld [vmem:[#allocation7 + $0xd4] sm:$0xf] }
 0x326   :  { %v8422_v2 = vld [vmem:[#allocation7 + $0x4ec] sm:$0xf0] }
 0x327   :  { %4968 = vmatpush.bf16.msra.mxu1 %v7315_v4  ;;  %4944 = vmatpush.bf16.msrb.mxu3 %v7695_v12  ;;  %v8502_v4 = vld [vmem:[#allocation7 + $0x76c] sm:$0xf0]  ;;  %v7475_v18 = vor.u32 %v8422_v2, %v7474_v6 }
 0x328   :  { %v7795_v32 = vor.u32 %v8502_v4, %v7794_v43  ;;  %v7122_v12 = vld [vmem:[#allocation7 + $0x210] sm:$0xf]  ;;  %v6932_v43 = vld [vmem:[#allocation7 + $0xb0] sm:$0xf0] }
 0x329   :  { %4956 = vmatpush.bf16.msra.mxu0 %v6995_v47  ;;  %4932 = vmatpush.bf16.msrb.mxu2 %v7375_v23  ;;  %v7155_v47 = vor.u32 %v8342_v62, %v7154_v44  ;;  %v8334_v15 = vld [vmem:[#allocation7 + $0x22c] sm:$0xf0]  ;;  %v7063_v23 = vor.u32 %v8314_v7, %v7060_v11  ;;  %v8282_v62 = vld [vmem:[#allocation7 + $0x94] sm:$0xf] }
 0x32a   :  { %v7762_v16 = vld [vmem:[#allocation7 + $0x710] sm:$0xf]  ;;  %v7123_v25 = vor.u32 %v8334_v15, %v7122_v12  ;;  %v8514_v7 = vld [vmem:[#allocation7 + $0x7d4] sm:$0xf]  ;;  %v6935_v12 = vor.u32 %v8282_v62, %v6932_v43  ;;  %v7034_v62 = vld [vmem:[#allocation7 + $0x158] sm:$0xf] }
 0x32b   :  { %4969 = vmatpush.bf16.msra.mxu1 %v7283_v21  ;;  %4945 = vmatpush.bf16.msrb.mxu3 %v7663_v31  ;;  %v8494_v19 = vld [vmem:[#allocation7 + $0x72c] sm:$0xf0]  ;;  %v8386_v21 = vld [vmem:[#allocation7 + $0x3d4] sm:$0xf] }
 0x32c   :  { %4933 = vmatmul.bf16.vlgmr.msrb.gmra.mxu2 %v8960_v13  ;;  %v7763_v26 = vor.u32 %v8494_v19, %v7762_v16  ;;  %v7351_v31 = vor.u32 %v8386_v21, %v7348_v22  ;;  %v7730_v36 = vld [vmem:[#allocation7 + $0x6d0] sm:$0xf]  ;;  %v7860_v11 = vld [vmem:[#allocation7 + $0x7f0] sm:$0xf0] }
 0x32d   :  { %4957 = vmatpush.bf16.msra.mxu0 %v6963_v27  ;;  %4981 = vmatpush.bf16.msra.mxu2 %v7603_v3  ;;  %v7442_v27 = vld [vmem:[#allocation7 + $0x490] sm:$0xf]  ;;  %v8274_v21 = vld [vmem:[#allocation7 + $0x54] sm:$0xf] }
 0x32e   :  { %v8414_v3 = vld [vmem:[#allocation7 + $0x4ac] sm:$0xf0]  ;;  %v6900_v22 = vld [vmem:[#allocation7 + $0x70] sm:$0xf0] }
 0x32f   :  { %4970 = vmatpush.bf16.msra.mxu1 %v7251_v40  ;;  %4946 = vmatpush.bf16.msrb.mxu3 %v7631_v9  ;;  %v8486_v0 = vld [vmem:[#allocation7 + $0x6ec] sm:$0xf0]  ;;  %v8378_v40 = vld [vmem:[#allocation7 + $0x394] sm:$0xf]  ;;  %v7443_v42 = vor.u32 %v8414_v3, %v7442_v27 }
 0x330   :  { %v7731_v37 = vor.u32 %v8486_v0, %v7730_v36  ;;  %v7410_v50 = vld [vmem:[#allocation7 + $0x450] sm:$0xf]  ;;  %v6996_v9 = vld [vmem:[#allocation7 + $0x130] sm:$0xf0] }
 0x331   :  { %4958 = vmatpush.bf16.msra.mxu0 %v6931_v51  ;;  %4982 = vmatpush.bf16.msra.mxu2 %v7571_v52  ;;  %v8406_v48 = vld [vmem:[#allocation7 + $0x46c] sm:$0xf0]  ;;  %v8298_v51 = vld [vmem:[#allocation7 + $0x114] sm:$0xf]  ;;  %v7319_v52 = vor.u32 %v8378_v40, %v7316_v33 }
 0x332   :  { %4947 = vmatmul.bf16.vlgmr.msrb.gmra.mxu3 %v8964_v46  ;;  %v7698_v8 = vld [vmem:[#allocation7 + $0x690] sm:$0xf]  ;;  %v7411_v49 = vor.u32 %v8406_v48, %v7410_v50  ;;  %v6999_v55 = vor.u32 %v8298_v51, %v6996_v9  ;;  %v7188_v27 = vld [vmem:[#allocation7 + $0x2b0] sm:$0xf0]  ;;  %v8327_v50 = vld [vmem:[#allocation7 + $0x1f4] sm:$0xf0] }
 0x333   :  { %4971 = vmatpush.bf16.msra.mxu1 %v7219_v57  ;;  %4995 = vmatpush.bf16.msra.mxu3 %v7859_v28  ;;  %v8478_v56 = vld [vmem:[#allocation7 + $0x6ac] sm:$0xf0]  ;;  %v8370_v57 = vld [vmem:[#allocation7 + $0x354] sm:$0xf] }
 0x334   :  { %v7284_v28 = vld [vmem:[#allocation7 + $0x370] sm:$0xf0]  ;;  %v7378_v1 = vld [vmem:[#allocation7 + $0x410] sm:$0xf]  ;;  %v7699_v38 = vor.u32 %v8478_v56, %v7698_v8 }
 0x335   :  { %4959 = vmatpush.bf16.msra.mxu0 %v6899_v60  ;;  %4983 = vmatpush.bf16.msra.mxu2 %v7539_v58  ;;  %v8398_v59 = vld [vmem:[#allocation7 + $0x42c] sm:$0xf0]  ;;  %v6964_v60 = vld [vmem:[#allocation7 + $0xf0] sm:$0xf0]  ;;  %v7287_v30 = vor.u32 %v8370_v57, %v7284_v28 }
 0x336   :  { %v8450_v58 = vld [vmem:[#allocation7 + $0x5d4] sm:$0xf]  ;;  %v7666_v61 = vld [vmem:[#allocation7 + $0x650] sm:$0xf]  ;;  %v7379_v20 = vor.u32 %v8398_v59, %v7378_v1  ;;  %v6967_v10 = vor.u32 %v8290_v24, %v6964_v60  ;;  %v8319_v59 = vld [vmem:[#allocation7 + $0x1b4] sm:$0xf0] }
 0x337   :  { %4972 = vmatpush.bf16.msra.mxu1 %v7187_v53  ;;  %4996 = vmatpush.bf16.msra.mxu3 %v7827_v63  ;;  %v8470_v17 = vld [vmem:[#allocation7 + $0x66c] sm:$0xf0]  ;;  %v8362_v53 = vld [vmem:[#allocation7 + $0x314] sm:$0xf]  ;;  %v7607_v44 = vor.u32 %v8450_v58, %v7604_v39  ;;  %v7354_v39 = vld [vmem:[#allocation7 + $0x3d8] sm:$0xf] }
 0x338   :  { %v7252_v63 = vld [vmem:[#allocation7 + $0x330] sm:$0xf0]  ;;  %v7667_v4 = vor.u32 %v8470_v17, %v7666_v61  ;;  %v7634_v6 = vld [vmem:[#allocation7 + $0x610] sm:$0xf]  ;;  %v8391_v61 = vld [vmem:[#allocation7 + $0x3f4] sm:$0xf0] }
 0x339   :  { %4960 = vmatpush.bf16.msra.mxu0 %v6867_v5  ;;  %4984 = vmatpush.bf16.msra.mxu2 %v7507_v14  ;;  %v7255_v5 = vor.u32 %v8362_v53, %v7252_v63  ;;  %v8442_v14 = vld [vmem:[#allocation7 + $0x594] sm:$0xf]  ;;  %v8462_v2 = vld [vmem:[#allocation7 + $0x62c] sm:$0xf0]  ;;  %v7355_v43 = vor.u32 %v8391_v61, %v7354_v39  ;;  %v6906_v61 = vld [vmem:[#allocation7 + $0x58] sm:$0xf] }
 0x33a   :  { %v7635_v16 = vor.u32 %v8462_v2, %v7634_v6  ;;  %v8506_v3 = vld [vmem:[#allocation7 + $0x794] sm:$0xf]  ;;  %v8383_v6 = vld [vmem:[#allocation7 + $0x3b4] sm:$0xf0] }
 0x33b   :  { %4973 = vmatpush.bf16.msra.mxu1 %v7155_v47  ;;  %4997 = vmatpush.bf16.msra.mxu3 %v7795_v32  ;;  %v8354_v47 = vld [vmem:[#allocation7 + $0x2d4] sm:$0xf] }
 0x33c   :  { %4961 = vmatmul.bf16.vlgmr.msra.gmra.mxu0 %v8952_v34  ;;  %v7220_v32 = vld [vmem:[#allocation7 + $0x2f0] sm:$0xf0] }
 0x33d   :  { %5009 = vmatpush.bf16.msrb.mxu0 %v7095_v41  ;;  %4985 = vmatpush.bf16.msra.mxu2 %v7475_v18  ;;  %v7572_v41 = vld [vmem:[#allocation7 + $0x5b0] sm:$0xf0]  ;;  %v7223_v19 = vor.u32 %v8354_v47, %v7220_v32 }
 0x33e   :  { %v7575_v15 = vor.u32 %v8442_v14, %v7572_v41  ;;  %v8434_v18 = vld [vmem:[#allocation7 + $0x554] sm:$0xf]  ;;  %v7322_v41 = vld [vmem:[#allocation7 + $0x398] sm:$0xf] }
 0x33f   :  { %4974 = vmatpush.bf16.msra.mxu1 %v7123_v25  ;;  %4998 = vmatpush.bf16.msra.mxu3 %v7763_v26  ;;  %v7540_v25 = vld [vmem:[#allocation7 + $0x570] sm:$0xf0] }
 0x340   :  { %v8346_v26 = vld [vmem:[#allocation7 + $0x294] sm:$0xf]  ;;  %v7543_v36 = vor.u32 %v8434_v18, %v7540_v25  ;;  %v8375_v18 = vld [vmem:[#allocation7 + $0x374] sm:$0xf0] }
 0x341   :  { %5010 = vmatpush.bf16.msrb.mxu0 %v7063_v23  ;;  %4986 = vmatpush.bf16.msra.mxu2 %v7443_v42  ;;  %v7863_v23 = vor.u32 %v8514_v7, %v7860_v11  ;;  %v7191_v0 = vor.u32 %v8346_v26, %v7188_v27  ;;  %v6868_v40 = vld [vmem:[#allocation7 + $0x30] sm:$0xf0] }
 0x342   :  { %4975 = vmatmul.bf16.vlgmr.msra.gmra.mxu1 %v8956_v54  ;;  %v8426_v33 = vld [vmem:[#allocation7 + $0x514] sm:$0xf]  ;;  %v6871_v8 = vor.u32 %v8266_v35, %v6868_v40 }
 0x343   :  { %5023 = vmatpush.bf16.msrb.mxu1 %v7351_v31  ;;  %4999 = vmatpush.bf16.msra.mxu3 %v7731_v37  ;;  %v6903_v31 = vor.u32 %v8274_v21, %v6900_v22  ;;  %v7508_v42 = vld [vmem:[#allocation7 + $0x530] sm:$0xf0]  ;;  %v7098_v37 = vld [vmem:[#allocation7 + $0x1d8] sm:$0xf] }
 0x344   :  { %v8338_v48 = vld [vmem:[#allocation7 + $0x254] sm:$0xf]  ;;  %v7511_v56 = vor.u32 %v8426_v33, %v7508_v42  ;;  %v7099_v57 = vor.u32 %v8327_v50, %v7098_v37  ;;  %v7290_v22 = vld [vmem:[#allocation7 + $0x358] sm:$0xf] }
 0x345   :  { %5011 = vmatpush.bf16.msrb.mxu0 %v7031_v45  ;;  %4987 = vmatpush.bf16.msra.mxu2 %v7411_v49  ;;  %v7831_v45 = vor.u32 %v8506_v3, %v7828_v29  ;;  %v7156_v51 = vld [vmem:[#allocation7 + $0x270] sm:$0xf0]  ;;  %v6970_v29 = vld [vmem:[#allocation7 + $0xd8] sm:$0xf]  ;;  %v7291_v35 = vor.u32 %v8375_v18, %v7290_v22 }
 0x346   :  { %v7796_v9 = vld [vmem:[#allocation7 + $0x770] sm:$0xf0]  ;;  %v7159_v1 = vor.u32 %v8338_v48, %v7156_v51  ;;  %v7258_v42 = vld [vmem:[#allocation7 + $0x318] sm:$0xf] }
 0x347   :  { %5024 = vmatpush.bf16.msrb.mxu1 %v7319_v52  ;;  %5000 = vmatpush.bf16.msra.mxu3 %v7699_v38  ;;  %v8498_v52 = vld [vmem:[#allocation7 + $0x754] sm:$0xf]  ;;  %v7066_v38 = vld [vmem:[#allocation7 + $0x198] sm:$0xf] }
 0x348   :  { %v8418_v28 = vld [vmem:[#allocation7 + $0x4d4] sm:$0xf]  ;;  %v7067_v53 = vor.u32 %v8319_v59, %v7066_v38  ;;  %v6938_v51 = vld [vmem:[#allocation7 + $0x98] sm:$0xf] }
 0x349   :  { %5012 = vmatpush.bf16.msrb.mxu0 %v6999_v55  ;;  %4988 = vmatpush.bf16.msra.mxu2 %v7379_v20  ;;  %v7476_v49 = vld [vmem:[#allocation7 + $0x4f0] sm:$0xf0]  ;;  %v7799_v55 = vor.u32 %v8498_v52, %v7796_v9  ;;  %v8287_v52 = vld [vmem:[#allocation7 + $0xb4] sm:$0xf0] }
 0x34a   :  { %v8330_v24 = vld [vmem:[#allocation7 + $0x214] sm:$0xf]  ;;  %v7479_v17 = vor.u32 %v8418_v28, %v7476_v49  ;;  %v7866_v38 = vld [vmem:[#allocation7 + $0x7d8] sm:$0xf] }
 0x34b   :  { %5025 = vmatpush.bf16.msrb.mxu1 %v7287_v30  ;;  %5001 = vmatpush.bf16.msra.mxu3 %v7667_v4  ;;  %v7124_v60 = vld [vmem:[#allocation7 + $0x230] sm:$0xf0]  ;;  %v8311_v4 = vld [vmem:[#allocation7 + $0x174] sm:$0xf0] }
 0x34c   :  { %4989 = vmatmul.bf16.vlgmr.msra.gmra.mxu2 %v8960_v13  ;;  %v8490_v30 = vld [vmem:[#allocation7 + $0x714] sm:$0xf]  ;;  %v7127_v63 = vor.u32 %v8330_v24, %v7124_v60  ;;  %v7035_v47 = vor.u32 %v8311_v4, %v7034_v62  ;;  %v8519_v59 = vld [vmem:[#allocation7 + $0x7f4] sm:$0xf0]  ;;  %v6939_v24 = vor.u32 %v8287_v52, %v6938_v51 }
 0x34d   :  { %5013 = vmatpush.bf16.msrb.mxu0 %v6967_v10  ;;  %5037 = vmatpush.bf16.msrb.mxu2 %v7607_v44  ;;  %v7764_v58 = vld [vmem:[#allocation7 + $0x730] sm:$0xf0]  ;;  %v8511_v4 = vld [vmem:[#allocation7 + $0x7b4] sm:$0xf0] }
 0x34e   :  { %v7767_v20 = vor.u32 %v8490_v30, %v7764_v58  ;;  %v8410_v10 = vld [vmem:[#allocation7 + $0x494] sm:$0xf]  ;;  %v8503_v22 = vld [vmem:[#allocation7 + $0x774] sm:$0xf0] }
 0x34f   :  { %5026 = vmatpush.bf16.msrb.mxu1 %v7255_v5  ;;  %5002 = vmatpush.bf16.msra.mxu3 %v7635_v16  ;;  %v7444_v44 = vld [vmem:[#allocation7 + $0x4b0] sm:$0xf0]  ;;  %v8303_v16 = vld [vmem:[#allocation7 + $0x134] sm:$0xf0] }
 0x350   :  { %v8482_v5 = vld [vmem:[#allocation7 + $0x6d4] sm:$0xf]  ;;  %v7447_v2 = vor.u32 %v8410_v10, %v7444_v44  ;;  %v7194_v10 = vld [vmem:[#allocation7 + $0x298] sm:$0xf] }
 0x351   :  { %5014 = vmatpush.bf16.msrb.mxu0 %v6935_v12  ;;  %5038 = vmatpush.bf16.msrb.mxu2 %v7575_v15  ;;  %v7732_v14 = vld [vmem:[#allocation7 + $0x6f0] sm:$0xf0]  ;;  %v7002_v12 = vld [vmem:[#allocation7 + $0x118] sm:$0xf]  ;;  %v7323_v15 = vor.u32 %v8383_v6, %v7322_v41 }
 0x352   :  { %5003 = vmatmul.bf16.vlgmr.msra.gmra.mxu3 %v8964_v46  ;;  %v7735_v32 = vor.u32 %v8482_v5, %v7732_v14  ;;  %v8402_v7 = vld [vmem:[#allocation7 + $0x454] sm:$0xf]  ;;  %v7003_v26 = vor.u32 %v8303_v16, %v7002_v12  ;;  %v8351_v44 = vld [vmem:[#allocation7 + $0x2b4] sm:$0xf0]  ;;  %v8988_v5 = vld [vmem:[%s9071_s8] sm:$0xff] }
 0x353   :  { %5027 = vmatpush.bf16.msrb.mxu1 %v7223_v19  ;;  %5051 = vmatpush.bf16.msrb.mxu3 %v7863_v23  ;;  %v7412_v11 = vld [vmem:[#allocation7 + $0x470] sm:$0xf0]  ;;  %v6874_v41 = vld [vmem:[#allocation7 + $0x18] sm:$0xf]  ;;  %v8323_v12 = vld [vmem:[#allocation7 + $0x1dc] sm:$0xf] }
 0x354   :  { %v8474_v19 = vld [vmem:[#allocation7 + $0x694] sm:$0xf]  ;;  %v7415_v23 = vor.u32 %v8402_v7, %v7412_v11  ;;  %v8431_v7 = vld [vmem:[#allocation7 + $0x534] sm:$0xf0] }
 0x355   :  { %5015 = vmatpush.bf16.msrb.mxu0 %v6903_v31  ;;  %5039 = vmatpush.bf16.msrb.mxu2 %v7543_v36  ;;  %v7700_v21 = vld [vmem:[#allocation7 + $0x6b0] sm:$0xf0]  ;;  %v8295_v31 = vld [vmem:[#allocation7 + $0xf4] sm:$0xf0] }
 0x356   :  { %v8394_v25 = vld [vmem:[#allocation7 + $0x414] sm:$0xf]  ;;  %v7703_v27 = vor.u32 %v8474_v19, %v7700_v21  ;;  %v7610_v36 = vld [vmem:[#allocation7 + $0x5d8] sm:$0xf]  ;;  %v6971_v50 = vor.u32 %v8295_v31, %v6970_v29 }
 0x357   :  { %5028 = vmatpush.bf16.msrb.mxu1 %v7191_v0  ;;  %5052 = vmatpush.bf16.msrb.mxu3 %v7831_v45  ;;  %v7380_v3 = vld [vmem:[#allocation7 + $0x430] sm:$0xf0]  ;;  %v8455_v0 = vld [vmem:[#allocation7 + $0x5f4] sm:$0xf0] }
 0x358   :  { %v8466_v40 = vld [vmem:[#allocation7 + $0x654] sm:$0xf]  ;;  %v8367_v45 = vld [vmem:[#allocation7 + $0x334] sm:$0xf0]  ;;  %v7383_v37 = vor.u32 %v8394_v25, %v7380_v3  ;;  %v7611_v48 = vor.u32 %v8455_v0, %v7610_v36  ;;  %v7068_v36 = vld [vmem:[#allocation7 + $0x1b8] sm:$0xf0] }
 0x359   :  { %5016 = vmatpush.bf16.msrb.mxu0 %v6871_v8  ;;  %5040 = vmatpush.bf16.msrb.mxu2 %v7511_v56  ;;  %v7668_v33 = vld [vmem:[#allocation7 + $0x670] sm:$0xf0]  ;;  %v7259_v8 = vor.u32 %v8367_v45, %v7258_v42  ;;  %v7578_v56 = vld [vmem:[#allocation7 + $0x598] sm:$0xf]  ;;  %v4738_v30 = vpop.f32.mrf.mxu0 }
 0x35a   :  { %v7671_v9 = vor.u32 %v8466_v40, %v7668_v33  ;;  %v8458_v28 = vld [vmem:[#allocation7 + $0x614] sm:$0xf]  ;;  %v7162_v16 = vld [vmem:[#allocation7 + $0x258] sm:$0xf] }
 0x35b   :  { %5029 = vmatpush.bf16.msrb.mxu1 %v7159_v1  ;;  %5053 = vmatpush.bf16.msrb.mxu3 %v7799_v55  ;;  %v7636_v49 = vld [vmem:[#allocation7 + $0x630] sm:$0xf0]  ;;  %v7226_v1 = vld [vmem:[#allocation7 + $0x2d8] sm:$0xf] }
 0x35c   :  { %5017 = vmatmul.bf16.vlgmr.msrb.gmra.mxu0 %v8952_v34  ;;  %v8359_v55 = vld [vmem:[#allocation7 + $0x2f4] sm:$0xf0]  ;;  %v7639_v58 = vor.u32 %v8458_v28, %v7636_v49 }
 0x35d   :  { %5065 = vmatpush.bf16.msra.mxu0 %v7099_v57  ;;  %5041 = vmatpush.bf16.msrb.mxu2 %v7479_v17  ;;  %v8447_v57 = vld [vmem:[#allocation7 + $0x5b4] sm:$0xf0]  ;;  %v7227_v39 = vor.u32 %v8359_v55, %v7226_v1  ;;  %v8307_v1 = vld [vmem:[#allocation7 + $0x15c] sm:$0xf] }
 0x35e   :  { %v7579_v60 = vor.u32 %v8447_v57, %v7578_v56  ;;  %v8279_v17 = vld [vmem:[#allocation7 + $0x74] sm:$0xf0] }
 0x35f   :  { %5030 = vmatpush.bf16.msrb.mxu1 %v7127_v63  ;;  %5054 = vmatpush.bf16.msrb.mxu3 %v7767_v20  ;;  %v7867_v63 = vor.u32 %v8519_v59, %v7866_v38  ;;  %v8439_v20 = vld [vmem:[#allocation7 + $0x574] sm:$0xf0]  ;;  %v4752_v62 = vpop.f32.mrf.mxu1  ;;  %v6907_v14 = vor.u32 %v8279_v17, %v6906_v61  ;;  %v7036_v59 = vld [vmem:[#allocation7 + $0x178] sm:$0xf0] }
 0x360   :  { %v8343_v19 = vld [vmem:[#allocation7 + $0x274] sm:$0xf0] }
 0x361   :  { %5066 = vmatpush.bf16.msra.mxu0 %v7067_v53  ;;  %5042 = vmatpush.bf16.msrb.mxu2 %v7447_v2  ;;  %v7546_v53 = vld [vmem:[#allocation7 + $0x558] sm:$0xf]  ;;  %v7195_v2 = vor.u32 %v8351_v44, %v7194_v10  ;;  %v7163_v29 = vor.u32 %v8343_v19, %v7162_v16  ;;  %v4740_v40 = vpop.f32.mrf.mxu0  ;;  %v8299_v44 = vld [vmem:[#allocation7 + $0x11c] sm:$0xf] }
 0x362   :  { %5031 = vmatmul.bf16.vlgmr.msrb.gmra.mxu1 %v8956_v54  ;;  %v7547_v6 = vor.u32 %v8439_v20, %v7546_v53  ;;  %v7802_v21 = vld [vmem:[#allocation7 + $0x758] sm:$0xf]  ;;  %v7039_v53 = vor.u32 %v8307_v1, %v7036_v59 }
 0x363   :  { %5079 = vmatpush.bf16.msra.mxu1 %v7355_v43  ;;  %5055 = vmatpush.bf16.msrb.mxu3 %v7735_v32  ;;  %v7834_v43 = vld [vmem:[#allocation7 + $0x798] sm:$0xf]  ;;  %v7803_v31 = vor.u32 %v8503_v22, %v7802_v21  ;;  %v8291_v22 = vld [vmem:[#allocation7 + $0xdc] sm:$0xf] }
 0x364   :  { %v7514_v32 = vld [vmem:[#allocation7 + $0x518] sm:$0xf]  ;;  %v7835_v11 = vor.u32 %v8511_v4, %v7834_v43  ;;  %v7004_v4 = vld [vmem:[#allocation7 + $0x138] sm:$0xf0] }
 0x365   :  { %5067 = vmatpush.bf16.msra.mxu0 %v7035_v47  ;;  %5043 = vmatpush.bf16.msrb.mxu2 %v7415_v23  ;;  %v8271_v47 = vld [vmem:[#allocation7 + $0x34] sm:$0xf0]  ;;  %v3433_v23 = vperm.slane %v8988_v5, 0  ;;  %v7515_v25 = vor.u32 %v8431_v7, %v7514_v32  ;;  %v7007_v19 = vor.u32 %v8299_v44, %v7004_v4  ;;  %v7548_v4 = vld [vmem:[#allocation7 + $0x578] sm:$0xf0] }
 0x366   :  { %v6875_v18 = vor.u32 %v8271_v47, %v6874_v41  ;;  %v8423_v3 = vld [vmem:[#allocation7 + $0x4f4] sm:$0xf0]  ;;  %v7292_v47 = vld [vmem:[#allocation7 + $0x378] sm:$0xf0] }
 0x367   :  { %5080 = vmatpush.bf16.msra.mxu1 %v7323_v15  ;;  %5056 = vmatpush.bf16.msrb.mxu3 %v7703_v27  ;;  %v7100_v15 = vld [vmem:[#allocation7 + $0x1f8] sm:$0xf0]  ;;  %v7482_v27 = vld [vmem:[#allocation7 + $0x4d8] sm:$0xf]  ;;  %v4739_v51 = vadd.f32 %v4738_v30, %v3433_v23  ;;  %v4754_v52 = vpop.f32.mrf.mxu1  ;;  %v4741_v32 = vadd.f32 %v4740_v40, %v3433_v23  ;;  %v3434_v40 = vperm.slane %v8988_v5, 1 }
 0x368   :  { %v7130_v0 = vld [vmem:[#allocation7 + $0x218] sm:$0xf]  ;;  %v8379_v30 = vld [vmem:[#allocation7 + $0x39c] sm:$0xf] }
 0x369   :  { %5068 = vmatpush.bf16.msra.mxu0 %v7003_v26  ;;  %5044 = vmatpush.bf16.msrb.mxu2 %v7383_v37  ;;  %v7103_v26 = vor.u32 %v8323_v12, %v7100_v15  ;;  %v8335_v33 = vld [vmem:[#allocation7 + $0x234] sm:$0xf0]  ;;  %v4753_v55 = vadd.f32 %v4752_v62, %v4739_v51  ;;  %v4794_v7 = vpop.f32.mrf.mxu0  ;;  %v6940_v51 = vld [vmem:[#allocation7 + $0xb8] sm:$0xf0] }
 0x36a   :  { %v7770_v42 = vld [vmem:[#allocation7 + $0x718] sm:$0xf]  ;;  %v7131_v56 = vor.u32 %v8335_v33, %v7130_v0  ;;  %v7260_v0 = vld [vmem:[#allocation7 + $0x338] sm:$0xf0]  ;;  %v4795_v59 = vadd.f32 %v4794_v7, %v3434_v40 }
 0x36b   :  { %5081 = vmatpush.bf16.msra.mxu1 %v7291_v35  ;;  %5057 = vmatpush.bf16.msrb.mxu3 %v7671_v9  ;;  %v8315_v35 = vld [vmem:[#allocation7 + $0x19c] sm:$0xf]  ;;  %v8495_v45 = vld [vmem:[#allocation7 + $0x734] sm:$0xf0]  ;;  %v7483_v9 = vor.u32 %v8423_v3, %v7482_v27 }
 0x36c   :  { %5045 = vmatmul.bf16.vlgmr.msrb.gmra.mxu2 %v8960_v13  ;;  %v7771_v57 = vor.u32 %v8495_v45, %v7770_v42  ;;  %v7450_v28 = vld [vmem:[#allocation7 + $0x498] sm:$0xf]  ;;  %v8507_v7 = vld [vmem:[#allocation7 + $0x79c] sm:$0xf] }
 0x36d   :  { %5069 = vmatpush.bf16.msra.mxu0 %v6971_v50  ;;  %5093 = vmatpush.bf16.msra.mxu2 %v7611_v48  ;;  %v8387_v50 = vld [vmem:[#allocation7 + $0x3dc] sm:$0xf]  ;;  %v8415_v49 = vld [vmem:[#allocation7 + $0x4b4] sm:$0xf0] }
 0x36e   :  { %v7356_v48 = vld [vmem:[#allocation7 + $0x3f8] sm:$0xf0]  ;;  %v7451_v61 = vor.u32 %v8415_v49, %v7450_v28  ;;  %v7418_v20 = vld [vmem:[#allocation7 + $0x458] sm:$0xf] }
 0x36f   :  { %5082 = vmatpush.bf16.msra.mxu1 %v7259_v8  ;;  %5058 = vmatpush.bf16.msrb.mxu3 %v7639_v58  ;;  %v4766_v37 = vpop.f32.mrf.mxu2  ;;  %v7071_v8 = vor.u32 %v8315_v35, %v7068_v36  ;;  %v7359_v38 = vor.u32 %v8387_v50, %v7356_v48  ;;  %v7324_v58 = vld [vmem:[#allocation7 + $0x3b8] sm:$0xf0]  ;;  %v8407_v10 = vld [vmem:[#allocation7 + $0x474] sm:$0xf0]  ;;  %v4808_v27 = vpop.f32.mrf.mxu1 }
 0x370   :  { %v7327_v43 = vor.u32 %v8379_v30, %v7324_v58  ;;  %v8479_v41 = vld [vmem:[#allocation7 + $0x6b4] sm:$0xf0]  ;;  %v7419_v12 = vor.u32 %v8407_v10, %v7418_v20  ;;  %v8363_v36 = vld [vmem:[#allocation7 + $0x31c] sm:$0xf] }
 0x371   :  { %5070 = vmatpush.bf16.msra.mxu0 %v6939_v24  ;;  %5094 = vmatpush.bf16.msra.mxu2 %v7579_v60  ;;  %v7738_v24 = vld [vmem:[#allocation7 + $0x6d8] sm:$0xf]  ;;  %v8283_v48 = vld [vmem:[#allocation7 + $0x9c] sm:$0xf]  ;;  %v4796_v20 = vpop.f32.mrf.mxu0 }
 0x372   :  { %5059 = vmatmul.bf16.vlgmr.msrb.gmra.mxu3 %v8964_v46  ;;  %v8487_v60 = vld [vmem:[#allocation7 + $0x6f4] sm:$0xf0]  ;;  %v7868_v30 = vld [vmem:[#allocation7 + $0x7f8] sm:$0xf0]  ;;  %v6943_v58 = vor.u32 %v8283_v48, %v6940_v51 }
 0x373   :  { %5083 = vmatpush.bf16.msra.mxu1 %v7227_v39  ;;  %5107 = vmatpush.bf16.msra.mxu3 %v7867_v63  ;;  %v4767_v39 = vadd.f32 %v4766_v37, %v4753_v55  ;;  %v7739_v63 = vor.u32 %v8487_v60, %v7738_v24  ;;  %v7386_v15 = vld [vmem:[#allocation7 + $0x418] sm:$0xf]  ;;  %v8355_v55 = vld [vmem:[#allocation7 + $0x2dc] sm:$0xf] }
 0x374   :  { %v8399_v16 = vld [vmem:[#allocation7 + $0x434] sm:$0xf0]  ;;  %v8515_v60 = vld [vmem:[#allocation7 + $0x7dc] sm:$0xf] }
 0x375   :  { %5071 = vmatpush.bf16.msra.mxu0 %v6907_v14  ;;  %5095 = vmatpush.bf16.msra.mxu2 %v7547_v6  ;;  %v4780_v17 = vpop.f32.mrf.mxu3  ;;  %v7706_v14 = vld [vmem:[#allocation7 + $0x698] sm:$0xf]  ;;  %v7387_v42 = vor.u32 %v8399_v16, %v7386_v15  ;;  %v8419_v51 = vld [vmem:[#allocation7 + $0x4dc] sm:$0xf] }
 0x376   :  { %v4781_v62 = vadd.f32 %v4780_v17, %v4767_v39  ;;  %v7707_v21 = vor.u32 %v8479_v41, %v7706_v14  ;;  %v8471_v35 = vld [vmem:[#allocation7 + $0x674] sm:$0xf0]  ;;  %v6908_v17 = vld [vmem:[#allocation7 + $0x78] sm:$0xf0]  ;;  %v7871_v41 = vor.u32 %v8515_v60, %v7868_v30 }
 0x377   :  { %5084 = vmatpush.bf16.msra.mxu1 %v7195_v2  ;;  %5108 = vmatpush.bf16.msra.mxu3 %v7835_v11  ;;  %v4768_v6 = vpop.f32.mrf.mxu2  ;;  %v8371_v2 = vld [vmem:[#allocation7 + $0x35c] sm:$0xf]  ;;  %v7642_v28 = vld [vmem:[#allocation7 + $0x618] sm:$0xf] }
 0x378   :  { %v5177_v11 = vsub.f32 0.0, %v4781_v62  ;;  %v7295_v23 = vor.u32 %v8371_v2, %v7292_v47  ;;  %v8463_v1 = vld [vmem:[#allocation7 + $0x634] sm:$0xf0]  ;;  %v7196_v2 = vld [vmem:[#allocation7 + $0x2b8] sm:$0xf0]  ;;  %v4810_v47 = vpop.f32.mrf.mxu1 }
 0x379   :  { %5072 = vmatpush.bf16.msra.mxu0 %v6875_v18  ;;  %5096 = vmatpush.bf16.msra.mxu2 %v7515_v25  ;;  %v6972_v18 = vld [vmem:[#allocation7 + $0xf8] sm:$0xf0]  ;;  %v7643_v44 = vor.u32 %v8463_v1, %v7642_v28  ;;  %v4850_v28 = vpop.f32.mrf.mxu0 }
 0x37a   :  { %v8451_v25 = vld [vmem:[#allocation7 + $0x5dc] sm:$0xf]  ;;  %v5193_v3 = vmul.f32 1.442695, %v5177_v11  ;;  %v6975_v37 = vor.u32 %v8291_v22, %v6972_v18 }
 0x37b   :  { %5085 = vmatpush.bf16.msra.mxu1 %v7163_v29  ;;  %5109 = vmatpush.bf16.msra.mxu3 %v7803_v31  ;;  %v7612_v29 = vld [vmem:[#allocation7 + $0x5f8] sm:$0xf0]  ;;  %v7674_v31 = vld [vmem:[#allocation7 + $0x658] sm:$0xf] }
 0x37c   :  { %5073 = vmatmul.bf16.vlgmr.msra.gmra.mxu0 %v8952_v34  ;;  %8530 = vpow2.f32 %v5193_v3  ;;  %v7615_v50 = vor.u32 %v8451_v25, %v7612_v29  ;;  %v7836_v11 = vld [vmem:[#allocation7 + $0x7b8] sm:$0xf0] }
 0x37d   :  { %5121 = vmatpush.bf16.msrb.mxu0 %v7103_v26  ;;  %5097 = vmatpush.bf16.msra.mxu2 %v7483_v9  ;;  %v4755_v26 = vadd.f32 %v4754_v52, %v4741_v32  ;;  %v4782_v45 = vpop.f32.mrf.mxu3  ;;  %v7675_v9 = vor.u32 %v8471_v35, %v7674_v31  ;;  %v8267_v22 = vld [vmem:[#allocation7 + $0x1c] sm:$0xf]  ;;  %v4797_v31 = vadd.f32 %v4796_v20, %v3434_v40 }
 0x37e   :  { %v6876_v18 = vld [vmem:[#allocation7 + $0x38] sm:$0xf0] }
 0x37f   :  { %5086 = vmatpush.bf16.msra.mxu1 %v7131_v56  ;;  %5110 = vmatpush.bf16.msra.mxu3 %v7771_v57  ;;  %v4769_v33 = vadd.f32 %v4768_v6, %v4755_v26  ;;  %v8443_v56 = vld [vmem:[#allocation7 + $0x59c] sm:$0xf]  ;;  %v4822_v49 = vpop.f32.mrf.mxu2 }
 0x380   :  { %v7580_v57 = vld [vmem:[#allocation7 + $0x5b8] sm:$0xf0] }
 0x381   :  { %5122 = vmatpush.bf16.msrb.mxu0 %v7071_v8  ;;  %5098 = vmatpush.bf16.msra.mxu2 %v7451_v61  ;;  %v4783_v52 = vadd.f32 %v4782_v45, %v4769_v33  ;;  %v7263_v8 = vor.u32 %v8363_v36, %v7260_v0  ;;  %v7583_v39 = vor.u32 %v8443_v56, %v7580_v57  ;;  %v8275_v61 = vld [vmem:[#allocation7 + $0x5c] sm:$0xf] }
 0x382   :  { %5087 = vmatmul.bf16.vlgmr.msra.gmra.mxu1 %v8956_v54  ;;  %v8347_v6 = vld [vmem:[#allocation7 + $0x29c] sm:$0xf]  ;;  %v6911_v15 = vor.u32 %v8275_v61, %v6908_v17  ;;  %v6879_v33 = vor.u32 %v8267_v22, %v6876_v18  ;;  %v4811_v45 = vadd.f32 %v4810_v47, %v4797_v31 }
 0x383   :  { %5135 = vmatpush.bf16.msrb.mxu1 %v7359_v38  ;;  %5111 = vmatpush.bf16.msra.mxu3 %v7739_v63  ;;  %v7228_v38 = vld [vmem:[#allocation7 + $0x2f8] sm:$0xf0]  ;;  %v5185_v24 = vsub.f32 0.0, %v4783_v52  ;;  %v4809_v63 = vadd.f32 %v4808_v27, %v4795_v59  ;;  %v7839_v27 = vor.u32 %v8507_v7, %v7836_v11 }
 0x384   :  { %v7231_v62 = vor.u32 %v8355_v55, %v7228_v38  ;;  %v8427_v25 = vld [vmem:[#allocation7 + $0x51c] sm:$0xf]  ;;  %v3435_v38 = vperm.slane %v8988_v5, 2 }
 0x385   :  { %5123 = vmatpush.bf16.msrb.mxu0 %v7039_v53  ;;  %5099 = vmatpush.bf16.msra.mxu2 %v7419_v12  ;;  %v8531_v53 = vpop.eup %8530  ;;  %v5209_v10 = vmul.f32 1.442695, %v5185_v24  ;;  %v4823_v32 = vadd.f32 %v4822_v49, %v4809_v63  ;;  %v4836_v12 = vpop.f32.mrf.mxu3  ;;  %v7516_v3 = vld [vmem:[#allocation7 + $0x538] sm:$0xf0] }
 0x386   :  { %v5225_v14 = vadd.f32 1.0, %v8531_v53  ;;  %v7164_v29 = vld [vmem:[#allocation7 + $0x278] sm:$0xf0]  ;;  %v4864_v24 = vpop.f32.mrf.mxu1 }
 0x387   :  { %5136 = vmatpush.bf16.msrb.mxu1 %v7327_v43  ;;  %5112 = vmatpush.bf16.msra.mxu3 %v7707_v21  ;;  %v8435_v43 = vld [vmem:[#allocation7 + $0x55c] sm:$0xf]  ;;  %8532 = vpow2.f32 %v5209_v10  ;;  %v4837_v16 = vadd.f32 %v4836_v12, %v4823_v32  ;;  %v7199_v21 = vor.u32 %v8347_v6, %v7196_v2  ;;  %v4824_v26 = vpop.f32.mrf.mxu2  ;;  %v4852_v12 = vpop.f32.mrf.mxu0 }
 0x388   :  { %8534 = vrcp.f32 %v5225_v14  ;;  %v8499_v36 = vld [vmem:[#allocation7 + $0x75c] sm:$0xf]  ;;  %v4825_v49 = vadd.f32 %v4824_v26, %v4811_v45 }
 0x389   :  { %5124 = vmatpush.bf16.msrb.mxu0 %v7007_v19  ;;  %5100 = vmatpush.bf16.msra.mxu2 %v7387_v42  ;;  %v7551_v19 = vor.u32 %v8435_v43, %v7548_v4  ;;  %v5178_v35 = vsub.f32 0.0, %v4837_v16  ;;  %v7804_v0 = vld [vmem:[#allocation7 + $0x778] sm:$0xf0] }
 0x38a   :  { %v7484_v52 = vld [vmem:[#allocation7 + $0x4f8] sm:$0xf0]  ;;  %v7807_v40 = vor.u32 %v8499_v36, %v7804_v0 }
 0x38b   :  { %5137 = vmatpush.bf16.msrb.mxu1 %v7295_v23  ;;  %5113 = vmatpush.bf16.msra.mxu3 %v7675_v9  ;;  %v8339_v23 = vld [vmem:[#allocation7 + $0x25c] sm:$0xf]  ;;  %v7487_v30 = vor.u32 %v8419_v51, %v7484_v52 }
 0x38c   :  { %5101 = vmatmul.bf16.vlgmr.msra.gmra.mxu2 %v8960_v13  ;;  %v7167_v48 = vor.u32 %v8339_v23, %v7164_v29  ;;  %v8331_v56 = vld [vmem:[#allocation7 + $0x21c] sm:$0xf] }
 0x38d   :  { %5125 = vmatpush.bf16.msrb.mxu0 %v6975_v37  ;;  %5149 = vmatpush.bf16.msrb.mxu2 %v7615_v50  ;;  %v8533_v42 = vpop.eup %8532  ;;  %v5195_v37 = vmul.f32 1.442695, %v5178_v35  ;;  %v7519_v50 = vor.u32 %v8427_v25, %v7516_v3  ;;  %v7132_v57 = vld [vmem:[#allocation7 + $0x238] sm:$0xf0]  ;;  %v4838_v59 = vpop.f32.mrf.mxu3  ;;  %v4853_v3 = vadd.f32 %v4852_v12, %v3435_v38 }
 0x38e   :  { %v8535_v9 = vpop.eup %8534  ;;  %v8491_v1 = vld [vmem:[#allocation7 + $0x71c] sm:$0xf]  ;;  %v4839_v60 = vadd.f32 %v4838_v59, %v4825_v49  ;;  %v4866_v25 = vpop.f32.mrf.mxu1  ;;  %v3436_v49 = vperm.slane %v8988_v5, 3 }
 0x38f   :  { %5138 = vmatpush.bf16.msrb.mxu1 %v7263_v8  ;;  %5114 = vmatpush.bf16.msra.mxu3 %v7643_v44  ;;  %v5233_v8 = vadd.f32 1.0, %v8533_v42  ;;  %5257 = vst [vmem:[%s9072_s9] sm:$0xff] %v8535_v9  ;;  %8536 = vpow2.f32 %v5195_v37  ;;  %v7772_v55 = vld [vmem:[#allocation7 + $0x738] sm:$0xf0]  ;;  %v4878_v63 = vpop.f32.mrf.mxu2  ;;  %v4851_v44 = vadd.f32 %v4850_v28, %v3435_v38 }
 0x390   :  { %v8411_v61 = vld [vmem:[#allocation7 + $0x49c] sm:$0xf]  ;;  %v5186_v53 = vsub.f32 0.0, %v4839_v60 }
 0x391   :  { %5126 = vmatpush.bf16.msrb.mxu0 %v6943_v58  ;;  %5150 = vmatpush.bf16.msrb.mxu2 %v7583_v39  ;;  %8538 = vrcp.f32 %v5233_v8  ;;  %v7135_v58 = vor.u32 %v8331_v56, %v7132_v57  ;;  %v7775_v39 = vor.u32 %v8491_v1, %v7772_v55  ;;  %v7452_v17 = vld [vmem:[#allocation7 + $0x4b8] sm:$0xf0] }
 0x392   :  { %5115 = vmatmul.bf16.vlgmr.msra.gmra.mxu3 %v8964_v46  ;;  %v8483_v20 = vld [vmem:[#allocation7 + $0x6dc] sm:$0xf]  ;;  %v5211_v43 = vmul.f32 1.442695, %v5186_v53  ;;  %v7455_v4 = vor.u32 %v8411_v61, %v7452_v17 }
 0x393   :  { %5139 = vmatpush.bf16.msrb.mxu1 %v7231_v62  ;;  %5163 = vmatpush.bf16.msrb.mxu3 %v7871_v41  ;;  %v7740_v10 = vld [vmem:[#allocation7 + $0x6f8] sm:$0xf0]  ;;  %v4865_v41 = vadd.f32 %v4864_v24, %v4851_v44 }
 0x394   :  { %v7743_v2 = vor.u32 %v8483_v20, %v7740_v10  ;;  %v8403_v47 = vld [vmem:[#allocation7 + $0x45c] sm:$0xf]  ;;  %8540 = vpow2.f32 %v5211_v43 }
 0x395   :  { %5127 = vmatpush.bf16.msrb.mxu0 %v6911_v15  ;;  %5151 = vmatpush.bf16.msrb.mxu2 %v7551_v19  ;;  %v8537_v62 = vpop.eup %8536  ;;  %v7420_v32 = vld [vmem:[#allocation7 + $0x478] sm:$0xf0]  ;;  %v4879_v11 = vadd.f32 %v4878_v63, %v4865_v41  ;;  %v4892_v15 = vpop.f32.mrf.mxu3 }
 0x396   :  { %v5226_v6 = vadd.f32 1.0, %v8537_v62  ;;  %v7708_v7 = vld [vmem:[#allocation7 + $0x6b8] sm:$0xf0]  ;;  %v7423_v16 = vor.u32 %v8403_v47, %v7420_v32 }
 0x397   :  { %5140 = vmatpush.bf16.msrb.mxu1 %v7199_v21  ;;  %5164 = vmatpush.bf16.msrb.mxu3 %v7839_v27  ;;  %v8539_v14 = vpop.eup %8538  ;;  %v4893_v19 = vadd.f32 %v4892_v15, %v4879_v11  ;;  %v8395_v22 = vld [vmem:[#allocation7 + $0x41c] sm:$0xf]  ;;  %v4880_v31 = vpop.f32.mrf.mxu2 }
 0x398   :  { %5265 = vst [vmem:[%s9072_s9 + $0x40] sm:$0xff] %v8539_v14  ;;  %8542 = vrcp.f32 %v5226_v6  ;;  %v7388_v18 = vld [vmem:[#allocation7 + $0x438] sm:$0xf0] }
 0x399   :  { %5128 = vmatpush.bf16.msrb.mxu0 %v6879_v33  ;;  %5152 = vmatpush.bf16.msrb.mxu2 %v7519_v50  ;;  %v8467_v26 = vld [vmem:[#allocation7 + $0x65c] sm:$0xf]  ;;  %v5179_v23 = vsub.f32 0.0, %v4893_v19  ;;  %v7391_v35 = vor.u32 %v8395_v22, %v7388_v18  ;;  %v4906_v28 = vpop.f32.mrf.mxu0 }
 0x39a   :  { %v7676_v27 = vld [vmem:[#allocation7 + $0x678] sm:$0xf0]  ;;  %v8541_v29 = vpop.eup %8540  ;;  %v4907_v24 = vadd.f32 %v4906_v28, %v3436_v49 }
 0x39b   :  { %5141 = vmatpush.bf16.msrb.mxu1 %v7167_v48  ;;  %5165 = vmatpush.bf16.msrb.mxu3 %v7807_v40  ;;  %v5234_v0 = vadd.f32 1.0, %v8541_v29  ;;  %v5197_v33 = vmul.f32 1.442695, %v5179_v23  ;;  %v7679_v42 = vor.u32 %v8467_v26, %v7676_v27  ;;  %v8459_v45 = vld [vmem:[#allocation7 + $0x61c] sm:$0xf] }
 0x39c   :  { %5129 = vmatmul.bf16.vlgmr.msrb.gmra.mxu0 %v8952_v34  ;;  %v8475_v34 = vld [vmem:[#allocation7 + $0x69c] sm:$0xf] }
 0x39d   :  { %5153 = vmatpush.bf16.msrb.mxu2 %v7487_v30  ;;  %v7711_v21 = vor.u32 %v8475_v34, %v7708_v7  ;;  %v7644_v37 = vld [vmem:[#allocation7 + $0x638] sm:$0xf0]  ;;  %8544 = vrcp.f32 %v5234_v0  ;;  %v4894_v48 = vpop.f32.mrf.mxu3  ;;  %v3437_v34 = vperm.slane %v8988_v5, 4 }
 0x39e   :  { %v8543_v36 = vpop.eup %8542  ;;  %8546 = vpow2.f32 %v5197_v33  ;;  %v7647_v52 = vor.u32 %v8459_v45, %v7644_v37 }
 0x39f   :  { %5142 = vmatpush.bf16.msrb.mxu1 %v7135_v58  ;;  %5166 = vmatpush.bf16.msrb.mxu3 %v7775_v39  ;;  %5258 = vst [vmem:[%s9072_s9 + $0x8] sm:$0xff] %v8543_v36  ;;  %v4920_v1 = vpop.f32.mrf.mxu1 }
 0x3a0   :  { %v4921_v60 = vadd.f32 %v4920_v1, %v4907_v24 }
 0x3a1   :  { %5154 = vmatpush.bf16.msrb.mxu2 %v7455_v4  ;;  %v4908_v58 = vpop.f32.mrf.mxu0 }
 0x3a2   :  { %5143 = vmatmul.bf16.vlgmr.msrb.gmra.mxu1 %v8956_v54  ;;  %v4867_v54 = vadd.f32 %v4866_v25, %v4853_v3  ;;  %v4909_v53 = vadd.f32 %v4908_v58, %v3436_v49 }
 0x3a3   :  { %5167 = vmatpush.bf16.msrb.mxu3 %v7743_v2  ;;  %v8545_v8 = vpop.eup %8544 }
 0x3a4   :  { %v4881_v50 = vadd.f32 %v4880_v31, %v4867_v54  ;;  %v8547_v56 = vpop.eup %8546  ;;  %5266 = vst [vmem:[%s9072_s9 + $0x48] sm:$0xff] %v8545_v8 }
 0x3a5   :  { %5155 = vmatpush.bf16.msrb.mxu2 %v7423_v16  ;;  %v5227_v57 = vadd.f32 1.0, %v8547_v56 }
 0x3a6   :  { %v4895_v51 = vadd.f32 %v4894_v48, %v4881_v50 }
 0x3a7   :  { %5168 = vmatpush.bf16.msrb.mxu3 %v7711_v21  ;;  %v4922_v17 = vpop.f32.mrf.mxu1 }
 0x3a8   :  { %v5187_v9 = vsub.f32 0.0, %v4895_v51  ;;  %v4923_v10 = vadd.f32 %v4922_v17, %v4909_v53  ;;  %v3438_v51 = vperm.slane %v8988_v5, 5 }
 0x3a9   :  { %5156 = vmatpush.bf16.msrb.mxu2 %v7391_v35 }
 0x3aa   :  { %v5213_v40 = vmul.f32 1.442695, %v5187_v9 }
 0x3ab   :  { %5169 = vmatpush.bf16.msrb.mxu3 %v7679_v42 }
 0x3ac   :  { %5157 = vmatmul.bf16.vlgmr.msrb.gmra.mxu2 %v8960_v13  ;;  %8548 = vpow2.f32 %v5213_v40 }
 0x3ad   :  { %8550 = vrcp.f32 %v5227_v57 }
 0x3af   :  { %5170 = vmatpush.bf16.msrb.mxu3 %v7647_v52  ;;  %v4934_v38 = vpop.f32.mrf.mxu2 }
 0x3b0   :  { %v4935_v30 = vadd.f32 %v4934_v38, %v4921_v60 }
 0x3b2   :  { %5171 = vmatmul.bf16.vlgmr.msrb.gmra.mxu3 %v8964_v46  ;;  %v8549_v55 = vpop.eup %8548 }
 0x3b3   :  { %v5235_v13 = vadd.f32 1.0, %v8549_v55  ;;  %v8551_v59 = vpop.eup %8550 }
 0x3b4   :  { %5259 = vst [vmem:[%s9072_s9 + $0x10] sm:$0xff] %v8551_v59 }
 0x3b5   :  { %8552 = vrcp.f32 %v5235_v13  ;;  %v4948_v39 = vpop.f32.mrf.mxu3 }
 0x3b6   :  { %v4949_v46 = vadd.f32 %v4948_v39, %v4935_v30 }
 0x3b7   :  { %v4936_v20 = vpop.f32.mrf.mxu2 }
 0x3b8   :  { %v5180_v63 = vsub.f32 0.0, %v4949_v46  ;;  %v4937_v62 = vadd.f32 %v4936_v20, %v4923_v10 }
 0x3b9   :  { %v4962_v47 = vpop.f32.mrf.mxu0 }
 0x3ba   :  { %v5199_v44 = vmul.f32 1.442695, %v5180_v63  ;;  %v4963_v16 = vadd.f32 %v4962_v47, %v3437_v34 }
 0x3bb   :  { %v8553_v61 = vpop.eup %8552 }
 0x3bc   :  { %5267 = vst [vmem:[%s9072_s9 + $0x50] sm:$0xff] %v8553_v61  ;;  %8554 = vpow2.f32 %v5199_v44 }
 0x3bd   :  { %v4950_v43 = vpop.f32.mrf.mxu3 }
 0x3be   :  { %v4951_v4 = vadd.f32 %v4950_v43, %v4937_v62  ;;  %v3439_v62 = vperm.slane %v8988_v5, 6 }
 0x3bf   :  { %v4976_v11 = vpop.f32.mrf.mxu1 }
 0x3c0   :  { %v5188_v14 = vsub.f32 0.0, %v4951_v4  ;;  %v4977_v19 = vadd.f32 %v4976_v11, %v4963_v16 }
 0x3c1   :  { %v4964_v18 = vpop.f32.mrf.mxu0 }
 0x3c2   :  { %v8555_v41 = vpop.eup %8554  ;;  %v5215_v6 = vmul.f32 1.442695, %v5188_v14  ;;  %v4965_v3 = vadd.f32 %v4964_v18, %v3437_v34 }
 0x3c3   :  { %v5228_v2 = vadd.f32 1.0, %v8555_v41 }
 0x3c4   :  { %8556 = vpow2.f32 %v5215_v6 }
 0x3c5   :  { %8558 = vrcp.f32 %v5228_v2 }
 0x3c7   :  { %v4978_v27 = vpop.f32.mrf.mxu1 }
 0x3c8   :  { %v4979_v31 = vadd.f32 %v4978_v27, %v4965_v3 }
 0x3ca   :  { %v8557_v32 = vpop.eup %8556 }
 0x3cb   :  { %v8559_v7 = vpop.eup %8558  ;;  %v5236_v12 = vadd.f32 1.0, %v8557_v32 }
 0x3cc   :  { %5260 = vst [vmem:[%s9072_s9 + $0x18] sm:$0xff] %v8559_v7 }
 0x3cd   :  { %8560 = vrcp.f32 %v5236_v12 }
 0x3cf   :  { %v4990_v15 = vpop.f32.mrf.mxu2 }
 0x3d0   :  { %v4991_v21 = vadd.f32 %v4990_v15, %v4977_v19 }
 0x3d3   :  { %v8561_v22 = vpop.eup %8560 }
 0x3d4   :  { %5268 = vst [vmem:[%s9072_s9 + $0x58] sm:$0xff] %v8561_v22 }
 0x3d5   :  { %v5004_v25 = vpop.f32.mrf.mxu3 }
 0x3d6   :  { %v5005_v26 = vadd.f32 %v5004_v25, %v4991_v21 }
 0x3d7   :  { %v4992_v29 = vpop.f32.mrf.mxu2 }
 0x3d8   :  { %v5181_v23 = vsub.f32 0.0, %v5005_v26  ;;  %v4993_v36 = vadd.f32 %v4992_v29, %v4979_v31 }
 0x3d9   :  { %v5018_v50 = vpop.f32.mrf.mxu0 }
 0x3da   :  { %v5201_v35 = vmul.f32 1.442695, %v5181_v23  ;;  %v5019_v56 = vadd.f32 %v5018_v50, %v3438_v51 }
 0x3dc   :  { %8562 = vpow2.f32 %v5201_v35  ;;  %v3440_v35 = vperm.slane %v8988_v5, 7 }
 0x3dd   :  { %v5006_v54 = vpop.f32.mrf.mxu3 }
 0x3de   :  { %v5007_v0 = vadd.f32 %v5006_v54, %v4993_v36 }
 0x3df   :  { %v5032_v9 = vpop.f32.mrf.mxu1 }
 0x3e0   :  { %v5189_v33 = vsub.f32 0.0, %v5007_v0  ;;  %v5033_v57 = vadd.f32 %v5032_v9, %v5019_v56 }
 0x3e1   :  { %v5020_v1 = vpop.f32.mrf.mxu0 }
 0x3e2   :  { %v8563_v42 = vpop.eup %8562  ;;  %v5217_v45 = vmul.f32 1.442695, %v5189_v33  ;;  %v5021_v59 = vadd.f32 %v5020_v1, %v3438_v51 }
 0x3e3   :  { %v5229_v37 = vadd.f32 1.0, %v8563_v42 }
 0x3e4   :  { %8564 = vpow2.f32 %v5217_v45 }
 0x3e5   :  { %8566 = vrcp.f32 %v5229_v37 }
 0x3e7   :  { %v5034_v38 = vpop.f32.mrf.mxu1 }
 0x3e8   :  { %v5035_v30 = vadd.f32 %v5034_v38, %v5021_v59 }
 0x3ea   :  { %v8565_v48 = vpop.eup %8564 }
 0x3eb   :  { %v8567_v52 = vpop.eup %8566  ;;  %v5237_v8 = vadd.f32 1.0, %v8565_v48 }
 0x3ec   :  { %5261 = vst [vmem:[%s9072_s9 + $0x20] sm:$0xff] %v8567_v52 }
 0x3ed   :  { %8568 = vrcp.f32 %v5237_v8 }
 0x3ef   :  { %v5046_v40 = vpop.f32.mrf.mxu2 }
 0x3f0   :  { %v5047_v28 = vadd.f32 %v5046_v40, %v5033_v57 }
 0x3f3   :  { %v8569_v49 = vpop.eup %8568 }
 0x3f4   :  { %5269 = vst [vmem:[%s9072_s9 + $0x60] sm:$0xff] %v8569_v49 }
 0x3f5   :  { %v5060_v55 = vpop.f32.mrf.mxu3 }
 0x3f6   :  { %v5061_v13 = vadd.f32 %v5060_v55, %v5047_v28 }
 0x3f7   :  { %v5048_v60 = vpop.f32.mrf.mxu2 }
 0x3f8   :  { %v5182_v24 = vsub.f32 0.0, %v5061_v13  ;;  %v5049_v39 = vadd.f32 %v5048_v60, %v5035_v30 }
 0x3f9   :  { %v5074_v10 = vpop.f32.mrf.mxu0 }
 0x3fa   :  { %v5203_v58 = vmul.f32 1.442695, %v5182_v24  ;;  %v5075_v6 = vadd.f32 %v5074_v10, %v3439_v62 }
 0x3fc   :  { %8570 = vpow2.f32 %v5203_v58 }
 0x3fd   :  { %v5062_v46 = vpop.f32.mrf.mxu3 }
 0x3fe   :  { %v5063_v61 = vadd.f32 %v5062_v46, %v5049_v39 }
 0x3ff   :  { %v5088_v4 = vpop.f32.mrf.mxu1 }
 0x400   :  { %v5190_v17 = vsub.f32 0.0, %v5063_v61  ;;  %v5089_v2 = vadd.f32 %v5088_v4, %v5075_v6 }
 0x401   :  { %v5076_v34 = vpop.f32.mrf.mxu0 }
 0x402   :  { %v8571_v53 = vpop.eup %8570  ;;  %v5219_v63 = vmul.f32 1.442695, %v5190_v17  ;;  %v5077_v15 = vadd.f32 %v5076_v34, %v3439_v62 }
 0x403   :  { %v5230_v20 = vadd.f32 1.0, %v8571_v53 }
 0x404   :  { %8572 = vpow2.f32 %v5219_v63 }
 0x405   :  { %8574 = vrcp.f32 %v5230_v20 }
 0x407   :  { %v5090_v12 = vpop.f32.mrf.mxu1 }
 0x408   :  { %v5091_v21 = vadd.f32 %v5090_v12, %v5077_v15 }
 0x40a   :  { %v8573_v44 = vpop.eup %8572 }
 0x40b   :  { %v8575_v43 = vpop.eup %8574  ;;  %v5238_v14 = vadd.f32 1.0, %v8573_v44 }
 0x40c   :  { %5262 = vst [vmem:[%s9072_s9 + $0x28] sm:$0xff] %v8575_v43 }
 0x40d   :  { %8576 = vrcp.f32 %v5238_v14 }
 0x40f   :  { %v5102_v41 = vpop.f32.mrf.mxu2 }
 0x410   :  { %v5103_v47 = vadd.f32 %v5102_v41, %v5089_v2 }
 0x413   :  { %v8577_v32 = vpop.eup %8576 }
 0x414   :  { %5270 = vst [vmem:[%s9072_s9 + $0x68] sm:$0xff] %v8577_v32 }
 0x415   :  { %v5116_v7 = vpop.f32.mrf.mxu3 }
 0x416   :  { %v5117_v11 = vadd.f32 %v5116_v7, %v5103_v47 }
 0x417   :  { %v5104_v19 = vpop.f32.mrf.mxu2 }
 0x418   :  { %v5183_v16 = vsub.f32 0.0, %v5117_v11  ;;  %v5105_v18 = vadd.f32 %v5104_v19, %v5091_v21 }
 0x419   :  { %v5130_v31 = vpop.f32.mrf.mxu0 }
 0x41a   :  { %v5205_v22 = vmul.f32 1.442695, %v5183_v16  ;;  %v5131_v42 = vadd.f32 %v5130_v31, %v3440_v35 }
 0x41c   :  { %8578 = vpow2.f32 %v5205_v22 }
 0x41d   :  { %v5118_v25 = vpop.f32.mrf.mxu3 }
 0x41e   :  { %v5119_v26 = vadd.f32 %v5118_v25, %v5105_v18 }
 0x41f   :  { %v5144_v54 = vpop.f32.mrf.mxu1 }
 0x420   :  { %v5191_v27 = vsub.f32 0.0, %v5119_v26  ;;  %v5145_v37 = vadd.f32 %v5144_v54, %v5131_v42 }
 0x421   :  { %v5132_v48 = vpop.f32.mrf.mxu0 }
 0x422   :  { %v8579_v3 = vpop.eup %8578  ;;  %v5221_v23 = vmul.f32 1.442695, %v5191_v27  ;;  %v5133_v8 = vadd.f32 %v5132_v48, %v3440_v35 }
 0x423   :  { %v5231_v29 = vadd.f32 1.0, %v8579_v3 }
 0x424   :  { %8580 = vpow2.f32 %v5221_v23 }
 0x425   :  { %8582 = vrcp.f32 %v5231_v29 }
 0x427   :  { %v5146_v5 = vpop.f32.mrf.mxu1 }
 0x428   :  { %v5147_v57 = vadd.f32 %v5146_v5, %v5133_v8 }
 0x42a   :  { %v8581_v36 = vpop.eup %8580 }
 0x42b   :  { %v8583_v0 = vpop.eup %8582  ;;  %v5239_v33 = vadd.f32 1.0, %v8581_v36 }
 0x42c   :  { %5263 = vst [vmem:[%s9072_s9 + $0x30] sm:$0xff] %v8583_v0 }
 0x42d   :  { %8584 = vrcp.f32 %v5239_v33 }
 0x42f   :  { %v5158_v45 = vpop.f32.mrf.mxu2 }
 0x430   :  { %v5159_v50 = vadd.f32 %v5158_v45, %v5145_v37 }
 0x433   :  { %v8585_v52 = vpop.eup %8584 }
 0x434   :  { %5271 = vst [vmem:[%s9072_s9 + $0x70] sm:$0xff] %v8585_v52 }
 0x435   :  { %v5172_v51 = vpop.f32.mrf.mxu3 }
 0x436   :  { %v5173_v9 = vadd.f32 %v5172_v51, %v5159_v50 }
 0x437   :  { %v5160_v56 = vpop.f32.mrf.mxu2 }
 0x438   :  { %v5184_v40 = vsub.f32 0.0, %v5173_v9  ;;  %v5161_v49 = vadd.f32 %v5160_v56, %v5147_v57 }
 0x43a   :  { %v5207_v28 = vmul.f32 1.442695, %v5184_v40 }
 0x43c   :  { %8586 = vpow2.f32 %v5207_v28 }
 0x43d   :  { %v5174_v1 = vpop.f32.mrf.mxu3 }
 0x43e   :  { %v5175_v55 = vadd.f32 %v5174_v1, %v5161_v49 }
 0x440   :  { %v5192_v13 = vsub.f32 0.0, %v5175_v55 }
 0x442   :  { %v8587_v38 = vpop.eup %8586  ;;  %v5223_v59 = vmul.f32 1.442695, %v5192_v13 }
 0x443   :  { %v5232_v24 = vadd.f32 1.0, %v8587_v38 }
 0x444   :  { %8588 = vpow2.f32 %v5223_v59 }
 0x445   :  { %8590 = vrcp.f32 %v5232_v24 }
 0x44a   :  { %v8589_v60 = vpop.eup %8588 }
 0x44b   :  { %v8591_v30 = vpop.eup %8590  ;;  %v5240_v58 = vadd.f32 1.0, %v8589_v60 }
 0x44c   :  { %5264 = vst [vmem:[%s9072_s9 + $0x38] sm:$0xff] %v8591_v30 }
 0x44d   :  { %8592 = vrcp.f32 %v5240_v58 }
 0x453   :  { %v8593_v39 = vpop.eup %8592 }
 0x454   :  { %5272 = vst [vmem:[%s9072_s9 + $0x78] sm:$0xff] %v8593_v39 }
 0x455   :  { %5277 = vsyncpa [#allocation3], 1 }
 0x456   :  { %5278 = vsyncpa [#allocation5], 1 }
 0x457   :  { %5279 = vsyncpa [#allocation8], 1 }

</bundles_post_ra>
